<compile_context>
chip_gen: v5e
topology: v5e:2x2
jax: 0.10.0
libtpu: 0.0.40
codegen_flags: <defaults>
</compile_context>

<pallas_src>
import functools

import jax
import jax.numpy as jnp
from jax.experimental import pallas as pl
from jax.experimental.pallas import tpu as pltpu

ALPHA = 1.0
GAMMA = 2.0            # baked in: (1 - pt)**2 is done with a plain multiply

LANE = 128             # lane width (last dim of every tile)
SUBLANE = 8            # f32 sublanes per vreg
CHUNK_ROWS = 256       # rows per inner accumulation chunk


def _cdiv(a, b):
    return -(-a // b)


def _round_up(a, b):
    return _cdiv(a, b) * b


def _tpu_generation():
    """Best-effort TPU generation detection (0 = unknown -> conservative)."""
    try:
        kind = jax.devices()[0].device_kind.lower()
    except Exception:
        return 0
    if "v7" in kind or "7x" in kind:
        return 7
    if "v6" in kind:
        return 6
    if "v5" in kind:
        return 5
    return 0


def _focal_elementwise(x, t, binary_targets):
    """Elementwise focal loss in f32 (shared by both kernels)."""
    x = x.astype(jnp.float32)
    t = t.astype(jnp.float32)
    e = jnp.exp(-jnp.abs(x))                                   # EUP #1 (reused)
    bce = jnp.maximum(x, 0.0) - x * t + jnp.log1p(e)           # EUP #2
    if binary_targets:
        # Exact algebra for t in {0,1}:
        #   exp(-BCE) == sigmoid(x)  if t == 1
        #             == sigmoid(-x) if t == 0
        # both expressible with the already-computed e = exp(-|x|):
        #   numerator = 1 when sign(x) "matches" the label, else e;  pt = num/(1+e)
        num = jnp.where(t >= 0.5,
                        jnp.where(x >= 0.0, 1.0, e),
                        jnp.where(x >= 0.0, e, 1.0))
        denom = 1.0 + e
        r = pl.reciprocal(denom, approx=True)                  # cheap EUP rcp
        r = r * (2.0 - denom * r)                              # 1 Newton step -> ~f32 exact
        pt = num * r
    else:
        pt = jnp.exp(-bce)                                     # soft-target fallback
    one_m_pt = 1.0 - pt
    return (ALPHA * bce) * (one_m_pt * one_m_pt)               # gamma == 2 -> multiply


def _focal_sum_kernel(x_ref, t_ref, out_ref, *, tile_rows, tiles_per_split,
                      n_valid, binary_targets):
    """grid = (num_splits, tiles_per_split); out block (8,128) is a per-split
    partial-sum accumulator, resident across the 'arbitrary' inner axis."""
    s = pl.program_id(0)
    i = pl.program_id(1)

    @pl.when(i == 0)
    def _init():
        out_ref[...] = jnp.zeros_like(out_ref)

    # Logical (unclamped) tile index -> used for masking. The DMA uses a
    # clamped block index (see index_map), so duplicated/fully-OOB tiles simply
    # contribute zero.
    tile_idx = s * tiles_per_split + i

    # Hoisted iota: global element id = row * 128 + lane (computed once).
    base_elem = (jax.lax.broadcasted_iota(jnp.int32, (CHUNK_ROWS, LANE), 0) * LANE
                 + jax.lax.broadcasted_iota(jnp.int32, (CHUNK_ROWS, LANE), 1))

    n_chunks = tile_rows // CHUNK_ROWS

    def body(c, acc):
        r = pl.multiple_of(c * CHUNK_ROWS, CHUNK_ROWS)
        loss = _focal_elementwise(x_ref[pl.ds(r, CHUNK_ROWS), :],
                                  t_ref[pl.ds(r, CHUNK_ROWS), :],
                                  binary_targets)
        elem0 = (tile_idx * tile_rows + r) * LANE
        loss = jnp.where(base_elem + elem0 < n_valid, loss, 0.0)
        # vreg-aligned partial reduce: pure VPU adds, no per-chunk XLU reduce.
        return acc + jnp.sum(loss.reshape(CHUNK_ROWS // SUBLANE, SUBLANE, LANE),
                             axis=0)

    acc = jax.lax.fori_loop(0, n_chunks, body,
                            jnp.zeros((SUBLANE, LANE), jnp.float32),
                            unroll=(n_chunks <= 16))
    out_ref[...] += acc


def _focal_map_kernel(x_ref, t_ref, o_ref, *, tile_rows, binary_targets):
    """Per-element loss map; chunked so temps never exceed ~a few hundred KiB."""
    n_chunks = tile_rows // CHUNK_ROWS

    @pl.loop(0, n_chunks)
    def _chunk(c):
        r = pl.multiple_of(c * CHUNK_ROWS, CHUNK_ROWS)
        loss = _focal_elementwise(x_ref[pl.ds(r, CHUNK_ROWS), :],
                                  t_ref[pl.ds(r, CHUNK_ROWS), :],
                                  binary_targets)
        o_ref[pl.ds(r, CHUNK_ROWS), :] = loss.astype(o_ref.dtype)


def _prep_inputs(inputs, targets, binary_targets):
    """Flatten to a lane-dense (rows, 128) view.  Only the final (<128 elem)
    sub-row is ever physically padded; ragged row counts are left to the grid
    (partial last block) and masked / discarded in-kernel."""
    n = inputs.size
    x = inputs.reshape(-1)
    t = targets.reshape(-1)
    if binary_targets and t.dtype != jnp.bfloat16:
        t = t.astype(jnp.bfloat16)       # exact for {0,1}; halves target bytes
    rows = _cdiv(n, LANE)
    pad = rows * LANE - n
    if pad:
        # TODO(synk): a 1-D BlockSpec path could avoid even this (<128 element)
        # padded copy; padded elements are masked (mean) / sliced off (none).
        x = jnp.concatenate([x, jnp.zeros((pad,), x.dtype)])
        t = jnp.concatenate([t, jnp.zeros((pad,), t.dtype)])
    return x.reshape(rows, LANE), t.reshape(rows, LANE), rows, n


def focal_loss(inputs: jax.Array, targets: jax.Array, reduction: str = "mean",
               binary_targets: bool = True) -> jax.Array:
    """Pallas implementation of FocalLoss(alpha=1.0, gamma=2.0).forward.

    binary_targets=True assumes t in {0,1} (exact bf16 cast + algebraic pt);
    set False for soft targets to use the exact exp(-BCE) reference path.
    """
    assert inputs.shape == targets.shape
    gen = _tpu_generation()
    x2d, t2d, rows, n = _prep_inputs(inputs, targets, binary_targets)

    if reduction == "mean":
        max_rows = {7: 8192, 6: 4096}.get(gen, 2048)
        tile_rows = min(max_rows, _round_up(rows, CHUNK_ROWS))
        num_tiles = _cdiv(rows, tile_rows)
        num_splits = 2 if (gen == 7 and num_tiles >= 2) else 1
        tiles_per_split = _cdiv(num_tiles, num_splits)

        def in_map(s, i):
            # Clamp so the DMA never starts out of bounds (odd tile counts with
            # a 2-way split); the kernel masks the duplicated tile to zero.
            return (jnp.minimum(s * tiles_per_split + i, num_tiles - 1), 0)

        kernel = functools.partial(
            _focal_sum_kernel, tile_rows=tile_rows,
            tiles_per_split=tiles_per_split, n_valid=n,
            binary_targets=binary_targets)

        partial_sums = pl.pallas_call(
            kernel,
            out_shape=jax.ShapeDtypeStruct((num_splits * SUBLANE, LANE),
                                           jnp.float32),
            grid_spec=pltpu.PrefetchScalarGridSpec(
                num_scalar_prefetch=0,
                grid=(num_splits, tiles_per_split),
                in_specs=[
                    pl.BlockSpec((tile_rows, LANE), in_map),
                    pl.BlockSpec((tile_rows, LANE), in_map),
                ],
                out_specs=pl.BlockSpec((SUBLANE, LANE), lambda s, i: (s, 0)),
            ),
            compiler_params=pltpu.CompilerParams(
                dimension_semantics=("parallel", "arbitrary")),
        )(x2d, t2d)
        # Tiny final reduce (num_splits * 1024 elems) + mean over ORIGINAL count.
        return jnp.sum(partial_sums) / jnp.float32(n)

    # reduction != 'mean' -> per-element loss (PyTorch returns the unreduced map).
    max_rows = 4096 if gen in (6, 7) else 2048   # v5e: keep under 16 MiB scoped VMEM
    tile_rows = min(max_rows, _round_up(rows, CHUNK_ROWS))
    num_tiles = _cdiv(rows, tile_rows)
    kernel = functools.partial(_focal_map_kernel, tile_rows=tile_rows,
                               binary_targets=binary_targets)
    loss2d = pl.pallas_call(
        kernel,
        out_shape=jax.ShapeDtypeStruct((rows, LANE), inputs.dtype),
        grid_spec=pltpu.PrefetchScalarGridSpec(
            num_scalar_prefetch=0,
            grid=(num_tiles,),
            in_specs=[pl.BlockSpec((tile_rows, LANE), lambda i: (i, 0)),
                      pl.BlockSpec((tile_rows, LANE), lambda i: (i, 0))],
            out_specs=pl.BlockSpec((tile_rows, LANE), lambda i: (i, 0)),
        ),
        compiler_params=pltpu.CompilerParams(dimension_semantics=("parallel",)),
    )(x2d, t2d)
    flat = loss2d.reshape(-1)
    if rows * LANE != n:
        flat = flat[:n]
    return flat.reshape(inputs.shape)


# ------------------------- reference (pure JAX) -------------------------

def _reference_none(x, t):
    x = x.astype(jnp.float32)
    t = t.astype(jnp.float32)
    bce = jnp.maximum(x, 0.0) - x * t + jnp.log1p(jnp.exp(-jnp.abs(x)))
    pt = jnp.exp(-bce)
    return ALPHA * (1.0 - pt) ** GAMMA * bce


def _reference_mean(x, t):
    return jnp.mean(_reference_none(x, t))


if __name__ == "__main__":
    key = jax.random.PRNGKey(0)
    k1, k2, k3, k4, k5, k6 = jax.random.split(key, 6)

    # Small NCHW-shaped logits + binary targets (sigmoid-logit head).
    B, C, H, W = 2, 4, 16, 16
    inputs = jax.random.normal(k1, (B, C, H, W), dtype=jnp.float32) * 2.0
    targets = jax.random.bernoulli(k2, p=0.3, shape=(B, C, H, W)).astype(jnp.float32)

    out = jax.block_until_ready(focal_loss(inputs, targets, reduction="mean"))
    ref = _reference_mean(inputs, targets)
    assert jnp.allclose(out, ref, rtol=1e-5, atol=1e-6), (out, ref)

    # reduction='none' path (per-element loss map).
    out_n = jax.block_until_ready(focal_loss(inputs, targets, reduction="none"))
    ref_n = _reference_none(inputs, targets)
    assert out_n.shape == inputs.shape
    assert jnp.allclose(out_n, ref_n, rtol=1e-5, atol=1e-6)

    # Non-multiple-of-128 size: exercises the (<128 elem) tail pad + masking.
    big_n = 300_000
    xb = jax.random.normal(k3, (big_n,), dtype=jnp.float32) * 3.0
    tb = jax.random.bernoulli(k4, p=0.5, shape=(big_n,)).astype(jnp.float32)
    out_b = jax.block_until_ready(focal_loss(xb, tb, reduction="mean"))
    ref_b = _reference_mean(xb, tb)
    assert jnp.allclose(out_b, ref_b, rtol=1e-4, atol=1e-6), (out_b, ref_b)

    # Multiple-of-128 but ragged row count: zero-copy path, partial last block.
    rag_n = 128 * 3001
    xr = jax.random.normal(k5, (rag_n,), dtype=jnp.float32) * 2.0
    tr = jax.random.bernoulli(k6, p=0.4, shape=(rag_n,)).astype(jnp.float32)
    out_r = jax.block_until_ready(focal_loss(xr, tr, reduction="mean"))
    ref_r = _reference_mean(xr, tr)
    assert jnp.allclose(out_r, ref_r, rtol=1e-4, atol=1e-6), (out_r, ref_r)

    # Soft-target fallback (exact exp(-BCE) path, no bf16 target cast).
    ts = jax.random.uniform(k2, (B, C, H, W), dtype=jnp.float32)
    out_s = jax.block_until_ready(
        focal_loss(inputs, ts, reduction="mean", binary_targets=False))
    ref_s = _reference_mean(inputs, ts)
    assert jnp.allclose(out_s, ref_s, rtol=1e-5, atol=1e-6), (out_s, ref_s)

    print("KERNEL_OK")
</pallas_src>

<mosaic_0001>
module attributes {stable_mosaic.version = 11 : i64} {
  func.func @_focal_sum_kernel(%arg0: i32, %arg1: i32, %arg2: memref<256x128xf32, #tpu.memory_space<vmem>>, %arg3: memref<256x128xbf16, #tpu.memory_space<vmem>>, %arg4: memref<8x128xf32, #tpu.memory_space<vmem>>) attributes {dimension_semantics = [#tpu.dimension_semantics<parallel>, #tpu.dimension_semantics<arbitrary>], iteration_bounds = array<i64: 1, 1>, scalar_prefetch = 0 : i64, scratch_operands = 0 : i64, tpu.core_type = #tpu.core_type<tc>, window_params = [{transform_indices = @transform_0, window_bounds = array<i64: 256, 128>}, {transform_indices = @transform_1, window_bounds = array<i64: 256, 128>}, {transform_indices = @transform_2, window_bounds = array<i64: 8, 128>}]} {
    %c0_i32 = arith.constant 0 : i32
    %0 = arith.cmpi eq, %arg1, %c0_i32 : i32
    %1 = arith.extui %0 : i1 to i32
    %c0_i32_0 = arith.constant 0 : i32
    %2 = arith.cmpi ne, %1, %c0_i32_0 : i32
    scf.if %2 {
      %cst_23 = arith.constant 0.000000e+00 : f32
      %68 = vector.broadcast %cst_23 : f32 to vector<8x128xf32>
      %c0_24 = arith.constant 0 : index
      %c0_25 = arith.constant 0 : index
      %69 = vector.load %arg4[%c0_24, %c0_25] : memref<8x128xf32, #tpu.memory_space<vmem>>, vector<8x128xf32>
      tpu.vector_store %arg4[%c0_24, %c0_25], %68 {strides = array<i32>} : memref<8x128xf32, #tpu.memory_space<vmem>>, vector<8x128xf32>,
    } else {
    }
    %c1_i32 = arith.constant 1 : i32
    %3 = arith.muli %arg0, %c1_i32 : i32
    %4 = arith.addi %3, %arg1 : i32
    %5 = tpu.iota {dimensions = array<i32: 0>} : vector<256x128xi32>
    %c128_i32 = arith.constant 128 : i32
    %6 = vector.broadcast %c128_i32 : i32 to vector<256x128xi32>
    %7 = arith.muli %5, %6 : vector<256x128xi32>
    %8 = tpu.iota {dimensions = array<i32: 1>} : vector<256x128xi32>
    %9 = arith.addi %7, %8 : vector<256x128xi32>
    %cst = arith.constant 0.000000e+00 : f32
    %10 = vector.broadcast %cst : f32 to vector<8x128xf32>
    %c0_i32_1 = arith.constant 0 : i32
    %c256_i32 = arith.constant 256 : i32
    %11 = arith.muli %c0_i32_1, %c256_i32 : i32
    %12 = tpu.assume_multiple %11, 256 : i32
    %13 = arith.index_cast %12 : i32 to index
    %c0 = arith.constant 0 : index
    %14 = vector.load %arg2[%13, %c0] : memref<256x128xf32, #tpu.memory_space<vmem>>, vector<256x128xf32>
    %15 = arith.index_cast %12 : i32 to index
    %c0_2 = arith.constant 0 : index
    %16 = vector.load %arg3[%15, %c0_2] : memref<256x128xbf16, #tpu.memory_space<vmem>>, vector<256x128xbf16>
    %17 = arith.extf %16 : vector<256x128xbf16> to vector<256x128xf32>
    %18 = math.absf %14 : vector<256x128xf32>
    %cst_3 = arith.constant 0.000000e+00 : f32
    %19 = vector.broadcast %cst_3 : f32 to vector<256x128xf32>
    %20 = arith.subf %19, %18 : vector<256x128xf32>
    %21 = math.exp %20 : vector<256x128xf32>
    %cst_4 = arith.constant 0.000000e+00 : f32
    %22 = vector.broadcast %cst_4 : f32 to vector<256x128xf32>
    %23 = arith.maximumf %14, %22 : vector<256x128xf32>
    %24 = arith.mulf %14, %17 : vector<256x128xf32>
    %25 = arith.subf %23, %24 : vector<256x128xf32>
    %26 = math.log1p %21 : vector<256x128xf32>
    %27 = arith.addf %25, %26 : vector<256x128xf32>
    %cst_5 = arith.constant 5.000000e-01 : f32
    %28 = vector.broadcast %cst_5 : f32 to vector<256x128xf32>
    %29 = arith.cmpf oge, %17, %28 : vector<256x128xf32>
    %cst_6 = arith.constant 0.000000e+00 : f32
    %30 = vector.broadcast %cst_6 : f32 to vector<256x128xf32>
    %31 = arith.cmpf oge, %14, %30 : vector<256x128xf32>
    %cst_7 = arith.constant 1.000000e+00 : f32
    %32 = vector.broadcast %cst_7 : f32 to vector<256x128xf32>
    %33 = arith.select %31, %32, %21 : vector<256x128xi1>, vector<256x128xf32>
    %cst_8 = arith.constant 0.000000e+00 : f32
    %34 = vector.broadcast %cst_8 : f32 to vector<256x128xf32>
    %35 = arith.cmpf oge, %14, %34 : vector<256x128xf32>
    %cst_9 = arith.constant 1.000000e+00 : f32
    %36 = vector.broadcast %cst_9 : f32 to vector<256x128xf32>
    %37 = arith.select %35, %21, %36 : vector<256x128xi1>, vector<256x128xf32>
    %38 = arith.select %29, %33, %37 : vector<256x128xi1>, vector<256x128xf32>
    %cst_10 = arith.constant 1.000000e+00 : f32
    %39 = vector.broadcast %cst_10 : f32 to vector<256x128xf32>
    %40 = arith.addf %39, %21 : vector<256x128xf32>
    %41 = tpu.reciprocal %40 {approx = true} : vector<256x128xf32> -> vector<256x128xf32>
    %42 = arith.mulf %40, %41 : vector<256x128xf32>
    %cst_11 = arith.constant 2.000000e+00 : f32
    %43 = vector.broadcast %cst_11 : f32 to vector<256x128xf32>
    %44 = arith.subf %43, %42 : vector<256x128xf32>
    %45 = arith.mulf %41, %44 : vector<256x128xf32>
    %46 = arith.mulf %38, %45 : vector<256x128xf32>
    %cst_12 = arith.constant 1.000000e+00 : f32
    %47 = vector.broadcast %cst_12 : f32 to vector<256x128xf32>
    %48 = arith.subf %47, %46 : vector<256x128xf32>
    %cst_13 = arith.constant 1.000000e+00 : f32
    %49 = vector.broadcast %cst_13 : f32 to vector<256x128xf32>
    %50 = arith.mulf %49, %27 : vector<256x128xf32>
    %51 = arith.mulf %48, %48 : vector<256x128xf32>
    %52 = arith.mulf %50, %51 : vector<256x128xf32>
    %c256_i32_14 = arith.constant 256 : i32
    %53 = arith.muli %4, %c256_i32_14 : i32
    %54 = arith.addi %53, %12 : i32
    %c128_i32_15 = arith.constant 128 : i32
    %55 = arith.muli %54, %c128_i32_15 : i32
    %56 = vector.broadcast %55 : i32 to vector<256x128xi32>
    %57 = arith.addi %9, %56 : vector<256x128xi32>
    %c2048_i32 = arith.constant 2048 : i32
    %58 = vector.broadcast %c2048_i32 : i32 to vector<256x128xi32>
    %59 = arith.cmpi slt, %57, %58 : vector<256x128xi32>
    %cst_16 = arith.constant 0.000000e+00 : f32
    %60 = vector.broadcast %cst_16 : f32 to vector<256x128xf32>
    %61 = arith.select %59, %52, %60 : vector<256x128xi1>, vector<256x128xf32>
    %62 = vector.shape_cast %61 : vector<256x128xf32> to vector<32x8x128xf32>
    %cst_17 = arith.constant dense<0.000000e+00> : vector<8x128xf32>
    %63 = vector.multi_reduction <add>, %62, %cst_17 [0] : vector<32x8x128xf32> to vector<8x128xf32>
    %64 = arith.addf %10, %63 : vector<8x128xf32>
    %c1_i32_18 = arith.constant 1 : i32
    %c0_19 = arith.constant 0 : index
    %c0_20 = arith.constant 0 : index
    %65 = vector.load %arg4[%c0_19, %c0_20] : memref<8x128xf32, #tpu.memory_space<vmem>>, vector<8x128xf32>
    %66 = arith.addf %65, %64 : vector<8x128xf32>
    %c0_21 = arith.constant 0 : index
    %c0_22 = arith.constant 0 : index
    %67 = vector.load %arg4[%c0_21, %c0_22] : memref<8x128xf32, #tpu.memory_space<vmem>>, vector<8x128xf32>
    tpu.vector_store %arg4[%c0_21, %c0_22], %66 {strides = array<i32>} : memref<8x128xf32, #tpu.memory_space<vmem>>, vector<8x128xf32>,
    return
  }
  func.func @transform_0(%arg0: i32, %arg1: i32) -> (i32, i32) {
    %c1_i32 = arith.constant 1 : i32
    %0 = arith.muli %arg0, %c1_i32 : i32
    %1 = arith.addi %0, %arg1 : i32
    %c0_i32 = arith.constant 0 : i32
    %2 = arith.minsi %1, %c0_i32 : i32
    %c0_i32_0 = arith.constant 0 : i32
    %c0_i32_1 = arith.constant 0 : i32
    return %2, %c0_i32_0 : i32, i32
  }
  func.func @transform_1(%arg0: i32, %arg1: i32) -> (i32, i32) {
    %c1_i32 = arith.constant 1 : i32
    %0 = arith.muli %arg0, %c1_i32 : i32
    %1 = arith.addi %0, %arg1 : i32
    %c0_i32 = arith.constant 0 : i32
    %2 = arith.minsi %1, %c0_i32 : i32
    %c0_i32_0 = arith.constant 0 : i32
    %c0_i32_1 = arith.constant 0 : i32
    return %2, %c0_i32_0 : i32, i32
  }
  func.func @transform_2(%arg0: i32, %arg1: i32) -> (i32, i32) {
    %c0_i32 = arith.constant 0 : i32
    %c0_i32_0 = arith.constant 0 : i32
    return %arg0, %c0_i32 : i32, i32
  }
}

</mosaic_0001>

<bundles_post_ra>
// kernel: tpu_custom_call.1
= control target key start
LH: loop header
LB: loop body
LE: loop exit
PB: predicated region body
PF: predicated region fallthrough
CT: control target
= control target key end

     0   :  { %7 = vsyncpa [#allocation3], 0  ;;  %s4609_s0 = inlined_call_operand.hbm [shape: f32[16,128], index: 0, kind: input, shape index: {}]   ;;  %s4610_s1 = inlined_call_operand.hbm [shape: bf16[16,128], index: 1, kind: input, shape index: {}]   ;;  %s4611_s2 = inlined_call_operand.hbm [shape: f32[8,128], index: 2, kind: output, shape index: {}]  }
   0x1   :  { %8 = vsyncpa [#allocation6], 0 }
   0x2   :  { %9 = vsyncpa [#allocation4], 0 }
   0x3   :  { %20 = vsyncadd [#allocation3], 3840  ;;  %s25_s11 = sshll.u32 %s4609_s0, 4  ;;  %s1817_s12 = smov [#allocation2]   ;;  %s26_s11 = int_to_ptr.hbm [resolvable:$true] %s25_s11 }
   0x4   :  { %s27_s13 = sshll.u32 %s1817_s12, 4  ;;  %s1818_s14 = smov 128   ;;  %s28_s13 = int_to_ptr.vmem [resolvable:$true] %s27_s13 }
   0x5   :  { %s1819_s15 = smov 8  }
   0x6   :  { %33 = dma.hbm_to_vmem [thread:$0]  %s26_s11, 256, %s28_s13, [#allocation3], %s1818_s14, %s1818_s14, %s1819_s15  }
   0x7   :  { %44 = vsyncadd [#allocation6], 1920  ;;  %s49_s18 = sshll.u32 %s4610_s1, 4  ;;  %s1820_s19 = smov [#allocation5]   ;;  %s50_s18 = int_to_ptr.hbm [resolvable:$true] %s49_s18 }
   0x8   :  { %s51_s20 = sshll.u32 %s1820_s19, 4  ;;  %s1821_s21 = smov 64   ;;  %s52_s20 = int_to_ptr.vmem [resolvable:$true] %s51_s20 }
   0x9   :  { %s1822_s22 = smov 4  }
   0xa   :  { %57 = dma.hbm_to_vmem [thread:$0]  %s50_s18, 128, %s52_s20, [#allocation6], %s1821_s21, %s1821_s21, %s1822_s22  }
   0xb   :  { %1811 = dma.done.wait [#allocation3], 4096  }
   0xc   :  { %1812 = vsyncadd [#allocation3], 4294963200 }
   0xd   :  { %1813 = dma.done.wait [#allocation6], 2048  }
   0xe   :  { %1814 = vsyncadd [#allocation6], 4294965248  ;;  %v84_v0 = vlaneseq  ;;  %v2126_v63 = vld [vmem:[#allocation2 + $0x60] sm:$0xff]  ;;  %s1823_s0 = smov [#allocation7]   ;;  %s1413_s25 = sshll.u32 %s4611_s2, 4  ;;  %s1414_s25 = int_to_ptr.hbm [resolvable:$true] %s1413_s25 }
   0xf   :  { %5098 = vst [vmem:[#allocation57_spill] sm:$0xff] %v2126_v63  ;;  %s1411_s1 = sshll.u32 %s1823_s0, 4  ;;  %s1412_s1 = int_to_ptr.vmem [resolvable:$true] %s1411_s1 }
  0x10   :  { %v1845_v1 = vshrl.u32 %v84_v0, 7  ;;  %v1850_v3 = vand.u32 127, %v84_v0  ;;  %v2140_v0 = vld [vmem:[#allocation2 + $0x80] sm:$0xff] }
  0x11   :  { %5103 = vst [vmem:[#allocation62_spill] sm:$0xff] %v2140_v0 }
  0x12   :  { %v1848_v2 = vadd.s32 8, %v1845_v1  ;;  %5052 = vst [vmem:[#allocation11_spill] sm:$0xff] %v1850_v3  ;;  %v1853_v4 = vadd.s32 16, %v1845_v1  ;;  %v1856_v5 = vadd.s32 24, %v1845_v1  ;;  %v1859_v6 = vadd.s32 32, %v1845_v1 }
  0x13   :  { %v1862_v7 = vadd.s32 40, %v1845_v1  ;;  %v1865_v8 = vadd.s32 48, %v1845_v1  ;;  %v1868_v9 = vadd.s32 56, %v1845_v1  ;;  %v1871_v10 = vadd.s32 64, %v1845_v1 }
  0x14   :  { %v1874_v11 = vadd.s32 72, %v1845_v1  ;;  %v1877_v12 = vadd.s32 80, %v1845_v1  ;;  %v1880_v13 = vadd.s32 88, %v1845_v1  ;;  %v1883_v14 = vadd.s32 96, %v1845_v1 }
  0x15   :  { %v1886_v15 = vadd.s32 104, %v1845_v1  ;;  %v1889_v16 = vadd.s32 112, %v1845_v1  ;;  %v1892_v17 = vadd.s32 120, %v1845_v1  ;;  %v1895_v18 = vadd.s32 128, %v1845_v1 }
  0x16   :  { %v1898_v19 = vadd.s32 136, %v1845_v1  ;;  %v1901_v20 = vadd.s32 144, %v1845_v1  ;;  %v1904_v21 = vadd.s32 152, %v1845_v1  ;;  %v1907_v22 = vadd.s32 160, %v1845_v1 }
  0x17   :  { %v1910_v23 = vadd.s32 168, %v1845_v1  ;;  %v1913_v24 = vadd.s32 176, %v1845_v1  ;;  %v1916_v25 = vadd.s32 184, %v1845_v1  ;;  %v1919_v26 = vadd.s32 192, %v1845_v1 }
  0x18   :  { %v1922_v27 = vadd.s32 200, %v1845_v1  ;;  %v1925_v28 = vadd.s32 208, %v1845_v1  ;;  %v1928_v29 = vadd.s32 216, %v1845_v1  ;;  %v1931_v30 = vadd.s32 224, %v1845_v1 }
  0x19   :  { %v1934_v31 = vadd.s32 232, %v1845_v1  ;;  %v1937_v32 = vadd.s32 240, %v1845_v1  ;;  %v1940_v33 = vadd.s32 248, %v1845_v1  ;;  %v117_v34 = vmul.u32 128, %v1845_v1  ;;  %v2108_v1 = vld [vmem:[#allocation2 + $0x40] sm:$0xff] }
  0x1a   :  { %v118_v35 = vmul.u32 128, %v1848_v2  ;;  %v119_v36 = vmul.u32 128, %v1853_v4  ;;  %v120_v37 = vmul.u32 128, %v1856_v5  ;;  %v121_v38 = vmul.u32 128, %v1859_v6 }
  0x1b   :  { %5053 = vst [vmem:[#allocation12_spill] sm:$0xff] %v1934_v31  ;;  %v122_v39 = vmul.u32 128, %v1862_v7  ;;  %v123_v40 = vmul.u32 128, %v1865_v8  ;;  %v124_v41 = vmul.u32 128, %v1868_v9  ;;  %v125_v42 = vmul.u32 128, %v1871_v10  ;;  %v2145_v31 = vld [vmem:[#allocation5 + $0x68] sm:$0xff]  }
  0x1c   :  { %5054 = vst [vmem:[#allocation13_spill] sm:$0xff] %v1937_v32  ;;  %v126_v43 = vmul.u32 128, %v1874_v11  ;;  %v127_v44 = vmul.u32 128, %v1877_v12  ;;  %v128_v45 = vmul.u32 128, %v1880_v13  ;;  %v129_v46 = vmul.u32 128, %v1883_v14  ;;  %v2136_v32 = vld [vmem:[#allocation5 + $0x60] sm:$0xff]  }
  0x1d   :  { %5055 = vst [vmem:[#allocation14_spill] sm:$0xff] %v1940_v33  ;;  %v130_v47 = vmul.u32 128, %v1886_v15  ;;  %v131_v48 = vmul.u32 128, %v1889_v16  ;;  %v132_v49 = vmul.u32 128, %v1892_v17  ;;  %v133_v50 = vmul.u32 128, %v1895_v18 }
  0x1e   :  { %v134_v51 = vmul.u32 128, %v1898_v19  ;;  %v135_v52 = vmul.u32 128, %v1901_v20  ;;  %v136_v53 = vmul.u32 128, %v1904_v21  ;;  %v137_v54 = vmul.u32 128, %v1907_v22  ;;  %v2028_v21 = vld [vmem:[#allocation5] sm:$0xff]   ;;  %5101 = vst [vmem:[#allocation60_spill] sm:$0xff] %v2136_v32 }
  0x1f   :  { %v138_v55 = vmul.u32 128, %v1910_v23  ;;  %v139_v56 = vmul.u32 128, %v1913_v24  ;;  %v140_v57 = vmul.u32 128, %v1916_v25  ;;  %v141_v58 = vmul.u32 128, %v1919_v26  ;;  %5074 = vst [vmem:[#allocation33_spill] sm:$0xff] %v2028_v21  ;;  %v2042_v26 = vld [vmem:[#allocation5 + $0x8] sm:$0xff]  }
  0x20   :  { %v142_v59 = vmul.u32 128, %v1922_v27  ;;  %v143_v60 = vmul.u32 128, %v1925_v28  ;;  %v144_v61 = vmul.u32 128, %v1928_v29  ;;  %v145_v62 = vmul.u32 128, %v1931_v30  ;;  %5079 = vst [vmem:[#allocation38_spill] sm:$0xff] %v2042_v26  ;;  %v2044_v27 = vld [vmem:[#allocation5 + $0x10] sm:$0xff]  }
  0x21   :  { %v1975_v2 = vadd.s32 %v1850_v3, %v117_v34  ;;  %v1978_v4 = vadd.s32 %v1850_v3, %v118_v35  ;;  %v1981_v5 = vadd.s32 %v1850_v3, %v119_v36  ;;  %v1984_v6 = vadd.s32 %v1850_v3, %v120_v37  ;;  %5080 = vst [vmem:[#allocation39_spill] sm:$0xff] %v2044_v27  ;;  %v2058_v35 = vld [vmem:[#allocation5 + $0x18] sm:$0xff]   ;;  %v2060_v36 = vld [vmem:[#allocation5 + $0x20] sm:$0xff]  }
  0x22   :  { %v1987_v7 = vadd.s32 %v1850_v3, %v121_v38  ;;  %v1990_v8 = vadd.s32 %v1850_v3, %v122_v39  ;;  %v1993_v9 = vadd.s32 %v1850_v3, %v123_v40  ;;  %v1996_v10 = vadd.s32 %v1850_v3, %v124_v41  ;;  %5085 = vst [vmem:[#allocation44_spill] sm:$0xff] %v2058_v35  ;;  %v2072_v41 = vld [vmem:[#allocation5 + $0x28] sm:$0xff]   ;;  %v2124_v40 = vld [vmem:[#allocation5 + $0x58] sm:$0xff]  }
  0x23   :  { %5056 = vst [vmem:[#allocation15_spill] sm:$0xff] %v1975_v2  ;;  %v1999_v11 = vadd.s32 %v1850_v3, %v125_v42  ;;  %v2002_v12 = vadd.s32 %v1850_v3, %v126_v43  ;;  %v2005_v13 = vadd.s32 %v1850_v3, %v127_v44  ;;  %v2008_v14 = vadd.s32 %v1850_v3, %v128_v45  ;;  %v2074_v42 = vld [vmem:[#allocation5 + $0x30] sm:$0xff]   ;;  %v2076_v43 = vld [vmem:[#allocation2] sm:$0xff]  ;;  %v2078_v44 = vld [vmem:[#allocation2 + $0x8] sm:$0xff] }
  0x24   :  { %5057 = vst [vmem:[#allocation16_spill] sm:$0xff] %v1978_v4  ;;  %v2011_v15 = vadd.s32 %v1850_v3, %v129_v46  ;;  %v2014_v16 = vadd.s32 %v1850_v3, %v130_v47  ;;  %v2017_v17 = vadd.s32 %v1850_v3, %v131_v48  ;;  %v2020_v18 = vadd.s32 %v1850_v3, %v132_v49  ;;  %v2080_v45 = vld [vmem:[#allocation2 + $0x10] sm:$0xff]  ;;  %v2118_v49 = vld [vmem:[#allocation2 + $0x58] sm:$0xff] }
  0x25   :  { %5058 = vst [vmem:[#allocation17_spill] sm:$0xff] %v1981_v5  ;;  %v2023_v19 = vadd.s32 %v1850_v3, %v133_v50  ;;  %v2026_v20 = vadd.s32 %v1850_v3, %v134_v51  ;;  %v2031_v22 = vadd.s32 %v1850_v3, %v135_v52  ;;  %v2034_v23 = vadd.s32 %v1850_v3, %v136_v53  ;;  %v2086_v50 = vld [vmem:[#allocation5 + $0x38] sm:$0xff]   ;;  %v2088_v51 = vld [vmem:[#allocation5 + $0x40] sm:$0xff]   ;;  %v2194_v4 = vld [vmem:[#allocation2 + $0xf0] sm:$0xff] }
  0x26   :  { %5059 = vst [vmem:[#allocation18_spill] sm:$0xff] %v1984_v6  ;;  %v2037_v24 = vadd.s32 %v1850_v3, %v137_v54  ;;  %v2040_v25 = vadd.s32 %v1850_v3, %v138_v55  ;;  %v2047_v28 = vadd.s32 %v1850_v3, %v139_v56  ;;  %v2050_v29 = vadd.s32 %v1850_v3, %v140_v57  ;;  %v2090_v52 = vld [vmem:[#allocation2 + $0x18] sm:$0xff]  ;;  %v2092_v53 = vld [vmem:[#allocation2 + $0x20] sm:$0xff]  ;;  %v2094_v54 = vld [vmem:[#allocation2 + $0x28] sm:$0xff] }
  0x27   :  { %5060 = vst [vmem:[#allocation19_spill] sm:$0xff] %v1987_v7  ;;  %v2053_v30 = vadd.s32 %v1850_v3, %v141_v58  ;;  %v2056_v34 = vadd.s32 %v1850_v3, %v142_v59  ;;  %v2063_v37 = vadd.s32 %v1850_v3, %v143_v60  ;;  %v2066_v38 = vadd.s32 %v1850_v3, %v144_v61  ;;  %v2100_v59 = vld [vmem:[#allocation5 + $0x48] sm:$0xff]   ;;  %v2102_v60 = vld [vmem:[#allocation5 + $0x50] sm:$0xff]   ;;  %v2138_v46 = vld [vmem:[#allocation2 + $0x78] sm:$0xff] }
  0x28   :  { %5061 = vst [vmem:[#allocation20_spill] sm:$0xff] %v1990_v8  ;;  %v2069_v39 = vadd.s32 %v1850_v3, %v145_v62  ;;  %v2104_v61 = vld [vmem:[#allocation2 + $0x30] sm:$0xff]  ;;  %v2106_v62 = vld [vmem:[#allocation2 + $0x38] sm:$0xff]  ;;  %v2114_v55 = vld [vmem:[#allocation2 + $0x48] sm:$0xff]  ;;  %v279_v33 = vand.u32 2147483647, %v2076_v43 }
  0x29   :  { %5062 = vst [vmem:[#allocation21_spill] sm:$0xff] %v1993_v9  ;;  %v2116_v58 = vld [vmem:[#allocation2 + $0x50] sm:$0xff]  ;;  %v2128_v56 = vld [vmem:[#allocation2 + $0x68] sm:$0xff]  ;;  %v281_v48 = vand.u32 2147483647, %v2080_v45  ;;  %v2152_v47 = vld [vmem:[#allocation2 + $0x98] sm:$0xff] }
  0x2a   :  { %5063 = vst [vmem:[#allocation22_spill] sm:$0xff] %v1996_v10  ;;  %v2130_v57 = vld [vmem:[#allocation2 + $0x70] sm:$0xff]  ;;  %v283_v3 = vand.u32 2147483647, %v2092_v53  ;;  %v2184_v10 = vld [vmem:[#allocation2 + $0xe0] sm:$0xff]  ;;  %v2186_v9 = vld [vmem:[#allocation2 + $0xe8] sm:$0xff] }
  0x2b   :  { %5064 = vst [vmem:[#allocation23_spill] sm:$0xff] %v1999_v11  ;;  %v2182_v11 = vld [vmem:[#allocation2 + $0xd8] sm:$0xff]  ;;  %v291_v6 = vand.u32 2147483647, %v2126_v63  ;;  %v293_v5 = vand.u32 2147483647, %v2130_v57 }
  0x2c   :  { %5065 = vst [vmem:[#allocation24_spill] sm:$0xff] %v2002_v12  ;;  %v290_v12 = vand.u32 2147483647, %v2118_v49  ;;  %v2189_v7 = vld [vmem:[#allocation5 + $0x78] sm:$0xff]  }
  0x2d   :  { %5066 = vst [vmem:[#allocation25_spill] sm:$0xff] %v2005_v13  ;;  %v288_v13 = vand.u32 2147483647, %v2114_v55  ;;  %v2196_v2 = vld [vmem:[#allocation2 + $0xf8] sm:$0xff]  ;;  %v325_v63 = vsub.f32 0.0, %v293_v5 }
  0x2e   :  { %5067 = vst [vmem:[#allocation26_spill] sm:$0xff] %v2008_v14  ;;  %v292_v14 = vand.u32 2147483647, %v2128_v56  ;;  %v310_v27 = vand.u32 2147483647, %v2196_v2 }
  0x2f   :  { %5068 = vst [vmem:[#allocation27_spill] sm:$0xff] %v2011_v15  ;;  %v2176_v15 = vld [vmem:[#allocation2 + $0xd0] sm:$0xff] }
  0x30   :  { %5069 = vst [vmem:[#allocation28_spill] sm:$0xff] %v2014_v16  ;;  %v2174_v16 = vld [vmem:[#allocation2 + $0xc8] sm:$0xff]  ;;  %v342_v5 = vsub.f32 0.0, %v310_v27 }
  0x31   :  { %5070 = vst [vmem:[#allocation29_spill] sm:$0xff] %v2017_v17  ;;  %v2172_v17 = vld [vmem:[#allocation2 + $0xc0] sm:$0xff]  ;;  %v304_v32 = vand.u32 2147483647, %v2174_v16 }
  0x32   :  { %5071 = vst [vmem:[#allocation30_spill] sm:$0xff] %v2020_v18  ;;  %v287_v18 = vand.u32 2147483647, %v2108_v1  ;;  %v303_v26 = vand.u32 2147483647, %v2172_v17 }
  0x33   :  { %5072 = vst [vmem:[#allocation31_spill] sm:$0xff] %v2023_v19  ;;  %v285_v19 = vand.u32 2147483647, %v2104_v61 }
  0x34   :  { %5073 = vst [vmem:[#allocation32_spill] sm:$0xff] %v2026_v20  ;;  %v2167_v20 = vld [vmem:[#allocation5 + $0x70] sm:$0xff]  }
  0x35   :  { %5075 = vst [vmem:[#allocation34_spill] sm:$0xff] %v2031_v22  ;;  %v289_v22 = vand.u32 2147483647, %v2116_v58 }
  0x36   :  { %5076 = vst [vmem:[#allocation35_spill] sm:$0xff] %v2034_v23  ;;  %v2164_v23 = vld [vmem:[#allocation2 + $0xb8] sm:$0xff] }
  0x37   :  { %5077 = vst [vmem:[#allocation36_spill] sm:$0xff] %v2037_v24  ;;  %v2162_v24 = vld [vmem:[#allocation2 + $0xb0] sm:$0xff]  ;;  %v302_v35 = vand.u32 2147483647, %v2164_v23 }
  0x38   :  { %5078 = vst [vmem:[#allocation37_spill] sm:$0xff] %v2040_v25  ;;  %v2160_v25 = vld [vmem:[#allocation2 + $0xa8] sm:$0xff] }
  0x39   :  { %5081 = vst [vmem:[#allocation40_spill] sm:$0xff] %v2047_v28  ;;  %v284_v28 = vand.u32 2147483647, %v2094_v54 }
  0x3a   :  { %5082 = vst [vmem:[#allocation41_spill] sm:$0xff] %v2050_v29  ;;  %v282_v29 = vand.u32 2147483647, %v2090_v52 }
  0x3b   :  { %5083 = vst [vmem:[#allocation42_spill] sm:$0xff] %v2053_v30  ;;  %v286_v30 = vand.u32 2147483647, %v2106_v62 }
  0x3c   :  { %5084 = vst [vmem:[#allocation43_spill] sm:$0xff] %v2056_v34  ;;  %v2154_v34 = vld [vmem:[#allocation2 + $0xa0] sm:$0xff] }
  0x3d   :  { %5086 = vst [vmem:[#allocation45_spill] sm:$0xff] %v2060_v36  ;;  %v300_v36 = vand.u32 2147483647, %v2160_v25 }
  0x3e   :  { %5087 = vst [vmem:[#allocation46_spill] sm:$0xff] %v2063_v37  ;;  %v2150_v37 = vld [vmem:[#allocation2 + $0x90] sm:$0xff] }
  0x3f   :  { %5088 = vst [vmem:[#allocation47_spill] sm:$0xff] %v2066_v38  ;;  %v2142_v38 = vld [vmem:[#allocation2 + $0x88] sm:$0xff] }
  0x40   :  { %5089 = vst [vmem:[#allocation48_spill] sm:$0xff] %v2069_v39  ;;  %v280_v39 = vand.u32 2147483647, %v2078_v44  ;;  %v296_v8 = vand.u32 2147483647, %v2142_v38 }
  0x41   :  { %5090 = vst [vmem:[#allocation49_spill] sm:$0xff] %v2072_v41  ;;  %v307_v41 = vand.u32 2147483647, %v2184_v10 }
  0x42   :  { %5091 = vst [vmem:[#allocation50_spill] sm:$0xff] %v2074_v42  ;;  %v299_v42 = vand.u32 2147483647, %v2154_v34 }
  0x43   :  { %5092 = vst [vmem:[#allocation51_spill] sm:$0xff] %v2086_v50  ;;  %v298_v50 = vand.u32 2147483647, %v2152_v47 }
  0x44   :  { %5093 = vst [vmem:[#allocation52_spill] sm:$0xff] %v2088_v51  ;;  %v297_v51 = vand.u32 2147483647, %v2150_v37 }
  0x45   :  { %5094 = vst [vmem:[#allocation53_spill] sm:$0xff] %v2100_v59  ;;  %v295_v59 = vand.u32 2147483647, %v2140_v0  ;;  %v317_v0 = vsub.f32 0.0, %v285_v19  ;;  %v336_v19 = vsub.f32 0.0, %v304_v32 }
  0x46   :  { %5095 = vst [vmem:[#allocation54_spill] sm:$0xff] %v2102_v60  ;;  %v294_v60 = vand.u32 2147483647, %v2138_v46 }
  0x47   :  { %5096 = vst [vmem:[#allocation55_spill] sm:$0xff] %v2118_v49  ;;  %v329_v49 = vsub.f32 0.0, %v297_v51 }
  0x48   :  { %5097 = vst [vmem:[#allocation56_spill] sm:$0xff] %v2124_v40  ;;  %v301_v40 = vand.u32 2147483647, %v2162_v24 }
  0x49   :  { %5099 = vst [vmem:[#allocation58_spill] sm:$0xff] %v2128_v56  ;;  %v323_v56 = vsub.f32 0.0, %v291_v6 }
  0x4a   :  { %5100 = vst [vmem:[#allocation59_spill] sm:$0xff] %v2130_v57  ;;  %v321_v57 = vsub.f32 0.0, %v289_v22  ;;  %v339_v22 = vsub.f32 0.0, %v307_v41 }
  0x4b   :  { %5102 = vst [vmem:[#allocation61_spill] sm:$0xff] %v2138_v46  ;;  %v319_v46 = vsub.f32 0.0, %v287_v18 }
  0x4c   :  { %5104 = vst [vmem:[#allocation63_spill] sm:$0xff] %v2142_v38  ;;  %v315_v38 = vsub.f32 0.0, %v283_v3 }
  0x4d   :  { %5105 = vst [vmem:[#allocation64_spill] sm:$0xff] %v2145_v31  ;;  %v305_v31 = vand.u32 2147483647, %v2176_v15 }
  0x4e   :  { %5106 = vst [vmem:[#allocation65_spill] sm:$0xff] %v2150_v37  ;;  %v313_v37 = vsub.f32 0.0, %v281_v48  ;;  %v333_v48 = vsub.f32 0.0, %v301_v40 }
  0x4f   :  { %5107 = vst [vmem:[#allocation66_spill] sm:$0xff] %v2152_v47  ;;  %v318_v47 = vsub.f32 0.0, %v286_v30  ;;  %v337_v30 = vsub.f32 0.0, %v305_v31  ;;  %v355_v31 = vmul.f32 1.442695, %v317_v0 }
  0x50   :  { %5108 = vst [vmem:[#allocation67_spill] sm:$0xff] %v2154_v34  ;;  %v306_v34 = vand.u32 2147483647, %v2182_v11  ;;  %v347_v6 = vmul.f32 1.442695, %v313_v37 }
  0x51   :  { %5109 = vst [vmem:[#allocation68_spill] sm:$0xff] %v2160_v25  ;;  %v308_v25 = vand.u32 2147483647, %v2186_v9  ;;  %v357_v32 = vmul.f32 1.442695, %v318_v47 }
  0x52   :  { %5110 = vst [vmem:[#allocation69_spill] sm:$0xff] %v2162_v24  ;;  %v326_v24 = vsub.f32 0.0, %v294_v60  ;;  %v2253_v47 = vmul.f32 1.442695, %v339_v22 }
  0x53   :  { %5111 = vst [vmem:[#allocation70_spill] sm:$0xff] %v2164_v23  ;;  %v309_v23 = vand.u32 2147483647, %v2194_v4 }
  0x54   :  { %5112 = vst [vmem:[#allocation71_spill] sm:$0xff] %v2167_v20  ;;  %v311_v20 = vsub.f32 0.0, %v279_v33  ;;  %v331_v33 = vsub.f32 0.0, %v299_v42 }
  0x55   :  { %5113 = vst [vmem:[#allocation72_spill] sm:$0xff] %v2172_v17  ;;  %v312_v17 = vsub.f32 0.0, %v280_v39  ;;  %v332_v39 = vsub.f32 0.0, %v300_v36  ;;  %v373_v36 = vmul.f32 1.442695, %v326_v24 }
  0x56   :  { %5114 = vst [vmem:[#allocation73_spill] sm:$0xff] %v2174_v16  ;;  %v314_v16 = vsub.f32 0.0, %v282_v29  ;;  %v334_v29 = vsub.f32 0.0, %v302_v35  ;;  %v343_v3 = vmul.f32 1.442695, %v311_v20  ;;  %v5122_v35 = vunpack.c.l.bf16 %v2028_v21 }
  0x57   :  { %5115 = vst [vmem:[#allocation74_spill] sm:$0xff] %v2176_v15  ;;  %v316_v15 = vsub.f32 0.0, %v284_v28  ;;  %v335_v28 = vsub.f32 0.0, %v303_v26  ;;  %v345_v18 = vmul.f32 1.442695, %v312_v17 }
  0x58   :  { %5116 = vst [vmem:[#allocation75_spill] sm:$0xff] %v2182_v11  ;;  %v320_v11 = vsub.f32 0.0, %v288_v13  ;;  %v338_v13 = vsub.f32 0.0, %v306_v34  ;;  %v349_v60 = vmul.f32 1.442695, %v314_v16  ;;  %1515 = vpow2.f32 %v343_v3 }
  0x59   :  { %5117 = vst [vmem:[#allocation76_spill] sm:$0xff] %v2184_v10  ;;  %v322_v10 = vsub.f32 0.0, %v290_v12  ;;  %v340_v12 = vsub.f32 0.0, %v308_v25  ;;  %v353_v42 = vmul.f32 1.442695, %v316_v15  ;;  %v2225_v20 = vmul.f32 %v5122_v35, %v2076_v43  ;;  %v5143_v35 = vld [vmem:[#allocation67_spill] sm:$0xff] }
  0x5a   :  { %5118 = vst [vmem:[#allocation77_spill] sm:$0xff] %v2186_v9  ;;  %v324_v9 = vsub.f32 0.0, %v292_v14  ;;  %v341_v14 = vsub.f32 0.0, %v309_v23  ;;  %1517 = vpow2.f32 %v345_v18  ;;  %v359_v17 = vmul.f32 1.442695, %v319_v46 }
  0x5b   :  { %5119 = vst [vmem:[#allocation78_spill] sm:$0xff] %v2189_v7  ;;  %v327_v7 = vsub.f32 0.0, %v295_v59  ;;  %1519 = vpow2.f32 %v347_v6  ;;  %v361_v25 = vmul.f32 1.442695, %v320_v11  ;;  %v363_v26 = vmul.f32 1.442695, %v321_v57 }
  0x5c   :  { %5120 = vst [vmem:[#allocation79_spill] sm:$0xff] %v2194_v4  ;;  %v328_v4 = vsub.f32 0.0, %v296_v8  ;;  %v365_v23 = vmul.f32 1.442695, %v322_v10  ;;  %1521 = vpow2.f32 %v349_v60  ;;  %v367_v16 = vmul.f32 1.442695, %v323_v56 }
  0x5d   :  { %5121 = vst [vmem:[#allocation80_spill] sm:$0xff] %v2196_v2  ;;  %v330_v2 = vsub.f32 0.0, %v298_v50  ;;  %v351_v50 = vmul.f32 1.442695, %v315_v38  ;;  %v369_v27 = vmul.f32 1.442695, %v324_v9 }
  0x5e   :  { %v371_v34 = vmul.f32 1.442695, %v325_v63  ;;  %v375_v15 = vmul.f32 1.442695, %v327_v7  ;;  %v377_v37 = vmul.f32 1.442695, %v328_v4  ;;  %v2233_v41 = vpop.eup %1515 }
  0x5f   :  { %1523 = vpow2.f32 %v351_v50  ;;  %v2227_v38 = vmul.f32 1.442695, %v329_v49  ;;  %v2229_v40 = vmul.f32 1.442695, %v330_v2  ;;  %v2231_v0 = vmul.f32 1.442695, %v331_v33 }
  0x60   :  { %1525 = vpow2.f32 %v353_v42  ;;  %5123 = vst [vmem:[#allocation81_spill] sm:$0xff] %v2233_v41  ;;  %v2235_v11 = vmul.f32 1.442695, %v332_v39  ;;  %v2237_v10 = vmul.f32 1.442695, %v333_v48  ;;  %v2241_v63 = vpop.eup %1517  ;;  %v5132_v60 = vld [vmem:[#allocation57_spill] sm:$0xff] }
  0x61   :  { %1527 = vpow2.f32 %v355_v31  ;;  %v2239_v9 = vmul.f32 1.442695, %v334_v29  ;;  %5124 = vst [vmem:[#allocation82_spill] sm:$0xff] %v2241_v63  ;;  %v2243_v4 = vmul.f32 1.442695, %v335_v28  ;;  %v2249_v24 = vpop.eup %1519  ;;  %v5133_v42 = vld [vmem:[#allocation58_spill] sm:$0xff] }
  0x62   :  { %1529 = vpow2.f32 %v357_v32  ;;  %v2245_v7 = vmul.f32 1.442695, %v336_v19  ;;  %v2247_v2 = vmul.f32 1.442695, %v337_v30  ;;  %5125 = vst [vmem:[#allocation83_spill] sm:$0xff] %v2249_v24  ;;  %v2257_v51 = vpop.eup %1521  ;;  %v5135_v32 = vld [vmem:[#allocation59_spill] sm:$0xff] }
  0x63   :  { %1531 = vpow2.f32 %v359_v17  ;;  %v2251_v46 = vmul.f32 1.442695, %v338_v13  ;;  %v2255_v49 = vmul.f32 1.442695, %v340_v12  ;;  %5126 = vst [vmem:[#allocation84_spill] sm:$0xff] %v2257_v51  ;;  %v5139_v12 = vld [vmem:[#allocation63_spill] sm:$0xff] }
  0x64   :  { %1533 = vpow2.f32 %v361_v25  ;;  %v2259_v56 = vmul.f32 1.442695, %v341_v14  ;;  %v2261_v57 = vmul.f32 1.442695, %v342_v5  ;;  %v5131_v14 = vld [vmem:[#allocation55_spill] sm:$0xff]  ;;  %v5136_v25 = vld [vmem:[#allocation61_spill] sm:$0xff] }
  0x65   :  { %v2264_v33 = vpop.eup %1523  ;;  %1535 = vpow2.f32 %v363_v26  ;;  %v5140_v13 = vld [vmem:[#allocation65_spill] sm:$0xff]  ;;  %v5141_v30 = vld [vmem:[#allocation66_spill] sm:$0xff]  ;;  %v5144_v28 = vld [vmem:[#allocation68_spill] sm:$0xff] }
  0x66   :  { %5127 = vst [vmem:[#allocation85_spill] sm:$0xff] %v2264_v33  ;;  %v2269_v3 = vpop.eup %1525  ;;  %1537 = vpow2.f32 %v365_v23  ;;  %v5137_v23 = vld [vmem:[#allocation62_spill] sm:$0xff]  ;;  %v5145_v29 = vld [vmem:[#allocation69_spill] sm:$0xff]  ;;  %v5148_v39 = vld [vmem:[#allocation72_spill] sm:$0xff] }
  0x67   :  { %5128 = vst [vmem:[#allocation86_spill] sm:$0xff] %v2269_v3  ;;  %v2274_v18 = vpop.eup %1527  ;;  %1539 = vpow2.f32 %v367_v16  ;;  %v5147_v16 = vld [vmem:[#allocation70_spill] sm:$0xff]  ;;  %v5149_v59 = vld [vmem:[#allocation73_spill] sm:$0xff]  ;;  %v5153_v17 = vld [vmem:[#allocation76_spill] sm:$0xff] }
  0x68   :  { %5129 = vst [vmem:[#allocation87_spill] sm:$0xff] %v2274_v18  ;;  %v2279_v6 = vpop.eup %1529  ;;  %1541 = vpow2.f32 %v369_v27  ;;  %v5164_v5 = vld [vmem:[#allocation39_spill] sm:$0xff]  ;;  %v5178_v51 = vld [vmem:[#allocation50_spill] sm:$0xff] }
  0x69   :  { %5130 = vst [vmem:[#allocation88_spill] sm:$0xff] %v2279_v6  ;;  %v2284_v31 = vpop.eup %1531  ;;  %1543 = vpow2.f32 %v371_v34  ;;  %v5152_v34 = vld [vmem:[#allocation75_spill] sm:$0xff]  ;;  %v5165_v27 = vunpack.c.l.bf16 %v5164_v5  ;;  %v5179_v24 = vunpack.c.l.bf16 %v5178_v51 }
  0x6a   :  { %5134 = vst [vmem:[#allocation55_spill] sm:$0xff] %v2284_v31  ;;  %v2289_v22 = vpop.eup %1533  ;;  %1545 = vpow2.f32 %v373_v36  ;;  %v5157_v31 = vld [vmem:[#allocation80_spill] sm:$0xff] }
  0x6b   :  { %5138 = vst [vmem:[#allocation61_spill] sm:$0xff] %v2289_v22  ;;  %v2294_v19 = vpop.eup %1535  ;;  %1547 = vpow2.f32 %v375_v15  ;;  %v5151_v15 = vld [vmem:[#allocation74_spill] sm:$0xff] }
  0x6c   :  { %5142 = vst [vmem:[#allocation62_spill] sm:$0xff] %v2294_v19  ;;  %v2299_v48 = vpop.eup %1537  ;;  %1549 = vpow2.f32 %v377_v37  ;;  %v5155_v37 = vld [vmem:[#allocation77_spill] sm:$0xff]  ;;  %v5160_v22 = vld [vmem:[#allocation38_spill] sm:$0xff] }
  0x6d   :  { %5146 = vst [vmem:[#allocation68_spill] sm:$0xff] %v2299_v48  ;;  %v2304_v8 = vpop.eup %1539  ;;  %1551 = vpow2.f32 %v2227_v38  ;;  %v5156_v48 = vld [vmem:[#allocation79_spill] sm:$0xff]  ;;  %v5159_v38 = vunpack.c.h.bf16 %v2028_v21  ;;  %v5161_v50 = vunpack.c.l.bf16 %v5160_v22  ;;  %v5166_v21 = vunpack.c.h.bf16 %v5164_v5 }
  0x6e   :  { %5150 = vst [vmem:[#allocation69_spill] sm:$0xff] %v2304_v8  ;;  %v2310_v26 = vpop.eup %1541  ;;  %1553 = vpow2.f32 %v2229_v40  ;;  %v5162_v40 = vunpack.c.h.bf16 %v5160_v22  ;;  %v5171_v22 = vld [vmem:[#allocation45_spill] sm:$0xff] }
  0x6f   :  { %5154 = vst [vmem:[#allocation75_spill] sm:$0xff] %v2310_v26  ;;  %v2316_v6 = vpop.eup %1543  ;;  %1555 = vpow2.f32 %v2231_v0  ;;  %v440_v19 = vmul.f32 %v5159_v38, %v2078_v44  ;;  %v441_v26 = vmul.f32 %v5161_v50, %v2080_v45  ;;  %v443_v0 = vmul.f32 %v5165_v27, %v2092_v53 }
  0x70   :  { %5158 = vst [vmem:[#allocation76_spill] sm:$0xff] %v2316_v6  ;;  %v442_v36 = vmul.f32 %v5162_v40, %v2090_v52  ;;  %v2328_v8 = vpop.eup %1545  ;;  %1557 = vpow2.f32 %v2235_v11  ;;  %v444_v38 = vmul.f32 %v5166_v21, %v2094_v54  ;;  %v5167_v6 = vld [vmem:[#allocation44_spill] sm:$0xff]  ;;  %v5173_v5 = vunpack.c.h.bf16 %v5171_v22 }
  0x71   :  { %5163 = vst [vmem:[#allocation77_spill] sm:$0xff] %v2328_v8  ;;  %v5168_v18 = vunpack.c.l.bf16 %v5167_v6  ;;  %v2340_v3 = vpop.eup %1547  ;;  %1559 = vpow2.f32 %v2237_v10  ;;  %v5170_v40 = vunpack.c.h.bf16 %v5167_v6  ;;  %v5172_v8 = vunpack.c.l.bf16 %v5171_v22  ;;  %v5182_v22 = vld [vmem:[#allocation51_spill] sm:$0xff] }
  0x72   :  { %5169 = vst [vmem:[#allocation79_spill] sm:$0xff] %v2340_v3  ;;  %v448_v21 = vmul.f32 %v5173_v5, %v2114_v55  ;;  %v2352_v33 = vpop.eup %1549  ;;  %1561 = vpow2.f32 %v2239_v9  ;;  %v5181_v5 = vunpack.c.h.bf16 %v5178_v51 }
  0x73   :  { %v445_v50 = vmul.f32 %v5168_v18, %v2104_v61  ;;  %v446_v11 = vmul.f32 %v5170_v40, %v2106_v62  ;;  %v447_v27 = vmul.f32 %v5172_v8, %v2108_v1  ;;  %5174 = vst [vmem:[#allocation80_spill] sm:$0xff] %v2352_v33  ;;  %v5175_v18 = vld [vmem:[#allocation49_spill] sm:$0xff]  ;;  %v451_v8 = vmul.f32 %v5179_v24, %v5132_v60  ;;  %v2364_v63 = vpop.eup %1551  ;;  %v5186_v24 = vld [vmem:[#allocation52_spill] sm:$0xff] }
  0x74   :  { %v5176_v3 = vunpack.c.l.bf16 %v5175_v18  ;;  %v5177_v6 = vunpack.c.h.bf16 %v5175_v18  ;;  %5180 = vst [vmem:[#allocation89_spill] sm:$0xff] %v2364_v63  ;;  %1563 = vpow2.f32 %v2243_v4  ;;  %v452_v9 = vmul.f32 %v5181_v5, %v5133_v42  ;;  %v2376_v41 = vpop.eup %1553  ;;  %v5189_v42 = vld [vmem:[#allocation53_spill] sm:$0xff] }
  0x75   :  { %v5183_v33 = vunpack.c.l.bf16 %v5182_v22  ;;  %v5184_v18 = vunpack.c.h.bf16 %v5182_v22  ;;  %5185 = vst [vmem:[#allocation90_spill] sm:$0xff] %v2376_v41  ;;  %1565 = vpow2.f32 %v2245_v7  ;;  %v5187_v63 = vunpack.c.l.bf16 %v5186_v24  ;;  %v5193_v22 = vld [vmem:[#allocation54_spill] sm:$0xff] }
  0x76   :  { %v449_v10 = vmul.f32 %v5176_v3, %v2116_v58  ;;  %v450_v40 = vmul.f32 %v5177_v6, %v5131_v14  ;;  %v5188_v51 = vunpack.c.h.bf16 %v5186_v24  ;;  %v5190_v60 = vunpack.c.l.bf16 %v5189_v42 }
  0x77   :  { %v453_v3 = vmul.f32 %v5183_v33, %v5135_v32  ;;  %v454_v6 = vmul.f32 %v5184_v18, %v5136_v25  ;;  %v455_v4 = vmul.f32 %v5187_v63, %v5137_v23  ;;  %v2388_v32 = vpop.eup %1555  ;;  %1567 = vpow2.f32 %v2247_v2 }
  0x78   :  { %v456_v5 = vmul.f32 %v5188_v51, %v5139_v12  ;;  %v457_v33 = vmul.f32 %v5190_v60, %v5140_v13  ;;  %5191 = vst [vmem:[#allocation91_spill] sm:$0xff] %v2388_v32  ;;  %v5192_v18 = vunpack.c.h.bf16 %v5189_v42  ;;  %v5194_v41 = vunpack.c.l.bf16 %v5193_v22  ;;  %v2400_v12 = vpop.eup %1557  ;;  %v5197_v60 = vld [vmem:[#allocation56_spill] sm:$0xff] }
  0x79   :  { %v5195_v24 = vunpack.c.h.bf16 %v5193_v22  ;;  %5196 = vst [vmem:[#allocation92_spill] sm:$0xff] %v2400_v12  ;;  %1569 = vpow2.f32 %v2251_v46  ;;  %v5198_v32 = vunpack.c.l.bf16 %v5197_v60  ;;  %v5199_v42 = vunpack.c.h.bf16 %v5197_v60  ;;  %v5204_v22 = vld [vmem:[#allocation64_spill] sm:$0xff] }
  0x7a   :  { %v458_v7 = vmul.f32 %v5192_v18, %v5141_v30  ;;  %v459_v63 = vmul.f32 %v5194_v41, %v5143_v35  ;;  %v5200_v30 = vld [vmem:[#allocation60_spill] sm:$0xff]  ;;  %v2412_v35 = vpop.eup %1559  ;;  %1571 = vpow2.f32 %v2253_v47  ;;  %v5205_v12 = vunpack.c.l.bf16 %v5204_v22 }
  0x7b   :  { %v460_v51 = vmul.f32 %v5195_v24, %v5144_v28  ;;  %v461_v2 = vmul.f32 %v5198_v32, %v5145_v29  ;;  %v462_v18 = vmul.f32 %v5199_v42, %v5147_v16  ;;  %v5201_v13 = vunpack.c.l.bf16 %v5200_v30  ;;  %5202 = vst [vmem:[#allocation93_spill] sm:$0xff] %v2412_v35  ;;  %v2424_v16 = vpop.eup %1561 }
  0x7c   :  { %v5203_v24 = vunpack.c.h.bf16 %v5200_v30  ;;  %v465_v32 = vmul.f32 %v5205_v12, %v5151_v15  ;;  %v5206_v60 = vunpack.c.h.bf16 %v5204_v22  ;;  %5207 = vst [vmem:[#allocation94_spill] sm:$0xff] %v2424_v16  ;;  %1573 = vpow2.f32 %v2255_v49  ;;  %v2436_v15 = vpop.eup %1563 }
  0x7d   :  { %v463_v41 = vmul.f32 %v5201_v13, %v5148_v39  ;;  %v5208_v13 = vld [vmem:[#allocation71_spill] sm:$0xff]  ;;  %5213 = vst [vmem:[#allocation95_spill] sm:$0xff] %v2436_v15  ;;  %1575 = vpow2.f32 %v2259_v56  ;;  %v5215_v22 = vmax.f32 %v2076_v43, 0.0  ;;  %v2451_v16 = vpop.eup %1565  ;;  %v5220_v43 = vmax.f32 %v2092_v53, 0.0 }
  0x7e   :  { %v464_v46 = vmul.f32 %v5203_v24, %v5149_v59  ;;  %v466_v42 = vmul.f32 %v5206_v60, %v5152_v34  ;;  %v5209_v35 = vunpack.c.l.bf16 %v5208_v13  ;;  %v5210_v30 = vunpack.c.h.bf16 %v5208_v13  ;;  %v5211_v59 = vld [vmem:[#allocation78_spill] sm:$0xff]  ;;  %5217 = vst [vmem:[#allocation96_spill] sm:$0xff] %v2451_v16 }
  0x7f   :  { %v5212_v39 = vunpack.c.l.bf16 %v5211_v59  ;;  %v5214_v60 = vunpack.c.h.bf16 %v5211_v59  ;;  %v5216_v13 = vmax.f32 %v2078_v44, 0.0  ;;  %1577 = vpow2.f32 %v2261_v57 }
  0x80   :  { %v467_v47 = vmul.f32 %v5209_v35, %v5153_v17  ;;  %v468_v24 = vmul.f32 %v5210_v30, %v5155_v37  ;;  %v2445_v35 = vsub.f32 %v5215_v22, %v2225_v20  ;;  %v5219_v59 = vmax.f32 %v2090_v52, 0.0  ;;  %v2466_v22 = vpop.eup %1567 }
  0x81   :  { %v469_v12 = vmul.f32 %v5212_v39, %v5156_v48  ;;  %v470_v49 = vmul.f32 %v5214_v60, %v5157_v31  ;;  %v2449_v30 = vsub.f32 %v5216_v13, %v440_v19  ;;  %v5218_v39 = vmax.f32 %v2080_v45, 0.0  ;;  %5221 = vst [vmem:[#allocation97_spill] sm:$0xff] %v2466_v22  ;;  %v2484_v53 = vpop.eup %1569 }
  0x82   :  { %v2460_v60 = vsub.f32 %v5219_v59, %v442_v36  ;;  %v2464_v20 = vsub.f32 %v5220_v43, %v443_v0  ;;  %v5222_v44 = vmax.f32 %v2094_v54, 0.0  ;;  %v5223_v57 = vmax.f32 %v2104_v61, 0.0 }
  0x83   :  { %v2456_v56 = vsub.f32 %v5218_v39, %v441_v26  ;;  %v5225_v45 = vmax.f32 %v2106_v62, 0.0  ;;  %v5227_v52 = vmax.f32 %v2108_v1, 0.0  ;;  %v5229_v36 = vmax.f32 %v2114_v55, 0.0  ;;  %v5235_v62 = vld [vmem:[#allocation57_spill] sm:$0xff]  ;;  %v2502_v1 = vpop.eup %1571  ;;  %v5241_v55 = vld [vmem:[#allocation59_spill] sm:$0xff] }
  0x84   :  { %v2470_v19 = vsub.f32 %v5222_v44, %v444_v38  ;;  %v2474_v13 = vsub.f32 %v5223_v57, %v445_v50  ;;  %v5231_v54 = vmax.f32 %v2116_v58, 0.0  ;;  %v5233_v61 = vmax.f32 %v5131_v14, 0.0 }
  0x85   :  { %v2478_v26 = vsub.f32 %v5225_v45, %v446_v11  ;;  %v2482_v59 = vsub.f32 %v5227_v52, %v447_v27  ;;  %v2488_v0 = vsub.f32 %v5229_v36, %v448_v21  ;;  %v5236_v11 = vmax.f32 %v5235_v62, 0.0  ;;  %v5238_v27 = vld [vmem:[#allocation58_spill] sm:$0xff]  ;;  %v5248_v45 = vld [vmem:[#allocation63_spill] sm:$0xff] }
  0x86   :  { %5224 = vst [vmem:[#allocation98_spill] sm:$0xff] %v2474_v13  ;;  %v2492_v38 = vsub.f32 %v5231_v54, %v449_v10  ;;  %v2496_v50 = vsub.f32 %v5233_v61, %v450_v40  ;;  %v5239_v43 = vmax.f32 %v5238_v27, 0.0  ;;  %v5242_v21 = vmax.f32 %v5241_v55, 0.0 }
  0x87   :  { %5226 = vst [vmem:[#allocation99_spill] sm:$0xff] %v2478_v26  ;;  %v2500_v39 = vsub.f32 %v5236_v11, %v451_v8  ;;  %v5244_v58 = vmax.f32 %v5136_v25, 0.0  ;;  %v5246_v14 = vmax.f32 %v5137_v23, 0.0  ;;  %v2520_v8 = vpop.eup %1573  ;;  %v5249_v52 = vmax.f32 %v5248_v45, 0.0  ;;  %v5257_v25 = vld [vmem:[#allocation81_spill] sm:$0xff]  ;;  %v5259_v23 = vld [vmem:[#allocation67_spill] sm:$0xff] }
  0x88   :  { %5228 = vst [vmem:[#allocation100_spill] sm:$0xff] %v2482_v59  ;;  %v2506_v44 = vsub.f32 %v5239_v43, %v452_v9  ;;  %v2510_v57 = vsub.f32 %v5242_v21, %v453_v3  ;;  %v5251_v9 = vld [vmem:[#allocation65_spill] sm:$0xff]  ;;  %v5254_v3 = vld [vmem:[#allocation66_spill] sm:$0xff]  ;;  %v2535_v27 = vpop.eup %1575  ;;  %v5262_v55 = vmax.f32 %v5144_v28, 0.0  ;;  %v2546_v21 = vadd.f32 1.0, %v5257_v25 }
  0x89   :  { %5230 = vst [vmem:[#allocation101_spill] sm:$0xff] %v2488_v0  ;;  %v2514_v10 = vsub.f32 %v5244_v58, %v454_v6  ;;  %v2518_v40 = vsub.f32 %v5246_v14, %v455_v4  ;;  %v2524_v36 = vsub.f32 %v5249_v52, %v456_v5  ;;  %v5252_v54 = vmax.f32 %v5251_v9, 0.0  ;;  %v2549_v14 = vpop.eup %1577  ;;  %v5269_v52 = vld [vmem:[#allocation70_spill] sm:$0xff]  ;;  %v5349_v0 = vld [vmem:[#allocation75_spill] sm:$0xff] }
  0x8a   :  { %5232 = vst [vmem:[#allocation102_spill] sm:$0xff] %v2492_v38  ;;  %v5255_v62 = vmax.f32 %v5254_v3, 0.0  ;;  %v506_v6 = vmul.f32 -0.5, %v5257_v25  ;;  %v5260_v4 = vmax.f32 %v5259_v23, 0.0  ;;  %v2543_v5 = vsub.f32 %v5262_v55, %v460_v51  ;;  %v5279_v55 = vld [vmem:[#allocation74_spill] sm:$0xff] }
  0x8b   :  { %5234 = vst [vmem:[#allocation103_spill] sm:$0xff] %v2496_v50  ;;  %v2528_v61 = vsub.f32 %v5252_v54, %v457_v33  ;;  %v5265_v33 = vld [vmem:[#allocation82_spill] sm:$0xff]  ;;  %v5270_v9 = vmax.f32 %v5269_v52, 0.0  ;;  %1579 = vlog2.f32 %v2546_v21  ;;  %v5346_v38 = vmov 0 }
  0x8c   :  { %5237 = vst [vmem:[#allocation57_spill] sm:$0xff] %v2500_v39  ;;  %v2532_v11 = vsub.f32 %v5255_v62, %v458_v7  ;;  %v2539_v43 = vsub.f32 %v5260_v4, %v459_v63  ;;  %v515_v58 = vmul.f32 -0.5, %v5265_v33  ;;  %v5267_v7 = vmax.f32 %v5145_v29, 0.0  ;;  %v5272_v63 = vld [vmem:[#allocation72_spill] sm:$0xff]  ;;  %v5276_v62 = vld [vmem:[#allocation73_spill] sm:$0xff] }
  0x8d   :  { %5240 = vst [vmem:[#allocation58_spill] sm:$0xff] %v2506_v44  ;;  %v2557_v54 = vsub.f32 %v5270_v9, %v462_v18  ;;  %v5273_v3 = vmax.f32 %v5272_v63, 0.0  ;;  %v2564_v51 = vadd.f32 1.0, %v5265_v33  ;;  %v5277_v23 = vmax.f32 %v5276_v62, 0.0  ;;  %v5284_v63 = vld [vmem:[#allocation84_spill] sm:$0xff] }
  0x8e   :  { %5243 = vst [vmem:[#allocation59_spill] sm:$0xff] %v2510_v57  ;;  %v2553_v45 = vsub.f32 %v5267_v7, %v461_v2  ;;  %v5282_v2 = vld [vmem:[#allocation83_spill] sm:$0xff]  ;;  %v507_v7 = vadd.f32 1.0, %v506_v6  ;;  %v518_v52 = vand.u32 2147483647, %v5265_v33  ;;  %v516_v9 = vadd.f32 1.0, %v515_v58 }
  0x8f   :  { %5245 = vst [vmem:[#allocation104_spill] sm:$0xff] %v2514_v10  ;;  %v2561_v28 = vsub.f32 %v5273_v3, %v463_v41  ;;  %v2568_v4 = vsub.f32 %v5277_v23, %v464_v46  ;;  %v2576_v18 = vadd.f32 1.0, %v5282_v2  ;;  %v509_v41 = vand.u32 2147483647, %v5257_v25  ;;  %v5330_v44 = vld [vmem:[#allocation68_spill] sm:$0xff] }
  0x90   :  { %5247 = vst [vmem:[#allocation105_spill] sm:$0xff] %v2518_v40  ;;  %1581 = vlog2.f32 %v2564_v51  ;;  %v524_v46 = vmul.f32 -0.5, %v5282_v2  ;;  %v5288_v6 = vmax.f32 %v5153_v17, 0.0  ;;  %v527_v23 = vand.u32 2147483647, %v5282_v2 }
  0x91   :  { %5250 = vst [vmem:[#allocation63_spill] sm:$0xff] %v2524_v36  ;;  %1583 = vlog2.f32 %v2576_v18  ;;  %v5290_v58 = vmax.f32 %v5155_v37, 0.0  ;;  %v5295_v17 = vmax.f32 %v5157_v31, 0.0  ;;  %vm2613_vm0 = vcmp.lt.f32.partialorder %v509_v41, 0.0004427343 }
  0x92   :  { %5253 = vst [vmem:[#allocation65_spill] sm:$0xff] %v2528_v61  ;;  %v2592_v62 = vsub.f32 %v5288_v6, %v467_v47  ;;  %vm2617_vm1 = vcmp.lt.f32.partialorder %v518_v52, 0.0004427343  ;;  %vm2628_vm2 = vcmp.lt.f32.partialorder %v527_v23, 0.0004427343 }
  0x93   :  { %5256 = vst [vmem:[#allocation66_spill] sm:$0xff] %v2532_v11  ;;  %v2608_v47 = vsub.f32 %v5295_v17, %v470_v49  ;;  %v5302_v49 = vld [vmem:[#allocation86_spill] sm:$0xff]  ;;  %v536_v52 = vand.u32 2147483647, %v5284_v63 }
  0x94   :  { %5258 = vst [vmem:[#allocation106_spill] sm:$0xff] %v2535_v27  ;;  %v2634_v17 = vadd.f32 1.0, %v5302_v49  ;;  %v554_v23 = vand.u32 2147483647, %v5302_v49 }
  0x95   :  { %5261 = vst [vmem:[#allocation67_spill] sm:$0xff] %v2539_v43  ;;  %vm2662_vm3 = vcmp.lt.f32.partialorder %v536_v52, 0.0004427343  ;;  %v5323_v43 = vld [vmem:[#allocation62_spill] sm:$0xff] }
  0x96   :  { %5263 = vst [vmem:[#allocation107_spill] sm:$0xff] %v2543_v5  ;;  %v5280_v5 = vmax.f32 %v5279_v55, 0.0  ;;  %v533_v55 = vmul.f32 -0.5, %v5284_v63  ;;  %vm2680_vm5 = vcmp.lt.f32.partialorder %v554_v23, 0.0004427343  ;;  %v5318_v23 = vmov 0 }
  0x97   :  { %5264 = vst [vmem:[#allocation108_spill] sm:$0xff] %v2546_v21  ;;  %v2716_v11 = vadd.f32 1.0, %v5323_v43 }
  0x98   :  { %5266 = vst [vmem:[#allocation109_spill] sm:$0xff] %v2549_v14  ;;  %v2572_v29 = vsub.f32 %v5280_v5, %v465_v32  ;;  %v2584_v32 = vadd.f32 1.0, %v5284_v63  ;;  %v5286_v5 = vmax.f32 %v5152_v34, 0.0  ;;  %v5294_v34 = vld [vmem:[#allocation85_spill] sm:$0xff] }
  0x99   :  { %5268 = vst [vmem:[#allocation110_spill] sm:$0xff] %v2553_v45  ;;  %v2625_v31 = vadd.f32 1.0, %v5294_v34 }
  0x9a   :  { %5271 = vst [vmem:[#allocation70_spill] sm:$0xff] %v2557_v54  ;;  %v2588_v3 = vsub.f32 %v5286_v5, %v466_v42  ;;  %1585 = vlog2.f32 %v2584_v32  ;;  %v542_v42 = vmul.f32 -0.5, %v5294_v34  ;;  %v2611_v5 = vmul.f32 %v5257_v25, %v507_v7 }
  0x9b   :  { %5274 = vst [vmem:[#allocation72_spill] sm:$0xff] %v2561_v28  ;;  %1587 = vlog2.f32 %v2625_v31 }
  0x9c   :  { %5275 = vst [vmem:[#allocation111_spill] sm:$0xff] %v2564_v51  ;;  %1589 = vlog2.f32 %v2634_v17 }
  0x9d   :  { %5278 = vst [vmem:[#allocation73_spill] sm:$0xff] %v2568_v4 }
  0x9e   :  { %5281 = vst [vmem:[#allocation74_spill] sm:$0xff] %v2572_v29  ;;  %v2598_v29 = vsub.f32 %v5290_v58, %v468_v24  ;;  %v2622_v24 = vmul.f32 %v5265_v33, %v516_v9  ;;  %v534_v58 = vadd.f32 1.0, %v533_v55  ;;  %v543_v9 = vadd.f32 1.0, %v542_v42  ;;  %v5308_v55 = vld [vmem:[#allocation88_spill] sm:$0xff] }
  0x9f   :  { %5283 = vst [vmem:[#allocation112_spill] sm:$0xff] %v2576_v18  ;;  %v5292_v18 = vmax.f32 %v5156_v48, 0.0  ;;  %v1580_v48 = vpop.eup %1579 }
  0xa0   :  { %5285 = vst [vmem:[#allocation113_spill] sm:$0xff] %v2584_v32  ;;  %v1582_v7 = vpop.eup %1581  ;;  %v2660_v25 = vmul.f32 %v5284_v63, %v534_v58  ;;  %v2678_v58 = vmul.f32 %v5294_v34, %v543_v9 }
  0xa1   :  { %5287 = vst [vmem:[#allocation114_spill] sm:$0xff] %v2588_v3  ;;  %v2602_v51 = vsub.f32 %v5292_v18, %v469_v12  ;;  %v525_v12 = vadd.f32 1.0, %v524_v46  ;;  %v551_v18 = vmul.f32 -0.5, %v5302_v49  ;;  %v545_v46 = vand.u32 2147483647, %v5294_v34 }
  0xa2   :  { %5289 = vst [vmem:[#allocation115_spill] sm:$0xff] %v2592_v62  ;;  %v2641_v62 = vmul.f32 0.6931472, %v1580_v48  ;;  %v2646_v3 = vadd.f32 1.0, %v5308_v55  ;;  %v2648_v21 = vmul.f32 0.6931472, %v1582_v7 }
  0xa3   :  { %5291 = vst [vmem:[#allocation116_spill] sm:$0xff] %v2598_v29  ;;  %v552_v33 = vadd.f32 1.0, %v551_v18  ;;  %v2655_v48 = vmul.f32 %v5282_v2, %v525_v12  ;;  %vm2666_vm4 = vcmp.lt.f32.partialorder %v545_v46, 0.0004427343  ;;  %v5316_v12 = vld [vmem:[#allocation55_spill] sm:$0xff] }
  0xa4   :  { %5293 = vst [vmem:[#allocation117_spill] sm:$0xff] %v2602_v51  ;;  %v5306_v51 = vld [vmem:[#allocation87_spill] sm:$0xff]  ;;  %v572_v34 = vand.u32 2147483647, %v5308_v55  ;;  %v581_v36 = vand.u32 2147483647, %v5316_v12 }
  0xa5   :  { %5296 = vst [vmem:[#allocation118_spill] sm:$0xff] %v2608_v47  ;;  %v1584_v47 = vpop.eup %1583  ;;  %v2639_v29 = vadd.f32 1.0, %v5306_v51  ;;  %v560_v42 = vmul.f32 -0.5, %v5306_v51  ;;  %v2689_v63 = vmul.f32 %v5302_v49, %v552_v33 }
  0xa6   :  { %5301 = vst [vmem:[#allocation119_spill] sm:$0xff] %v2625_v31  ;;  %v1586_v32 = vpop.eup %1585  ;;  %v2652_v31 = vmul.f32 0.6931472, %v1584_v47  ;;  %v569_v47 = vmul.f32 -0.5, %v5308_v55  ;;  %vm2742_vm7 = vcmp.lt.f32.partialorder %v572_v34, 0.0004427343 }
  0xa7   :  { %5305 = vst [vmem:[#allocation120_spill] sm:$0xff] %v2634_v17  ;;  %1591 = vlog2.f32 %v2639_v29  ;;  %v563_v17 = vand.u32 2147483647, %v5306_v51  ;;  %v1588_v46 = vpop.eup %1587  ;;  %v561_v2 = vadd.f32 1.0, %v560_v42  ;;  %v5321_v42 = vld [vmem:[#allocation61_spill] sm:$0xff] }
  0xa8   :  { %5307 = vst [vmem:[#allocation121_spill] sm:$0xff] %v2639_v29  ;;  %1593 = vlog2.f32 %v2646_v3  ;;  %v2675_v29 = vmul.f32 0.6931472, %v1586_v32  ;;  %v2692_v32 = vadd.f32 1.0, %v5316_v12  ;;  %v1590_v4 = vpop.eup %1589  ;;  %v570_v49 = vadd.f32 1.0, %v569_v47  ;;  %v5342_v34 = vld [vmem:[#allocation69_spill] sm:$0xff] }
  0xa9   :  { %5309 = vst [vmem:[#allocation122_spill] sm:$0xff] %v2646_v3  ;;  %vm2698_vm6 = vcmp.lt.f32.partialorder %v563_v17, 0.0004427343  ;;  %v578_v3 = vmul.f32 -0.5, %v5316_v12  ;;  %v2706_v28 = vadd.f32 1.0, %v5321_v42  ;;  %v587_v54 = vmul.f32 -0.5, %v5321_v42 }
  0xaa   :  { %5317 = vst [vmem:[#allocation123_spill] sm:$0xff] %v2692_v32  ;;  %v5319_v23 = vsel %vm2698_vm6, 4294967295, %v5318_v23  ;;  %1595 = vlog2.f32 %v2692_v32  ;;  %v2713_v9 = vmul.f32 0.6931472, %v1588_v46  ;;  %v596_v47 = vmul.f32 -0.5, %v5323_v43 }
  0xab   :  { %5320 = vst [vmem:[#allocation124_spill] sm:$0xff] %v5319_v23  ;;  %v2719_v61 = vmul.f32 0.6931472, %v1590_v4  ;;  %v2722_v32 = vmul.f32 %v5306_v51, %v561_v2  ;;  %1597 = vlog2.f32 %v2706_v28  ;;  %v579_v10 = vadd.f32 1.0, %v578_v3  ;;  %v5365_v23 = vld [vmem:[#allocation79_spill] sm:$0xff] }
  0xac   :  { %5322 = vst [vmem:[#allocation125_spill] sm:$0xff] %v2706_v28  ;;  %v590_v46 = vand.u32 2147483647, %v5321_v42  ;;  %1599 = vlog2.f32 %v2716_v11  ;;  %v2733_v57 = vmul.f32 %v5308_v55, %v570_v49  ;;  %v588_v4 = vadd.f32 1.0, %v587_v54 }
  0xad   :  { %v1592_v33 = vpop.eup %1591  ;;  %5324 = vst [vmem:[#allocation126_spill] sm:$0xff] %v2716_v11  ;;  %v2736_v2 = vadd.f32 1.0, %v5330_v44  ;;  %v5332_v3 = vmov 0  ;;  %v597_v28 = vadd.f32 1.0, %v596_v47  ;;  %v605_v49 = vmul.f32 -0.5, %v5330_v44 }
  0xae   :  { %v1594_v45 = vpop.eup %1593  ;;  %5325 = vst [vmem:[#allocation127_spill] sm:$0xff] %v2719_v61  ;;  %v2726_v40 = vmul.f32 0.6931472, %v1592_v33  ;;  %v5333_v3 = vsel %vm2742_vm7, 4294967295, %v5332_v3  ;;  %v608_v55 = vand.u32 2147483647, %v5330_v44  ;;  %v2759_v47 = vmul.f32 %v5316_v12, %v579_v10 }
  0xaf   :  { %5326 = vst [vmem:[#allocation128_spill] sm:$0xff] %v2722_v32  ;;  %v2730_v17 = vmul.f32 0.6931472, %v1594_v45  ;;  %v599_v45 = vand.u32 2147483647, %v5323_v43  ;;  %1601 = vlog2.f32 %v2736_v2  ;;  %v5338_v54 = vmov 0 }
  0xb0   :  { %5327 = vst [vmem:[#allocation129_spill] sm:$0xff] %v2726_v40  ;;  %v1596_v11 = vpop.eup %1595  ;;  %vm2761_vm8 = vcmp.lt.f32.partialorder %v581_v36, 0.0004427343  ;;  %vm2765_vm9 = vcmp.lt.f32.partialorder %v590_v46, 0.0004427343  ;;  %v2774_v39 = vmul.f32 %v5321_v42, %v588_v4  ;;  %v2777_v10 = vadd.f32 1.0, %v5342_v34 }
  0xb1   :  { %5328 = vst [vmem:[#allocation130_spill] sm:$0xff] %v2730_v17  ;;  %v5339_v54 = vsel %vm2765_vm9, 4294967295, %v5338_v54  ;;  %v614_v36 = vmul.f32 -0.5, %v5342_v34  ;;  %v2780_v50 = vmul.f32 0.6931472, %v1596_v11  ;;  %v2783_v46 = vmul.f32 %v5323_v43, %v597_v28 }
  0xb2   :  { %5329 = vst [vmem:[#allocation131_spill] sm:$0xff] %v2733_v57  ;;  %vm2785_vm10 = vcmp.lt.f32.partialorder %v599_v45, 0.0004427343  ;;  %v623_v51 = vmul.f32 -0.5, %v5349_v0  ;;  %v606_v59 = vadd.f32 1.0, %v605_v49  ;;  %v5350_v4 = vmov 0 }
  0xb3   :  { %5331 = vst [vmem:[#allocation132_spill] sm:$0xff] %v2736_v2  ;;  %v1598_v2 = vpop.eup %1597  ;;  %v5347_v38 = vsel %vm2785_vm10, 4294967295, %v5346_v38  ;;  %vm2790_vm11 = vcmp.lt.f32.partialorder %v608_v55, 0.0004427343  ;;  %1603 = vlog2.f32 %v2777_v10  ;;  %v2796_v42 = vadd.f32 1.0, %v5349_v0  ;;  %v5355_v45 = vld [vmem:[#allocation76_spill] sm:$0xff] }
  0xb4   :  { %5334 = vst [vmem:[#allocation133_spill] sm:$0xff] %v5333_v3  ;;  %v1600_v12 = vpop.eup %1599  ;;  %v5351_v4 = vsel %vm2790_vm11, 4294967295, %v5350_v4  ;;  %v2798_v11 = vmul.f32 0.6931472, %v1598_v2  ;;  %v617_v28 = vand.u32 2147483647, %v5342_v34 }
  0xb5   :  { %5335 = vst [vmem:[#allocation134_spill] sm:$0xff] %v2759_v47  ;;  %v2802_v43 = vadd.f32 1.0, %v5355_v45  ;;  %v632_v17 = vmul.f32 -0.5, %v5355_v45  ;;  %v1602_v57 = vpop.eup %1601  ;;  %v2805_v49 = vmul.f32 0.6931472, %v1600_v12  ;;  %v615_v55 = vadd.f32 1.0, %v614_v36 }
  0xb6   :  { %5340 = vst [vmem:[#allocation135_spill] sm:$0xff] %v5339_v54  ;;  %1605 = vlog2.f32 %v2796_v42  ;;  %v5358_v3 = vld [vmem:[#allocation77_spill] sm:$0xff]  ;;  %v624_v26 = vadd.f32 1.0, %v623_v51  ;;  %v626_v2 = vand.u32 2147483647, %v5349_v0  ;;  %v2819_v12 = vmul.f32 %v5330_v44, %v606_v59 }
  0xb7   :  { %5341 = vst [vmem:[#allocation136_spill] sm:$0xff] %v2774_v39  ;;  %1607 = vlog2.f32 %v2802_v43  ;;  %v641_v40 = vmul.f32 -0.5, %v5358_v3  ;;  %v635_v36 = vand.u32 2147483647, %v5355_v45  ;;  %vm2825_vm12 = vcmp.lt.f32.partialorder %v617_v28, 0.0004427343 }
  0xb8   :  { %5343 = vst [vmem:[#allocation137_spill] sm:$0xff] %v2777_v10  ;;  %v2809_v10 = vadd.f32 1.0, %v5358_v3  ;;  %v5362_v51 = vmov 0  ;;  %v2830_v13 = vadd.f32 1.0, %v5365_v23  ;;  %v2841_v28 = vmul.f32 %v5342_v34, %v615_v55  ;;  %v5481_v41 = vld [vmem:[#allocation129_spill] sm:$0xff] }
  0xb9   :  { %5344 = vst [vmem:[#allocation138_spill] sm:$0xff] %v2780_v50  ;;  %v5363_v51 = vsel %vm2825_vm12, 4294967295, %v5362_v51  ;;  %v1604_v61 = vpop.eup %1603  ;;  %v644_v32 = vand.u32 2147483647, %v5358_v3  ;;  %vm2847_vm13 = vcmp.lt.f32.partialorder %v626_v2, 0.0004427343 }
  0xba   :  { %5345 = vst [vmem:[#allocation139_spill] sm:$0xff] %v2783_v46  ;;  %1609 = vlog2.f32 %v2809_v10  ;;  %v642_v44 = vadd.f32 1.0, %v641_v40  ;;  %vm2852_vm14 = vcmp.lt.f32.partialorder %v635_v36, 0.0004427343  ;;  %v650_v55 = vmul.f32 -0.5, %v5365_v23 }
  0xbb   :  { %5348 = vst [vmem:[#allocation140_spill] sm:$0xff] %v5347_v38  ;;  %1611 = vlog2.f32 %v2830_v13  ;;  %v2865_v2 = vmul.f32 0.6931472, %v1604_v61  ;;  %vm2873_vm15 = vcmp.lt.f32.partialorder %v644_v32, 0.0004427343  ;;  %v5379_v38 = vmov 0 }
  0xbc   :  { %5352 = vst [vmem:[#allocation141_spill] sm:$0xff] %v5351_v4  ;;  %v1606_v59 = vpop.eup %1605  ;;  %v5380_v38 = vsel %vm2873_vm15, 4294967295, %v5379_v38  ;;  %v653_v39 = vand.u32 2147483647, %v5365_v23  ;;  %v2883_v61 = vmul.f32 %v5358_v3, %v642_v44  ;;  %v5388_v44 = vld [vmem:[#allocation91_spill] sm:$0xff] }
  0xbd   :  { %5353 = vst [vmem:[#allocation142_spill] sm:$0xff] %v2796_v42  ;;  %v2823_v42 = vmul.f32 0.6931472, %v1602_v57  ;;  %v5374_v57 = vld [vmem:[#allocation80_spill] sm:$0xff]  ;;  %v2880_v40 = vmul.f32 0.6931472, %v1606_v59 }
  0xbe   :  { %5354 = vst [vmem:[#allocation143_spill] sm:$0xff] %v2798_v11  ;;  %v5371_v11 = vmov 0  ;;  %v2858_v34 = vadd.f32 1.0, %v5374_v57  ;;  %v662_v54 = vand.u32 2147483647, %v5374_v57  ;;  %v2897_v3 = vadd.f32 1.0, %v5388_v44 }
  0xbf   :  { %5356 = vst [vmem:[#allocation144_spill] sm:$0xff] %v2802_v43  ;;  %v633_v43 = vadd.f32 1.0, %v632_v17  ;;  %v2845_v17 = vmul.f32 %v5349_v0, %v624_v26  ;;  %v5372_v11 = vsel %vm2852_vm14, 4294967295, %v5371_v11  ;;  %v659_v26 = vmul.f32 -0.5, %v5374_v57  ;;  %v1608_v0 = vpop.eup %1607 }
  0xc0   :  { %5357 = vst [vmem:[#allocation145_spill] sm:$0xff] %v2805_v49  ;;  %v1610_v46 = vpop.eup %1609  ;;  %1613 = vlog2.f32 %v2858_v34  ;;  %v2889_v32 = vmul.f32 0.6931472, %v1608_v0  ;;  %vm2903_vm11 = vcmp.lt.f32.partialorder %v653_v39, 0.0004427343  ;;  %v686_v47 = vmul.f32 -0.5, %v5388_v44 }
  0xc1   :  { %5359 = vst [vmem:[#allocation146_spill] sm:$0xff] %v2809_v10  ;;  %v5368_v10 = vmov 0  ;;  %v2868_v36 = vmul.f32 %v5355_v45, %v633_v43  ;;  %v5384_v43 = vld [vmem:[#allocation90_spill] sm:$0xff]  ;;  %v1612_v50 = vpop.eup %1611  ;;  %vm2924_vm12 = vcmp.lt.f32.partialorder %v662_v54, 0.0004427343  ;;  %v5395_v39 = vmov 0 }
  0xc2   :  { %5360 = vst [vmem:[#allocation147_spill] sm:$0xff] %v2819_v12  ;;  %v5369_v10 = vsel %vm2847_vm13, 4294967295, %v5368_v10  ;;  %v2887_v45 = vadd.f32 1.0, %v5384_v43  ;;  %v660_v12 = vadd.f32 1.0, %v659_v26 }
  0xc3   :  { %5361 = vst [vmem:[#allocation148_spill] sm:$0xff] %v2823_v42  ;;  %v651_v42 = vadd.f32 1.0, %v650_v55  ;;  %v5390_v55 = vmov 0 }
  0xc4   :  { %5364 = vst [vmem:[#allocation149_spill] sm:$0xff] %v5363_v51  ;;  %v5391_v55 = vsel %vm2903_vm11, 4294967295, %v5390_v55 }
  0xc5   :  { %5366 = vst [vmem:[#allocation150_spill] sm:$0xff] %v2830_v13  ;;  %v5377_v13 = vld [vmem:[#allocation89_spill] sm:$0xff]  ;;  %v2922_v0 = vmul.f32 %v5365_v23, %v651_v42 }
  0xc6   :  { %5367 = vst [vmem:[#allocation151_spill] sm:$0xff] %v2845_v17  ;;  %v2871_v49 = vadd.f32 1.0, %v5377_v13  ;;  %v668_v4 = vmul.f32 -0.5, %v5377_v13  ;;  %v671_v59 = vand.u32 2147483647, %v5377_v13  ;;  %v1614_v51 = vpop.eup %1613 }
  0xc7   :  { %5370 = vst [vmem:[#allocation152_spill] sm:$0xff] %v5369_v10  ;;  %v5393_v10 = vmov 0  ;;  %v5504_v18 = vld [vmem:[#allocation145_spill] sm:$0xff] }
  0xc8   :  { %5373 = vst [vmem:[#allocation153_spill] sm:$0xff] %v5372_v11  ;;  %1615 = vlog2.f32 %v2871_v49  ;;  %v669_v26 = vadd.f32 1.0, %v668_v4  ;;  %v2919_v4 = vmul.f32 0.6931472, %v1612_v50  ;;  %v5394_v10 = vsel %vm2924_vm12, 4294967295, %v5393_v10  ;;  %v5397_v50 = vld [vmem:[#allocation92_spill] sm:$0xff] }
  0xc9   :  { %5375 = vst [vmem:[#allocation154_spill] sm:$0xff] %v2858_v34  ;;  %v2892_v34 = vmul.f32 0.6931472, %v1610_v46  ;;  %1617 = vlog2.f32 %v2887_v45  ;;  %v677_v46 = vmul.f32 -0.5, %v5384_v43  ;;  %vm2935_vm13 = vcmp.lt.f32.partialorder %v671_v59, 0.0004427343 }
  0xca   :  { %5376 = vst [vmem:[#allocation155_spill] sm:$0xff] %v2868_v36  ;;  %1619 = vlog2.f32 %v2897_v3  ;;  %v5396_v39 = vsel %vm2935_vm13, 4294967295, %v5395_v39  ;;  %v695_v42 = vmul.f32 -0.5, %v5397_v50  ;;  %v2941_v54 = vmul.f32 %v5377_v13, %v669_v26 }
  0xcb   :  { %5378 = vst [vmem:[#allocation156_spill] sm:$0xff] %v2871_v49  ;;  %v680_v49 = vand.u32 2147483647, %v5384_v43  ;;  %v678_v23 = vadd.f32 1.0, %v677_v46  ;;  %v2945_v36 = vadd.f32 1.0, %v5397_v50  ;;  %v687_v59 = vadd.f32 1.0, %v686_v47 }
  0xcc   :  { %5381 = vst [vmem:[#allocation157_spill] sm:$0xff] %v5380_v38  ;;  %v5407_v47 = vld [vmem:[#allocation94_spill] sm:$0xff] }
  0xcd   :  { %5382 = vst [vmem:[#allocation158_spill] sm:$0xff] %v2880_v40  ;;  %v2933_v40 = vmul.f32 %v5374_v57, %v660_v12  ;;  %vm2949_vm15 = vcmp.lt.f32.partialorder %v680_v49, 0.0004427343  ;;  %v5401_v12 = vmov 0  ;;  %v5404_v57 = vld [vmem:[#allocation93_spill] sm:$0xff]  ;;  %1621 = vlog2.f32 %v2945_v36 }
  0xce   :  { %5383 = vst [vmem:[#allocation159_spill] sm:$0xff] %v2883_v61  ;;  %v5402_v12 = vsel %vm2949_vm15, 4294967295, %v5401_v12  ;;  %v696_v49 = vadd.f32 1.0, %v695_v42  ;;  %v698_v61 = vand.u32 2147483647, %v5397_v50  ;;  %v2967_v11 = vadd.f32 1.0, %v5407_v47 }
  0xcf   :  { %5385 = vst [vmem:[#allocation160_spill] sm:$0xff] %v2887_v45  ;;  %v1616_v45 = vpop.eup %1615  ;;  %v707_v26 = vand.u32 2147483647, %v5404_v57 }
  0xd0   :  { %5386 = vst [vmem:[#allocation161_spill] sm:$0xff] %v2889_v32  ;;  %v689_v32 = vand.u32 2147483647, %v5388_v44  ;;  %v1618_v38 = vpop.eup %1617  ;;  %v2960_v46 = vmul.f32 0.6931472, %v1616_v45  ;;  %v5411_v45 = vmov 0 }
  0xd1   :  { %5387 = vst [vmem:[#allocation162_spill] sm:$0xff] %v2892_v34  ;;  %v2954_v34 = vadd.f32 1.0, %v5404_v57  ;;  %v1620_v13 = vpop.eup %1619  ;;  %v2969_v17 = vmul.f32 0.6931472, %v1618_v38  ;;  %v713_v38 = vmul.f32 -0.5, %v5407_v47 }
  0xd2   :  { %5389 = vst [vmem:[#allocation163_spill] sm:$0xff] %v2897_v3  ;;  %v2947_v3 = vmul.f32 0.6931472, %v1614_v51  ;;  %v704_v51 = vmul.f32 -0.5, %v5404_v57  ;;  %vm2974_vm11 = vcmp.lt.f32.partialorder %v689_v32, 0.0004427343 }
  0xd3   :  { %5392 = vst [vmem:[#allocation164_spill] sm:$0xff] %v5391_v55  ;;  %1623 = vlog2.f32 %v2954_v34  ;;  %v2972_v55 = vmul.f32 %v5384_v43, %v678_v23  ;;  %v5412_v45 = vsel %vm2974_vm11, 4294967295, %v5411_v45  ;;  %v2988_v23 = vmul.f32 0.6931472, %v1620_v13 }
  0xd4   :  { %5398 = vst [vmem:[#allocation165_spill] sm:$0xff] %v2941_v54  ;;  %1625 = vlog2.f32 %v2967_v11  ;;  %v705_v32 = vadd.f32 1.0, %v704_v51  ;;  %v2992_v43 = vadd.f32 1.0, %v2436_v15  ;;  %vm3001_vm12 = vcmp.lt.f32.partialorder %v698_v61, 0.0004427343  ;;  %v1622_v51 = vpop.eup %1621 }
  0xd5   :  { %5399 = vst [vmem:[#allocation166_spill] sm:$0xff] %v2945_v36  ;;  %v716_v36 = vand.u32 2147483647, %v5407_v47  ;;  %v722_v13 = vmul.f32 -0.5, %v2436_v15  ;;  %vm3010_vm14 = vcmp.lt.f32.partialorder %v707_v26, 0.0004427343 }
  0xd6   :  { %5400 = vst [vmem:[#allocation167_spill] sm:$0xff] %v2947_v3  ;;  %v5421_v3 = vmov 0  ;;  %1627 = vlog2.f32 %v2992_v43  ;;  %v714_v42 = vadd.f32 1.0, %v713_v38  ;;  %v3021_v54 = vadd.f32 1.0, %v2466_v22 }
  0xd7   :  { %5403 = vst [vmem:[#allocation168_spill] sm:$0xff] %v5402_v12  ;;  %v5422_v3 = vsel %vm3010_vm14, 4294967295, %v5421_v3  ;;  %vm3030_vm15 = vcmp.lt.f32.partialorder %v716_v36, 0.0004427343  ;;  %v3039_v12 = vadd.f32 1.0, %v2484_v53  ;;  %v740_v36 = vmul.f32 -0.5, %v2466_v22 }
  0xd8   :  { %5405 = vst [vmem:[#allocation169_spill] sm:$0xff] %v2954_v34  ;;  %v2984_v34 = vmul.f32 %v5388_v44, %v687_v59  ;;  %v2999_v59 = vmul.f32 %v5397_v50, %v696_v49  ;;  %v3016_v49 = vadd.f32 1.0, %v2451_v16  ;;  %v725_v50 = vand.u32 2147483647, %v2436_v15 }
  0xd9   :  { %5406 = vst [vmem:[#allocation170_spill] sm:$0xff] %v2960_v46  ;;  %v1624_v61 = vpop.eup %1623  ;;  %v731_v46 = vmul.f32 -0.5, %v2451_v16  ;;  %v3028_v44 = vmul.f32 %v5404_v57, %v705_v32  ;;  %v734_v32 = vand.u32 2147483647, %v2451_v16  ;;  %v3046_v26 = vadd.f32 1.0, %v2502_v1 }
  0xda   :  { %5408 = vst [vmem:[#allocation171_spill] sm:$0xff] %v2967_v11  ;;  %v5418_v11 = vmov 0  ;;  %1629 = vlog2.f32 %v3016_v49  ;;  %v1626_v38 = vpop.eup %1625  ;;  %vm3051_vm11 = vcmp.lt.f32.partialorder %v725_v50, 0.0004427343  ;;  %v749_v57 = vmul.f32 -0.5, %v2484_v53 }
  0xdb   :  { %5409 = vst [vmem:[#allocation172_spill] sm:$0xff] %v2969_v17  ;;  %v5419_v11 = vsel %vm3001_vm12, 4294967295, %v5418_v11  ;;  %v3035_v17 = vmul.f32 0.6931472, %v1622_v51  ;;  %1631 = vlog2.f32 %v3021_v54  ;;  %vm3076_vm13 = vcmp.lt.f32.partialorder %v734_v32, 0.0004427343 }
  0xdc   :  { %5410 = vst [vmem:[#allocation173_spill] sm:$0xff] %v2972_v55  ;;  %v723_v55 = vadd.f32 1.0, %v722_v13  ;;  %v732_v13 = vadd.f32 1.0, %v731_v46  ;;  %1633 = vlog2.f32 %v3039_v12  ;;  %v743_v46 = vand.u32 2147483647, %v2466_v22 }
  0xdd   :  { %5413 = vst [vmem:[#allocation174_spill] sm:$0xff] %v5412_v45  ;;  %v3041_v45 = vmul.f32 0.6931472, %v1624_v61  ;;  %v3056_v61 = vmul.f32 0.6931472, %v1626_v38  ;;  %1635 = vlog2.f32 %v3046_v26  ;;  %v758_v38 = vmul.f32 -0.5, %v2502_v1 }
  0xde   :  { %5414 = vst [vmem:[#allocation175_spill] sm:$0xff] %v2984_v34  ;;  %v741_v34 = vadd.f32 1.0, %v740_v36  ;;  %v761_v36 = vand.u32 2147483647, %v2502_v1  ;;  %vm3096_vm14 = vcmp.lt.f32.partialorder %v743_v46, 0.0004427343 }
  0xdf   :  { %5415 = vst [vmem:[#allocation176_spill] sm:$0xff] %v2988_v23  ;;  %v3061_v23 = vadd.f32 1.0, %v2520_v8  ;;  %v770_v32 = vand.u32 2147483647, %v2520_v8  ;;  %v5447_v46 = vmov 0 }
  0xe0   :  { %5416 = vst [vmem:[#allocation177_spill] sm:$0xff] %v2992_v43  ;;  %v5427_v43 = vmov 0  ;;  %vm3124_vm12 = vcmp.lt.f32.partialorder %v761_v36, 0.0004427343 }
  0xe1   :  { %5417 = vst [vmem:[#allocation178_spill] sm:$0xff] %v2999_v59  ;;  %v5428_v43 = vsel %vm3030_vm15, 4294967295, %v5427_v43  ;;  %1637 = vlog2.f32 %v3061_v23  ;;  %v767_v59 = vmul.f32 -0.5, %v2520_v8 }
  0xe2   :  { %5420 = vst [vmem:[#allocation179_spill] sm:$0xff] %v5419_v11 }
  0xe3   :  { %5423 = vst [vmem:[#allocation180_spill] sm:$0xff] %v5422_v3 }
  0xe4   :  { %5424 = vst [vmem:[#allocation181_spill] sm:$0xff] %v3016_v49  ;;  %v3049_v49 = vmul.f32 %v5407_v47, %v714_v42  ;;  %v3068_v42 = vmul.f32 %v2436_v15, %v723_v55  ;;  %v3084_v15 = vmul.f32 %v2451_v16, %v732_v13  ;;  %v5441_v13 = vmov 0  ;;  %v5593_v47 = vld [vmem:[#allocation72_spill] sm:$0xff] }
  0xe5   :  { %5425 = vst [vmem:[#allocation182_spill] sm:$0xff] %v3021_v54  ;;  %v1628_v54 = vpop.eup %1627  ;;  %v5442_v13 = vsel %vm3096_vm14, 4294967295, %v5441_v13  ;;  %v759_v16 = vadd.f32 1.0, %v758_v38  ;;  %v768_v38 = vadd.f32 1.0, %v767_v59 }
  0xe6   :  { %5426 = vst [vmem:[#allocation183_spill] sm:$0xff] %v3028_v44  ;;  %v3081_v55 = vmul.f32 0.6931472, %v1628_v54  ;;  %v3101_v44 = vadd.f32 1.0, %v2535_v27 }
  0xe7   :  { %5429 = vst [vmem:[#allocation184_spill] sm:$0xff] %v5428_v43  ;;  %v3135_v59 = vmul.f32 %v2502_v1, %v759_v16  ;;  %v3152_v16 = vmul.f32 %v2520_v8, %v768_v38 }
  0xe8   :  { %5430 = vst [vmem:[#allocation185_spill] sm:$0xff] %v3035_v17  ;;  %v752_v17 = vand.u32 2147483647, %v2484_v53  ;;  %1639 = vlog2.f32 %v3101_v44 }
  0xe9   :  { %5431 = vst [vmem:[#allocation186_spill] sm:$0xff] %v3039_v12  ;;  %v1630_v12 = vpop.eup %1629 }
  0xea   :  { %5432 = vst [vmem:[#allocation187_spill] sm:$0xff] %v3041_v45  ;;  %v1632_v50 = vpop.eup %1631  ;;  %v3094_v54 = vmul.f32 0.6931472, %v1630_v12  ;;  %v727_v12 = vsel %vm3051_vm11, %v3068_v42, %v3081_v55  ;;  %vm3114_vm15 = vcmp.lt.f32.partialorder %v752_v17, 0.0004427343  ;;  %v5572_v55 = vld [vmem:[#allocation107_spill] sm:$0xff] }
  0xeb   :  { %5433 = vst [vmem:[#allocation188_spill] sm:$0xff] %v3046_v26  ;;  %v750_v26 = vadd.f32 1.0, %v749_v57  ;;  %v1634_v45 = vpop.eup %1633  ;;  %v3103_v11 = vmul.f32 0.6931472, %v1632_v50  ;;  %v3106_v57 = vmul.f32 %v2466_v22, %v741_v34  ;;  %v5448_v46 = vsel %vm3114_vm15, 4294967295, %v5447_v46  ;;  %v5586_v42 = vld [vmem:[#allocation70_spill] sm:$0xff] }
  0xec   :  { %5434 = vst [vmem:[#allocation189_spill] sm:$0xff] %v3049_v49  ;;  %v1636_v3 = vpop.eup %1635  ;;  %v3119_v49 = vmul.f32 0.6931472, %v1634_v45  ;;  %v5452_v22 = vmov 0  ;;  %v736_v17 = vsel %vm3076_vm13, %v3084_v15, %v3094_v54  ;;  %v3138_v45 = vadd.f32 1.0, %v2549_v14 }
  0xed   :  { %5437 = vst [vmem:[#allocation190_spill] sm:$0xff] %v3056_v61  ;;  %v785_v61 = vmul.f32 -0.5, %v2549_v14  ;;  %v1638_v50 = vpop.eup %1637  ;;  %v3122_v34 = vmul.f32 %v2484_v53, %v750_v26  ;;  %v5453_v22 = vsel %vm3124_vm12, 4294967295, %v5452_v22  ;;  %v3132_v51 = vmul.f32 0.6931472, %v1636_v3  ;;  %v5579_v26 = vld [vmem:[#allocation110_spill] sm:$0xff] }
  0xee   :  { %5438 = vst [vmem:[#allocation191_spill] sm:$0xff] %v3061_v23  ;;  %v776_v23 = vmul.f32 -0.5, %v2535_v27  ;;  %vm3144_vm11 = vcmp.lt.f32.partialorder %v770_v32, 0.0004427343  ;;  %v3149_v3 = vmul.f32 0.6931472, %v1638_v50  ;;  %1641 = vlog2.f32 %v3138_v45  ;;  %v1640_v50 = vpop.eup %1639 }
  0xef   :  { %5443 = vst [vmem:[#allocation192_spill] sm:$0xff] %v5442_v13  ;;  %v786_v15 = vadd.f32 1.0, %v785_v61  ;;  %v5464_v61 = vsel %vm2613_vm0, %v2611_v5, %v2641_v62  ;;  %v5466_v54 = vsel %vm2617_vm1, %v2622_v24, %v2648_v21  ;;  %v5472_v5 = vsel %vm2666_vm4, %v2678_v58, %v2713_v9  ;;  %v5486_v58 = vld [vmem:[#allocation131_spill] sm:$0xff]  ;;  %v5487_v9 = vld [vmem:[#allocation130_spill] sm:$0xff]  ;;  %v5604_v13 = vld [vmem:[#allocation81_spill] sm:$0xff] }
  0xf0   :  { %5444 = vst [vmem:[#allocation193_spill] sm:$0xff] %v3101_v44  ;;  %v777_v43 = vadd.f32 1.0, %v776_v23  ;;  %v5458_v23 = vmov 0  ;;  %v3169_v36 = vadd.f32 %v5464_v61, %v2445_v35  ;;  %v3177_v38 = vadd.f32 %v5466_v54, %v2449_v30  ;;  %v5491_v61 = vld [vmem:[#allocation134_spill] sm:$0xff]  ;;  %v5636_v44 = vld [vmem:[#allocation75_spill] sm:$0xff] }
  0xf1   :  { %5445 = vst [vmem:[#allocation194_spill] sm:$0xff] %v3103_v11  ;;  %v5459_v23 = vsel %vm3144_vm11, 4294967295, %v5458_v23  ;;  %v5468_v35 = vsel %vm2628_vm2, %v2655_v48, %v2652_v31  ;;  %v5470_v30 = vsel %vm2662_vm3, %v2660_v25, %v2675_v29  ;;  %v3205_v6 = vadd.f32 %v5472_v5, %v2464_v20  ;;  %v5480_v31 = vld [vmem:[#allocation128_spill] sm:$0xff]  ;;  %v5484_v20 = vld [vmem:[#allocation99_spill] sm:$0xff]  ;;  %v5492_v54 = vld [vmem:[#allocation138_spill] sm:$0xff] }
  0xf2   :  { %5446 = vst [vmem:[#allocation195_spill] sm:$0xff] %v3106_v57  ;;  %v3161_v32 = vmul.f32 %v2535_v27, %v777_v43  ;;  %v3189_v62 = vadd.f32 %v5468_v35, %v2456_v56  ;;  %v3197_v21 = vadd.f32 %v5470_v30, %v2460_v60  ;;  %v3208_v37 = vmul.f32 %v2549_v14, %v786_v15  ;;  %v5475_v56 = vld [vmem:[#allocation127_spill] sm:$0xff]  ;;  %v5478_v60 = vld [vmem:[#allocation98_spill] sm:$0xff]  ;;  %v5495_v5 = vld [vmem:[#allocation101_spill] sm:$0xff] }
  0xf3   :  { %5449 = vst [vmem:[#allocation196_spill] sm:$0xff] %v5448_v46  ;;  %v5476_v24 = vsel %vm2680_vm5, %v2689_v63, %v5475_v56  ;;  %v5482_v48 = vsel %vm2698_vm6, %v5480_v31, %v5481_v41  ;;  %v5488_v15 = vsel %vm2742_vm7, %v5486_v58, %v5487_v9  ;;  %v5490_v63 = vld [vmem:[#allocation100_spill] sm:$0xff]  ;;  %v5493_v35 = vsel %vm2761_vm8, %v5491_v61, %v5492_v54  ;;  %v5501_v41 = vld [vmem:[#allocation102_spill] sm:$0xff]  ;;  %v5511_v61 = vld [vmem:[#allocation147_spill] sm:$0xff] }
  0xf4   :  { %5450 = vst [vmem:[#allocation197_spill] sm:$0xff] %v3119_v49  ;;  %v3216_v25 = vadd.f32 %v5476_v24, %v2470_v19  ;;  %v3224_v7 = vadd.f32 %v5482_v48, %v5478_v60  ;;  %v3232_v52 = vadd.f32 %v5488_v15, %v5484_v20  ;;  %v3244_v30 = vadd.f32 %v5493_v35, %v5490_v63  ;;  %v5497_v24 = vld [vmem:[#allocation136_spill] sm:$0xff]  ;;  %v5498_v60 = vld [vmem:[#allocation143_spill] sm:$0xff]  ;;  %v5509_v63 = vld [vmem:[#allocation141_spill] sm:$0xff] }
  0xf5   :  { %5451 = vst [vmem:[#allocation198_spill] sm:$0xff] %v3122_v34  ;;  %v5499_v29 = vsel %vm2765_vm9, %v5497_v24, %v5498_v60  ;;  %v5503_v20 = vld [vmem:[#allocation139_spill] sm:$0xff]  ;;  %v3262_v9 = vmul.f32 0.6931472, %v1640_v50  ;;  %vm5510_vm0 = vnez %v5509_v63  ;;  %v5512_v54 = vld [vmem:[#allocation148_spill] sm:$0xff]  ;;  %v5516_v24 = vld [vmem:[#allocation149_spill] sm:$0xff]  ;;  %v3288_v63 = vpop.eup %1641  ;;  %vm5548_vm6 = vnez %v5394_v10 }
  0xf6   :  { %5454 = vst [vmem:[#allocation199_spill] sm:$0xff] %v5453_v22  ;;  %v3252_v31 = vadd.f32 %v5499_v29, %v5495_v5  ;;  %v5505_v58 = vsel %vm2785_vm10, %v5503_v20, %v5504_v18  ;;  %v5508_v15 = vld [vmem:[#allocation103_spill] sm:$0xff]  ;;  %v5513_v35 = vsel %vm5510_vm0, %v5511_v61, %v5512_v54  ;;  %v5515_v5 = vld [vmem:[#allocation57_spill] sm:$0xff]  ;;  %vm5517_vm1 = vnez %v5516_v24  ;;  %v5521_v48 = vld [vmem:[#allocation152_spill] sm:$0xff] }
  0xf7   :  { %5455 = vst [vmem:[#allocation200_spill] sm:$0xff] %v3132_v51  ;;  %v3260_v33 = vadd.f32 %v5505_v58, %v5501_v41  ;;  %v3270_v56 = vadd.f32 %v5513_v35, %v5508_v15  ;;  %v5518_v60 = vsel %vm5517_vm1, %v2841_v28, %v2865_v2  ;;  %v5520_v41 = vld [vmem:[#allocation58_spill] sm:$0xff]  ;;  %vm5522_vm2 = vnez %v5521_v48  ;;  %v5523_v50 = vld [vmem:[#allocation151_spill] sm:$0xff]  ;;  %v5529_v61 = vld [vmem:[#allocation153_spill] sm:$0xff] }
  0xf8   :  { %5456 = vst [vmem:[#allocation201_spill] sm:$0xff] %v3135_v59  ;;  %v3278_v29 = vadd.f32 %v5518_v60, %v5515_v5  ;;  %v5524_v20 = vld [vmem:[#allocation158_spill] sm:$0xff]  ;;  %v5528_v15 = vld [vmem:[#allocation59_spill] sm:$0xff]  ;;  %vm5530_vm3 = vnez %v5529_v61  ;;  %v5532_v35 = vld [vmem:[#allocation161_spill] sm:$0xff]  ;;  %vm5553_vm7 = vnez %v5396_v39 }
  0xf9   :  { %5457 = vst [vmem:[#allocation202_spill] sm:$0xff] %v3138_v45  ;;  %v5525_v18 = vsel %vm5522_vm2, %v5523_v50, %v5524_v20  ;;  %v5531_v54 = vld [vmem:[#allocation155_spill] sm:$0xff]  ;;  %v5535_v28 = vld [vmem:[#allocation104_spill] sm:$0xff]  ;;  %v5536_v2 = vld [vmem:[#allocation157_spill] sm:$0xff] }
  0xfa   :  { %5460 = vst [vmem:[#allocation203_spill] sm:$0xff] %v5459_v23  ;;  %v3286_v58 = vadd.f32 %v5525_v18, %v5520_v41  ;;  %v5533_v24 = vsel %vm5530_vm3, %v5531_v54, %v5532_v35  ;;  %vm5537_vm4 = vnez %v5536_v2  ;;  %v5538_v5 = vld [vmem:[#allocation159_spill] sm:$0xff]  ;;  %v5539_v60 = vld [vmem:[#allocation162_spill] sm:$0xff]  ;;  %v5542_v41 = vld [vmem:[#allocation105_spill] sm:$0xff] }
  0xfb   :  { %5461 = vst [vmem:[#allocation204_spill] sm:$0xff] %v3149_v3  ;;  %v3296_v19 = vadd.f32 %v5533_v24, %v5528_v15  ;;  %v5540_v48 = vsel %vm5537_vm4, %v5538_v5, %v5539_v60  ;;  %v5543_v50 = vld [vmem:[#allocation164_spill] sm:$0xff]  ;;  %v5547_v61 = vld [vmem:[#allocation63_spill] sm:$0xff]  ;;  %v5552_v24 = vld [vmem:[#allocation65_spill] sm:$0xff] }
  0xfc   :  { %5462 = vst [vmem:[#allocation205_spill] sm:$0xff] %v3152_v16  ;;  %v3304_v43 = vadd.f32 %v5540_v48, %v5535_v28  ;;  %vm5544_vm5 = vnez %v5543_v50  ;;  %v5549_v15 = vld [vmem:[#allocation167_spill] sm:$0xff]  ;;  %v5554_v28 = vld [vmem:[#allocation165_spill] sm:$0xff]  ;;  %v5555_v2 = vld [vmem:[#allocation170_spill] sm:$0xff] }
  0xfd   :  { %5463 = vst [vmem:[#allocation206_spill] sm:$0xff] %v3161_v32  ;;  %v5545_v20 = vsel %vm5544_vm5, %v2922_v0, %v2919_v4  ;;  %v5550_v54 = vsel %vm5548_vm6, %v2933_v40, %v5549_v15  ;;  %v5556_v5 = vsel %vm5553_vm7, %v5554_v28, %v5555_v2  ;;  %v5558_v48 = vld [vmem:[#allocation66_spill] sm:$0xff]  ;;  %v5559_v0 = vld [vmem:[#allocation168_spill] sm:$0xff]  ;;  %v5561_v4 = vld [vmem:[#allocation173_spill] sm:$0xff] }
  0xfe   :  { %5465 = vst [vmem:[#allocation207_spill] sm:$0xff] %v3169_v36  ;;  %v3312_v18 = vadd.f32 %v5545_v20, %v5542_v41  ;;  %v3320_v35 = vadd.f32 %v5550_v54, %v5547_v61  ;;  %v3328_v60 = vadd.f32 %v5556_v5, %v5552_v24  ;;  %vm5560_vm8 = vnez %v5559_v0  ;;  %v5562_v41 = vld [vmem:[#allocation172_spill] sm:$0xff]  ;;  %v5565_v20 = vld [vmem:[#allocation67_spill] sm:$0xff]  ;;  %v5566_v40 = vld [vmem:[#allocation174_spill] sm:$0xff] }
  0xff   :  { %5467 = vst [vmem:[#allocation208_spill] sm:$0xff] %v3177_v38  ;;  %v5563_v50 = vsel %vm5560_vm8, %v5561_v4, %v5562_v41  ;;  %vm5567_vm9 = vnez %v5566_v40  ;;  %v5568_v61 = vld [vmem:[#allocation175_spill] sm:$0xff]  ;;  %v5569_v15 = vld [vmem:[#allocation176_spill] sm:$0xff]  ;;  %v5575_v24 = vld [vmem:[#allocation178_spill] sm:$0xff] }
 0x100   :  { %5469 = vst [vmem:[#allocation209_spill] sm:$0xff] %v3189_v62  ;;  %v3336_v10 = vadd.f32 %v5563_v50, %v5558_v48  ;;  %v5570_v54 = vsel %vm5567_vm9, %v5568_v61, %v5569_v15  ;;  %v5573_v28 = vld [vmem:[#allocation179_spill] sm:$0xff]  ;;  %v5576_v2 = vld [vmem:[#allocation185_spill] sm:$0xff]  ;;  %v5580_v4 = vld [vmem:[#allocation180_spill] sm:$0xff] }
 0x101   :  { %5471 = vst [vmem:[#allocation210_spill] sm:$0xff] %v3197_v21  ;;  %v3344_v39 = vadd.f32 %v5570_v54, %v5565_v20  ;;  %vm5574_vm10 = vnez %v5573_v28  ;;  %vm5581_vm13 = vnez %v5580_v4  ;;  %v5582_v48 = vld [vmem:[#allocation183_spill] sm:$0xff]  ;;  %v5587_v61 = vld [vmem:[#allocation184_spill] sm:$0xff]  ;;  %v5589_v20 = vld [vmem:[#allocation189_spill] sm:$0xff] }
 0x102   :  { %5473 = vst [vmem:[#allocation211_spill] sm:$0xff] %v3205_v6  ;;  %v5577_v5 = vsel %vm5574_vm10, %v5575_v24, %v5576_v2  ;;  %v5583_v41 = vld [vmem:[#allocation187_spill] sm:$0xff]  ;;  %vm5588_vm0 = vnez %v5587_v61  ;;  %v5590_v15 = vld [vmem:[#allocation190_spill] sm:$0xff]  ;;  %v3371_v24 = vadd.f32 %v727_v12, %v5593_v47  ;;  %v3382_v4 = vld [vmem:[#allocation2 + $0x10] sm:$0xff] }
 0x103   :  { %5474 = vst [vmem:[#allocation212_spill] sm:$0xff] %v3208_v37  ;;  %v3352_v0 = vadd.f32 %v5577_v5, %v5572_v55  ;;  %v5584_v50 = vsel %vm5581_vm13, %v5582_v48, %v5583_v41  ;;  %v5591_v54 = vsel %vm5588_vm0, %v5589_v20, %v5590_v15  ;;  %v5595_v55 = vld [vmem:[#allocation73_spill] sm:$0xff]  ;;  %v3376_v5 = vld [vmem:[#allocation2] sm:$0xff]  ;;  %vm4903_vm3 = vcmp.ge.f32.partialorder %v3382_v4, 0.0  ;;  %v3394_v47 = vld [vmem:[#allocation2 + $0x30] sm:$0xff] }
 0x104   :  { %5477 = vst [vmem:[#allocation127_spill] sm:$0xff] %v3216_v25  ;;  %v3360_v40 = vadd.f32 %v5584_v50, %v5579_v26  ;;  %v3368_v28 = vadd.f32 %v5591_v54, %v5586_v42  ;;  %v3374_v2 = vadd.f32 %v736_v17, %v5595_v55  ;;  %vm855_vm1 = vcmp.ge.f32.partialorder %v3376_v5, 0.0  ;;  %v3379_v26 = vld [vmem:[#allocation2 + $0x8] sm:$0xff]  ;;  %v3385_v42 = vld [vmem:[#allocation2 + $0x18] sm:$0xff]  ;;  %v3388_v12 = vld [vmem:[#allocation2 + $0x20] sm:$0xff] }
 0x105   :  { %5483 = vst [vmem:[#allocation98_spill] sm:$0xff] %v3224_v7  ;;  %vm4945_vm2 = vcmp.ge.f32.partialorder %v3379_v26, 0.0  ;;  %vm4904_vm4 = vcmp.ge.f32.partialorder %v3385_v42, 0.0  ;;  %vm4905_vm5 = vcmp.ge.f32.partialorder %v3388_v12, 0.0  ;;  %v3391_v17 = vld [vmem:[#allocation2 + $0x28] sm:$0xff]  ;;  %vm4907_vm7 = vcmp.ge.f32.partialorder %v3394_v47, 0.0 }
 0x106   :  { %5489 = vst [vmem:[#allocation124_spill] sm:$0xff] %v3232_v52  ;;  %vm4906_vm6 = vcmp.ge.f32.partialorder %v3391_v17, 0.0  ;;  %v3397_v48 = vld [vmem:[#allocation2 + $0x38] sm:$0xff]  ;;  %v3400_v41 = vld [vmem:[#allocation2 + $0x40] sm:$0xff]  ;;  %v3403_v50 = vld [vmem:[#allocation2 + $0x48] sm:$0xff]  ;;  %vm5740_vm12 = vcmp.ge.f32.partialorder %v3394_v47, 0.0 }
 0x107   :  { %5494 = vst [vmem:[#allocation128_spill] sm:$0xff] %v3244_v30  ;;  %v3406_v61 = vld [vmem:[#allocation2 + $0x50] sm:$0xff]  ;;  %v3409_v20 = vld [vmem:[#allocation2 + $0x58] sm:$0xff]  ;;  %v3412_v15 = vld [vmem:[#allocation2 + $0x60] sm:$0xff]  ;;  %vm5742_vm15 = vcmp.ge.f32.partialorder %v3397_v48, 0.0  ;;  %v5754_v47 = vmov 0 }
 0x108   :  { %5500 = vst [vmem:[#allocation129_spill] sm:$0xff] %v3252_v31  ;;  %v3415_v54 = vld [vmem:[#allocation2 + $0x68] sm:$0xff]  ;;  %v3418_v55 = vld [vmem:[#allocation2 + $0x70] sm:$0xff]  ;;  %v3421_v37 = vld [vmem:[#allocation2 + $0x78] sm:$0xff] }
 0x109   :  { %5506 = vst [vmem:[#allocation99_spill] sm:$0xff] %v3260_v33  ;;  %v3424_v3 = vld [vmem:[#allocation2 + $0x80] sm:$0xff]  ;;  %v3427_v16 = vld [vmem:[#allocation2 + $0x88] sm:$0xff]  ;;  %v3430_v23 = vld [vmem:[#allocation2 + $0x90] sm:$0xff] }
 0x10a   :  { %5507 = vst [vmem:[#allocation133_spill] sm:$0xff] %v3262_v9  ;;  %v3433_v32 = vld [vmem:[#allocation2 + $0x98] sm:$0xff]  ;;  %v3436_v9 = vld [vmem:[#allocation2 + $0xa0] sm:$0xff]  ;;  %v3439_v51 = vld [vmem:[#allocation2 + $0xa8] sm:$0xff] }
 0x10b   :  { %5514 = vst [vmem:[#allocation131_spill] sm:$0xff] %v3270_v56  ;;  %v3442_v59 = vld [vmem:[#allocation2 + $0xb0] sm:$0xff]  ;;  %v3445_v22 = vld [vmem:[#allocation2 + $0xb8] sm:$0xff]  ;;  %v3460_v46 = vld [vmem:[#allocation2 + $0xe0] sm:$0xff] }
 0x10c   :  { %5519 = vst [vmem:[#allocation130_spill] sm:$0xff] %v3278_v29  ;;  %v3454_v49 = vld [vmem:[#allocation2 + $0xd0] sm:$0xff]  ;;  %v3457_v34 = vld [vmem:[#allocation2 + $0xd8] sm:$0xff]  ;;  %vm4964_vm9 = vcmp.ge.f32.partialorder %v3460_v46, 0.0  ;;  %v5616_v29 = vld [vmem:[#allocation87_spill] sm:$0xff] }
 0x10d   :  { %5526 = vst [vmem:[#allocation100_spill] sm:$0xff] %v3286_v58  ;;  %vm4965_vm8 = vcmp.ge.f32.partialorder %v3457_v34, 0.0  ;;  %v3466_v11 = vld [vmem:[#allocation2 + $0xf0] sm:$0xff]  ;;  %v3469_v57 = vld [vmem:[#allocation2 + $0xf8] sm:$0xff]  ;;  %v3505_v56 = vsel %vm4907_vm7, 1.0, %v5616_v29  ;;  %v5621_v30 = vld [vmem:[#allocation55_spill] sm:$0xff] }
 0x10e   :  { %5527 = vst [vmem:[#allocation134_spill] sm:$0xff] %v3288_v63  ;;  %v3448_v63 = vld [vmem:[#allocation2 + $0xc0] sm:$0xff]  ;;  %vm4961_vm13 = vcmp.ge.f32.partialorder %v3466_v11, 0.0  ;;  %vm4963_vm0 = vcmp.ge.f32.partialorder %v3469_v57, 0.0  ;;  %v5618_v33 = vld [vmem:[#allocation88_spill] sm:$0xff]  ;;  %v5624_v7 = vld [vmem:[#allocation61_spill] sm:$0xff] }
 0x10f   :  { %5534 = vst [vmem:[#allocation138_spill] sm:$0xff] %v3296_v19  ;;  %v5614_v19 = vld [vmem:[#allocation86_spill] sm:$0xff]  ;;  %v5630_v62 = vld [vmem:[#allocation68_spill] sm:$0xff]  ;;  %vm5631_vm7 = vcmp.ge.f32.partialorder %v3409_v20, 0.0  ;;  %v5633_v36 = vld [vmem:[#allocation69_spill] sm:$0xff] }
 0x110   :  { %5541 = vst [vmem:[#allocation101_spill] sm:$0xff] %v3304_v43  ;;  %v3500_v58 = vsel %vm4906_vm6, 1.0, %v5614_v19  ;;  %v5627_v6 = vld [vmem:[#allocation62_spill] sm:$0xff]  ;;  %vm5628_vm6 = vcmp.ge.f32.partialorder %v3406_v61, 0.0  ;;  %v3530_v38 = vsel %vm5631_vm7, 1.0, %v5630_v62  ;;  %vm5646_vm7 = vcmp.ge.f32.partialorder %v3424_v3, 0.0 }
 0x111   :  { %5546 = vst [vmem:[#allocation135_spill] sm:$0xff] %v3312_v18  ;;  %v5612_v18 = vld [vmem:[#allocation85_spill] sm:$0xff]  ;;  %v3525_v21 = vsel %vm5628_vm6, 1.0, %v5627_v6  ;;  %vm5643_vm6 = vcmp.ge.f32.partialorder %v3421_v37, 0.0 }
 0x112   :  { %5551 = vst [vmem:[#allocation136_spill] sm:$0xff] %v3320_v35  ;;  %v3495_v43 = vsel %vm4905_vm5, 1.0, %v5612_v18  ;;  %vm5625_vm5 = vcmp.ge.f32.partialorder %v3403_v50, 0.0 }
 0x113   :  { %5557 = vst [vmem:[#allocation143_spill] sm:$0xff] %v3328_v60  ;;  %v5610_v60 = vld [vmem:[#allocation84_spill] sm:$0xff]  ;;  %v3520_v25 = vsel %vm5625_vm5, 1.0, %v5624_v7  ;;  %vm5640_vm5 = vcmp.ge.f32.partialorder %v3418_v55, 0.0 }
 0x114   :  { %5564 = vst [vmem:[#allocation102_spill] sm:$0xff] %v3336_v10  ;;  %v3490_v35 = vsel %vm4904_vm4, 1.0, %v5610_v60  ;;  %vm5622_vm4 = vcmp.ge.f32.partialorder %v3400_v41, 0.0 }
 0x115   :  { %5571 = vst [vmem:[#allocation140_spill] sm:$0xff] %v3344_v39  ;;  %v5608_v39 = vld [vmem:[#allocation83_spill] sm:$0xff]  ;;  %v3515_v52 = vsel %vm5622_vm4, 1.0, %v5621_v30  ;;  %vm5637_vm4 = vcmp.ge.f32.partialorder %v3415_v54, 0.0 }
 0x116   :  { %5578 = vst [vmem:[#allocation139_spill] sm:$0xff] %v3352_v0  ;;  %v3485_v10 = vsel %vm4903_vm3, 1.0, %v5608_v39  ;;  %vm5619_vm3 = vcmp.ge.f32.partialorder %v3397_v48, 0.0 }
 0x117   :  { %5585 = vst [vmem:[#allocation145_spill] sm:$0xff] %v3360_v40  ;;  %v5606_v40 = vld [vmem:[#allocation82_spill] sm:$0xff]  ;;  %v3510_v31 = vsel %vm5619_vm3, 1.0, %v5618_v33  ;;  %vm5634_vm3 = vcmp.ge.f32.partialorder %v3412_v15, 0.0 }
 0x118   :  { %5592 = vst [vmem:[#allocation103_spill] sm:$0xff] %v3368_v28  ;;  %v3475_v28 = vsel %vm855_vm1, 1.0, %v5604_v13  ;;  %v3480_v0 = vsel %vm4945_vm2, 1.0, %v5606_v40  ;;  %v3535_v45 = vsel %vm5634_vm3, 1.0, %v5633_v36  ;;  %vm5649_vm3 = vcmp.ge.f32.partialorder %v3427_v16, 0.0 }
 0x119   :  { %5594 = vst [vmem:[#allocation141_spill] sm:$0xff] %v3371_v24  ;;  %v3463_v24 = vld [vmem:[#allocation2 + $0xe8] sm:$0xff] }
 0x11a   :  { %5596 = vst [vmem:[#allocation147_spill] sm:$0xff] %v3374_v2  ;;  %v3451_v2 = vld [vmem:[#allocation2 + $0xc8] sm:$0xff]  ;;  %vm4957_vm10 = vcmp.ge.f32.partialorder %v3463_v24, 0.0 }
 0x11b   :  { %5597 = vst [vmem:[#allocation148_spill] sm:$0xff] %v3430_v23 }
 0x11c   :  { %5598 = vst [vmem:[#allocation57_spill] sm:$0xff] %v3433_v32 }
 0x11d   :  { %5599 = vst [vmem:[#allocation149_spill] sm:$0xff] %v3436_v9 }
 0x11e   :  { %5600 = vst [vmem:[#allocation58_spill] sm:$0xff] %v3442_v59 }
 0x11f   :  { %5601 = vst [vmem:[#allocation152_spill] sm:$0xff] %v3445_v22 }
 0x120   :  { %5602 = vst [vmem:[#allocation151_spill] sm:$0xff] %v3448_v63 }
 0x121   :  { %5603 = vst [vmem:[#allocation158_spill] sm:$0xff] %v3454_v49 }
 0x122   :  { %5605 = vst [vmem:[#allocation59_spill] sm:$0xff] %v3475_v28 }
 0x123   :  { %5607 = vst [vmem:[#allocation153_spill] sm:$0xff] %v3480_v0 }
 0x124   :  { %5609 = vst [vmem:[#allocation155_spill] sm:$0xff] %v3485_v10 }
 0x125   :  { %5611 = vst [vmem:[#allocation161_spill] sm:$0xff] %v3490_v35 }
 0x126   :  { %5613 = vst [vmem:[#allocation104_spill] sm:$0xff] %v3495_v43 }
 0x127   :  { %5615 = vst [vmem:[#allocation157_spill] sm:$0xff] %v3500_v58 }
 0x128   :  { %5617 = vst [vmem:[#allocation159_spill] sm:$0xff] %v3505_v56 }
 0x129   :  { %5620 = vst [vmem:[#allocation162_spill] sm:$0xff] %v3510_v31 }
 0x12a   :  { %5623 = vst [vmem:[#allocation105_spill] sm:$0xff] %v3515_v52  ;;  %v3540_v52 = vsel %vm5637_vm4, 1.0, %v5636_v44  ;;  %vm5652_vm4 = vcmp.ge.f32.partialorder %v3430_v23, 0.0 }
 0x12b   :  { %5626 = vst [vmem:[#allocation164_spill] sm:$0xff] %v3520_v25  ;;  %v5639_v25 = vld [vmem:[#allocation76_spill] sm:$0xff] }
 0x12c   :  { %5629 = vst [vmem:[#allocation63_spill] sm:$0xff] %v3525_v21  ;;  %v3545_v31 = vsel %vm5640_vm5, 1.0, %v5639_v25  ;;  %v5642_v21 = vld [vmem:[#allocation77_spill] sm:$0xff]  ;;  %vm5655_vm5 = vcmp.ge.f32.partialorder %v3433_v32, 0.0 }
 0x12d   :  { %5632 = vst [vmem:[#allocation167_spill] sm:$0xff] %v3530_v38  ;;  %v3550_v56 = vsel %vm5643_vm6, 1.0, %v5642_v21  ;;  %v5645_v38 = vld [vmem:[#allocation79_spill] sm:$0xff]  ;;  %vm5658_vm6 = vcmp.ge.f32.partialorder %v3436_v9, 0.0  ;;  %v5671_v9 = vmov 0 }
 0x12e   :  { %5635 = vst [vmem:[#allocation65_spill] sm:$0xff] %v3535_v45  ;;  %v3555_v58 = vsel %vm5646_vm7, 1.0, %v5645_v38  ;;  %v5648_v45 = vld [vmem:[#allocation80_spill] sm:$0xff]  ;;  %vm5661_vm7 = vcmp.ge.f32.partialorder %v3439_v51, 0.0 }
 0x12f   :  { %5638 = vst [vmem:[#allocation165_spill] sm:$0xff] %v3540_v52  ;;  %v3560_v43 = vsel %vm5649_vm3, 1.0, %v5648_v45  ;;  %v5651_v52 = vld [vmem:[#allocation89_spill] sm:$0xff]  ;;  %vm5664_vm3 = vcmp.ge.f32.partialorder %v3442_v59, 0.0  ;;  %v5678_v59 = vld [vmem:[#allocation95_spill] sm:$0xff] }
 0x130   :  { %5641 = vst [vmem:[#allocation170_spill] sm:$0xff] %v3545_v31  ;;  %v3565_v35 = vsel %vm5652_vm4, 1.0, %v5651_v52  ;;  %v5654_v31 = vld [vmem:[#allocation90_spill] sm:$0xff]  ;;  %vm5667_vm4 = vcmp.ge.f32.partialorder %v3445_v22, 0.0  ;;  %v5681_v22 = vld [vmem:[#allocation96_spill] sm:$0xff] }
 0x131   :  { %5644 = vst [vmem:[#allocation66_spill] sm:$0xff] %v3550_v56  ;;  %v3570_v10 = vsel %vm5655_vm5, 1.0, %v5654_v31  ;;  %v5657_v56 = vld [vmem:[#allocation91_spill] sm:$0xff] }
 0x132   :  { %5647 = vst [vmem:[#allocation168_spill] sm:$0xff] %v3555_v58  ;;  %v3575_v0 = vsel %vm5658_vm6, 1.0, %v5657_v56  ;;  %v5660_v58 = vld [vmem:[#allocation92_spill] sm:$0xff] }
 0x133   :  { %5650 = vst [vmem:[#allocation173_spill] sm:$0xff] %v3560_v43  ;;  %v3580_v28 = vsel %vm5661_vm7, 1.0, %v5660_v58  ;;  %v5663_v43 = vld [vmem:[#allocation93_spill] sm:$0xff]  ;;  %vm5679_vm7 = vcmp.ge.f32.partialorder %v3448_v63, 0.0  ;;  %v5690_v63 = vmov 0 }
 0x134   :  { %5653 = vst [vmem:[#allocation172_spill] sm:$0xff] %v3565_v35  ;;  %v3585_v23 = vsel %vm5664_vm3, 1.0, %v5663_v43  ;;  %v5666_v35 = vld [vmem:[#allocation94_spill] sm:$0xff]  ;;  %vm5682_vm3 = vcmp.ge.f32.partialorder %v3451_v2, 0.0 }
 0x135   :  { %5656 = vst [vmem:[#allocation67_spill] sm:$0xff] %v3570_v10  ;;  %v3590_v32 = vsel %vm5667_vm4, 1.0, %v5666_v35  ;;  %v5669_v10 = vld [vmem:[#allocation33_spill] sm:$0xff]  ;;  %vm5685_vm4 = vcmp.ge.f32.partialorder %v3454_v49, 0.0  ;;  %v5697_v49 = vld [vmem:[#allocation39_spill] sm:$0xff] }
 0x136   :  { %5659 = vst [vmem:[#allocation174_spill] sm:$0xff] %v3575_v0  ;;  %v5670_v31 = vunpack.c.l.bf16 %v5669_v10  ;;  %v5674_v0 = vunpack.c.h.bf16 %v5669_v10  ;;  %v3622_v10 = vsel %vm4965_vm8, 1.0, %v2484_v53  ;;  %vm5721_vm8 = vcmp.ge.f32.partialorder %v3385_v42, 0.0 }
 0x137   :  { %5662 = vst [vmem:[#allocation175_spill] sm:$0xff] %v3580_v28  ;;  %v5675_v28 = vmov 0 }
 0x138   :  { %5665 = vst [vmem:[#allocation176_spill] sm:$0xff] %v3585_v23  ;;  %vm3594_vm5 = vcmp.ge.f32.partialorder %v5670_v31, 0.5  ;;  %vm3600_vm6 = vcmp.ge.f32.partialorder %v5674_v0, 0.5  ;;  %v3607_v23 = vsel %vm5679_vm7, 1.0, %v5678_v59  ;;  %v5684_v31 = vld [vmem:[#allocation97_spill] sm:$0xff]  ;;  %v5688_v0 = vld [vmem:[#allocation38_spill] sm:$0xff] }
 0x139   :  { %5668 = vst [vmem:[#allocation107_spill] sm:$0xff] %v3590_v32  ;;  %v5672_v9 = vsel %vm3594_vm5, 4294967295, %v5671_v9  ;;  %v5676_v28 = vsel %vm3600_vm6, 4294967295, %v5675_v28  ;;  %v3612_v32 = vsel %vm5682_vm3, 1.0, %v5681_v22 }
 0x13a   :  { %5673 = vst [vmem:[#allocation179_spill] sm:$0xff] %v5672_v9  ;;  %v3617_v9 = vsel %vm5685_vm4, 1.0, %v5684_v31  ;;  %v5698_v31 = vunpack.c.l.bf16 %v5697_v49 }
 0x13b   :  { %5677 = vst [vmem:[#allocation178_spill] sm:$0xff] %v5676_v28  ;;  %v5689_v28 = vunpack.c.l.bf16 %v5688_v0 }
 0x13c   :  { %5680 = vst [vmem:[#allocation185_spill] sm:$0xff] %v3607_v23  ;;  %v5693_v23 = vunpack.c.h.bf16 %v5688_v0  ;;  %vm3638_vm3 = vcmp.ge.f32.partialorder %v5698_v31, 0.5  ;;  %v3660_v31 = vsel %vm4963_vm0, 1.0, %v2549_v14  ;;  %v5706_v0 = vunpack.c.h.bf16 %v5697_v49 }
 0x13d   :  { %5683 = vst [vmem:[#allocation110_spill] sm:$0xff] %v3612_v32  ;;  %vm3626_vm2 = vcmp.ge.f32.partialorder %v5689_v28, 0.5  ;;  %v5694_v32 = vmov 0  ;;  %v3650_v28 = vsel %vm4957_vm10, 1.0, %v2520_v8  ;;  %v3683_v49 = vsel %vm855_vm1, %v5604_v13, 1.0 }
 0x13e   :  { %5686 = vst [vmem:[#allocation180_spill] sm:$0xff] %v3617_v9  ;;  %v5691_v63 = vsel %vm3626_vm2, 4294967295, %v5690_v63  ;;  %vm3632_vm7 = vcmp.ge.f32.partialorder %v5693_v23, 0.5  ;;  %v5699_v9 = vmov 0  ;;  %v3655_v23 = vsel %vm4961_vm13, 1.0, %v2535_v27 }
 0x13f   :  { %5687 = vst [vmem:[#allocation183_spill] sm:$0xff] %v3622_v10  ;;  %v5695_v32 = vsel %vm3632_vm7, 4294967295, %v5694_v32  ;;  %v5700_v9 = vsel %vm3638_vm3, 4294967295, %v5699_v9  ;;  %v3645_v10 = vsel %vm4964_vm9, 1.0, %v2502_v1  ;;  %vm3664_vm4 = vcmp.ge.f32.partialorder %v5706_v0, 0.5 }
 0x140   :  { %5692 = vst [vmem:[#allocation187_spill] sm:$0xff] %v5691_v63  ;;  %vm5718_vm0 = vcmp.ge.f32.partialorder %v3379_v26, 0.0  ;;  %vm5720_vm9 = vcmp.ge.f32.partialorder %v3382_v4, 0.0  ;;  %v5725_v13 = vmov 0  ;;  %v5732_v26 = vld [vmem:[#allocation49_spill] sm:$0xff]  ;;  %v5734_v4 = vmov 0 }
 0x141   :  { %5696 = vst [vmem:[#allocation70_spill] sm:$0xff] %v5695_v32  ;;  %v3688_v0 = vsel %vm5718_vm0, %v5606_v40, 1.0  ;;  %v5729_v40 = vmov 0  ;;  %vm5739_vm0 = vcmp.ge.f32.partialorder %v3391_v17, 0.0 }
 0x142   :  { %5701 = vst [vmem:[#allocation184_spill] sm:$0xff] %v5700_v9  ;;  %v3726_v42 = vsel %vm5739_vm0, %v5614_v19, 1.0  ;;  %v5750_v19 = vmov 0  ;;  %vm5758_vm0 = vcmp.ge.f32.partialorder %v3403_v50, 0.0  ;;  %v5771_v50 = vld [vmem:[#allocation52_spill] sm:$0xff] }
 0x143   :  { %5702 = vst [vmem:[#allocation189_spill] sm:$0xff] %v3645_v10  ;;  %v5709_v10 = vld [vmem:[#allocation44_spill] sm:$0xff]  ;;  %v3764_v48 = vsel %vm5758_vm0, %v5624_v7, 1.0  ;;  %v5768_v7 = vmov 0  ;;  %vm5778_vm0 = vcmp.ge.f32.partialorder %v3415_v54, 0.0 }
 0x144   :  { %5703 = vst [vmem:[#allocation190_spill] sm:$0xff] %v3650_v28  ;;  %v5710_v32 = vunpack.c.l.bf16 %v5709_v10  ;;  %v5713_v63 = vunpack.c.h.bf16 %v5709_v10  ;;  %v5723_v10 = vld [vmem:[#allocation45_spill] sm:$0xff] }
 0x145   :  { %5704 = vst [vmem:[#allocation72_spill] sm:$0xff] %v3655_v23  ;;  %v5714_v23 = vmov 0  ;;  %v5728_v5 = vunpack.c.h.bf16 %v5723_v10 }
 0x146   :  { %5705 = vst [vmem:[#allocation73_spill] sm:$0xff] %v3660_v31  ;;  %vm3670_vm10 = vcmp.ge.f32.partialorder %v5710_v32, 0.5  ;;  %vm3676_vm13 = vcmp.ge.f32.partialorder %v5713_v63, 0.5  ;;  %v3693_v32 = vsel %vm5720_vm9, %v5608_v39, 1.0  ;;  %v3698_v63 = vsel %vm5721_vm8, %v5610_v60, 1.0 }
 0x147   :  { %v5715_v23 = vsel %vm3676_vm13, 4294967295, %v5714_v23  ;;  %5717 = vst [vmem:[#allocation82_spill] sm:$0xff] %v3683_v49  ;;  %v5724_v31 = vunpack.c.l.bf16 %v5723_v10  ;;  %vm3708_vm1 = vcmp.ge.f32.partialorder %v5728_v5, 0.5  ;;  %v5733_v39 = vunpack.c.l.bf16 %v5732_v26  ;;  %v5900_v49 = vld [vmem:[#allocation161_spill] sm:$0xff] }
 0x148   :  { %5716 = vst [vmem:[#allocation81_spill] sm:$0xff] %v5715_v23  ;;  %v5730_v40 = vsel %vm3708_vm1, 4294967295, %v5729_v40  ;;  %vm5737_vm8 = vcmp.ge.f32.partialorder %v3388_v12, 0.0  ;;  %v3736_v10 = vsel %vm5742_vm15, %v5618_v33, 1.0  ;;  %v5744_v5 = vunpack.c.h.bf16 %v5732_v26  ;;  %v5748_v12 = vld [vmem:[#allocation50_spill] sm:$0xff]  ;;  %v5917_v23 = vld [vmem:[#allocation167_spill] sm:$0xff] }
 0x149   :  { %5719 = vst [vmem:[#allocation83_spill] sm:$0xff] %v3688_v0  ;;  %vm3702_vm11 = vcmp.ge.f32.partialorder %v5724_v31, 0.5  ;;  %vm3714_vm9 = vcmp.ge.f32.partialorder %v5733_v39, 0.5  ;;  %v3721_v60 = vsel %vm5737_vm8, %v5612_v18, 1.0  ;;  %v3731_v31 = vsel %vm5740_vm12, %v5616_v29, 1.0 }
 0x14a   :  { %5722 = vst [vmem:[#allocation84_spill] sm:$0xff] %v3698_v63  ;;  %v5726_v13 = vsel %vm3702_vm11, 4294967295, %v5725_v13  ;;  %v5735_v4 = vsel %vm3714_vm9, 4294967295, %v5734_v4  ;;  %vm3740_vm14 = vcmp.ge.f32.partialorder %v5744_v5, 0.5  ;;  %v5745_v18 = vmov 0  ;;  %v5762_v5 = vld [vmem:[#allocation51_spill] sm:$0xff] }
 0x14b   :  { %5727 = vst [vmem:[#allocation85_spill] sm:$0xff] %v5726_v13  ;;  %v5746_v18 = vsel %vm3740_vm14, 4294967295, %v5745_v18  ;;  %v5749_v17 = vunpack.c.l.bf16 %v5748_v12  ;;  %v5753_v29 = vunpack.c.h.bf16 %v5748_v12  ;;  %vm5757_vm15 = vcmp.ge.f32.partialorder %v3400_v41, 0.0  ;;  %v5977_v13 = vld [vmem:[#allocation163_spill] sm:$0xff] }
 0x14c   :  { %5731 = vst [vmem:[#allocation86_spill] sm:$0xff] %v5730_v40  ;;  %v3759_v33 = vsel %vm5757_vm15, %v5621_v30, 1.0  ;;  %vm5759_vm14 = vcmp.ge.f32.partialorder %v3406_v61, 0.0  ;;  %v5763_v12 = vunpack.c.l.bf16 %v5762_v5  ;;  %v5764_v30 = vmov 0 }
 0x14d   :  { %5736 = vst [vmem:[#allocation87_spill] sm:$0xff] %v5735_v4  ;;  %vm3746_vm8 = vcmp.ge.f32.partialorder %v5749_v17, 0.5  ;;  %vm3752_vm12 = vcmp.ge.f32.partialorder %v5753_v29, 0.5  ;;  %v3769_v26 = vsel %vm5759_vm14, %v5627_v6, 1.0  ;;  %v5767_v41 = vunpack.c.h.bf16 %v5762_v5  ;;  %v5930_v4 = vld [vmem:[#allocation126_spill] sm:$0xff] }
 0x14e   :  { %5738 = vst [vmem:[#allocation88_spill] sm:$0xff] %v3721_v60  ;;  %v5751_v19 = vsel %vm3746_vm8, 4294967295, %v5750_v19  ;;  %v5755_v47 = vsel %vm3752_vm12, 4294967295, %v5754_v47  ;;  %vm5761_vm8 = vcmp.ge.f32.partialorder %v3409_v20, 0.0  ;;  %vm3778_vm12 = vcmp.ge.f32.partialorder %v5763_v12, 0.5  ;;  %v5800_v12 = vld [vmem:[#allocation108_spill] sm:$0xff] }
 0x14f   :  { %5741 = vst [vmem:[#allocation55_spill] sm:$0xff] %v3731_v31  ;;  %v3774_v39 = vsel %vm5761_vm8, %v5630_v62, 1.0  ;;  %v5765_v30 = vsel %vm3778_vm12, 4294967295, %v5764_v30  ;;  %vm3784_vm15 = vcmp.ge.f32.partialorder %v5767_v41, 0.5  ;;  %v5772_v6 = vunpack.c.l.bf16 %v5771_v50  ;;  %v5914_v31 = vld [vmem:[#allocation164_spill] sm:$0xff] }
 0x150   :  { %5743 = vst [vmem:[#allocation61_spill] sm:$0xff] %v3736_v10  ;;  %v5769_v7 = vsel %vm3784_vm15, 4294967295, %v5768_v7  ;;  %v5773_v61 = vmov 0  ;;  %vm5776_vm8 = vcmp.ge.f32.partialorder %v3412_v15, 0.0  ;;  %v3802_v20 = vsel %vm5778_vm0, %v5636_v44, 1.0  ;;  %v5788_v15 = vld [vmem:[#allocation53_spill] sm:$0xff] }
 0x151   :  { %5747 = vst [vmem:[#allocation62_spill] sm:$0xff] %v5746_v18  ;;  %vm3790_vm14 = vcmp.ge.f32.partialorder %v5772_v6, 0.5  ;;  %v3797_v62 = vsel %vm5776_vm8, %v5633_v36, 1.0  ;;  %vm5780_vm12 = vcmp.ge.f32.partialorder %v3418_v55, 0.0  ;;  %vm5782_vm15 = vcmp.ge.f32.partialorder %v3421_v37, 0.0  ;;  %v5797_v37 = vld [vmem:[#allocation148_spill] sm:$0xff] }
 0x152   :  { %5752 = vst [vmem:[#allocation68_spill] sm:$0xff] %v5751_v19  ;;  %v5774_v61 = vsel %vm3790_vm14, 4294967295, %v5773_v61  ;;  %v3807_v17 = vsel %vm5780_vm12, %v5639_v25, 1.0  ;;  %v3812_v29 = vsel %vm5782_vm15, %v5642_v21, 1.0  ;;  %v5784_v5 = vunpack.c.h.bf16 %v5771_v50  ;;  %v5935_v19 = vld [vmem:[#allocation132_spill] sm:$0xff]  ;;  %v5979_v10 = vld [vmem:[#allocation169_spill] sm:$0xff] }
 0x153   :  { %5756 = vst [vmem:[#allocation69_spill] sm:$0xff] %v5755_v47  ;;  %v5785_v36 = vmov 0  ;;  %v5789_v54 = vunpack.c.l.bf16 %v5788_v15  ;;  %v5790_v44 = vmov 0  ;;  %vm5793_vm12 = vcmp.ge.f32.partialorder %v3424_v3, 0.0  ;;  %v5805_v3 = vld [vmem:[#allocation54_spill] sm:$0xff] }
 0x154   :  { %5760 = vst [vmem:[#allocation75_spill] sm:$0xff] %v3769_v26  ;;  %vm3816_vm14 = vcmp.ge.f32.partialorder %v5784_v5, 0.5  ;;  %v3829_v25 = vsel %vm5793_vm12, %v5645_v38, 1.0  ;;  %vm5795_vm15 = vcmp.ge.f32.partialorder %v3427_v16, 0.0  ;;  %vm5798_vm0 = vcmp.ge.f32.partialorder %v5797_v37, 0.0  ;;  %v5811_v16 = vld [vmem:[#allocation57_spill] sm:$0xff] }
 0x155   :  { %5766 = vst [vmem:[#allocation76_spill] sm:$0xff] %v5765_v30  ;;  %v5786_v36 = vsel %vm3816_vm14, 4294967295, %v5785_v36  ;;  %vm3822_vm8 = vcmp.ge.f32.partialorder %v5789_v54, 0.5  ;;  %v3834_v21 = vsel %vm5795_vm15, %v5648_v45, 1.0  ;;  %v3839_v55 = vsel %vm5798_vm0, %v5651_v52, 1.0  ;;  %v5810_v45 = vld [vmem:[#allocation90_spill] sm:$0xff] }
 0x156   :  { %5770 = vst [vmem:[#allocation77_spill] sm:$0xff] %v5769_v7  ;;  %v5791_v44 = vsel %vm3822_vm8, 4294967295, %v5790_v44  ;;  %1643 = vrcp.f32 %v5800_v12  ;;  %v5801_v41 = vunpack.c.h.bf16 %v5788_v15  ;;  %v5802_v50 = vmov 0  ;;  %v5814_v52 = vld [vmem:[#allocation149_spill] sm:$0xff]  ;;  %v5819_v37 = vld [vmem:[#allocation111_spill] sm:$0xff]  ;;  %v5966_v30 = vld [vmem:[#allocation146_spill] sm:$0xff] }
 0x157   :  { %5775 = vst [vmem:[#allocation79_spill] sm:$0xff] %v5774_v61  ;;  %v5806_v38 = vunpack.c.l.bf16 %v5805_v3  ;;  %v5807_v6 = vmov 0  ;;  %vm5812_vm15 = vcmp.ge.f32.partialorder %v5811_v16, 0.0  ;;  %vm5815_vm0 = vcmp.ge.f32.partialorder %v5814_v52, 0.0  ;;  %v5836_v52 = vld [vmem:[#allocation152_spill] sm:$0xff]  ;;  %v6008_v9 = vld [vmem:[#allocation55_spill] sm:$0xff] }
 0x158   :  { %5777 = vst [vmem:[#allocation80_spill] sm:$0xff] %v3797_v62  ;;  %vm3844_vm8 = vcmp.ge.f32.partialorder %v5801_v41, 0.5  ;;  %v3857_v5 = vsel %vm5812_vm15, %v5810_v45, 1.0  ;;  %v3862_v54 = vsel %vm5815_vm0, %v5657_v56, 1.0  ;;  %vm5817_vm14 = vcmp.ge.f32.partialorder %v3439_v51, 0.0  ;;  %v5824_v45 = vld [vmem:[#allocation56_spill] sm:$0xff] }
 0x159   :  { %5779 = vst [vmem:[#allocation89_spill] sm:$0xff] %v3802_v20  ;;  %v5803_v50 = vsel %vm3844_vm8, 4294967295, %v5802_v50  ;;  %vm3850_vm12 = vcmp.ge.f32.partialorder %v5806_v38, 0.5  ;;  %v3867_v15 = vsel %vm5817_vm14, %v5660_v58, 1.0  ;;  %1645 = vrcp.f32 %v5819_v37  ;;  %v5833_v58 = vld [vmem:[#allocation58_spill] sm:$0xff]  ;;  %v5989_v62 = vld [vmem:[#allocation83_spill] sm:$0xff] }
 0x15a   :  { %5781 = vst [vmem:[#allocation91_spill] sm:$0xff] %v3807_v17  ;;  %v5808_v6 = vsel %vm3850_vm12, 4294967295, %v5807_v6  ;;  %v5820_v41 = vunpack.c.h.bf16 %v5805_v3  ;;  %v5821_v38 = vmov 0  ;;  %v5825_v16 = vunpack.c.l.bf16 %v5824_v45  ;;  %v5978_v17 = vld [vmem:[#allocation166_spill] sm:$0xff]  ;;  %v6013_v28 = vld [vmem:[#allocation61_spill] sm:$0xff] }
 0x15b   :  { %5783 = vst [vmem:[#allocation92_spill] sm:$0xff] %v3812_v29  ;;  %v5829_v56 = vunpack.c.h.bf16 %v5824_v45  ;;  %v5830_v51 = vmov 0  ;;  %vm5834_vm14 = vcmp.ge.f32.partialorder %v5833_v58, 0.0  ;;  %v5842_v45 = vld [vmem:[#allocation112_spill] sm:$0xff]  ;;  %v5849_v58 = vmov 0  ;;  %v5970_v29 = vld [vmem:[#allocation119_spill] sm:$0xff] }
 0x15c   :  { %5787 = vst [vmem:[#allocation93_spill] sm:$0xff] %v5786_v36  ;;  %vm3872_vm12 = vcmp.ge.f32.partialorder %v5820_v41, 0.5  ;;  %vm3878_vm15 = vcmp.ge.f32.partialorder %v5825_v16, 0.5  ;;  %v3891_v3 = vsel %vm5834_vm14, %v5663_v43, 1.0  ;;  %v5839_v16 = vld [vmem:[#allocation151_spill] sm:$0xff]  ;;  %1647 = vrcp.f32 %v5842_v45 }
 0x15d   :  { %5792 = vst [vmem:[#allocation94_spill] sm:$0xff] %v5791_v44  ;;  %v5822_v38 = vsel %vm3872_vm12, 4294967295, %v5821_v38  ;;  %vm3884_vm0 = vcmp.ge.f32.partialorder %v5829_v56, 0.5  ;;  %vm5837_vm12 = vcmp.ge.f32.partialorder %v5836_v52, 0.0  ;;  %vm5840_vm8 = vcmp.ge.f32.partialorder %v5839_v16, 0.0  ;;  %v5843_v56 = vld [vmem:[#allocation60_spill] sm:$0xff] }
 0x15e   :  { %5794 = vst [vmem:[#allocation33_spill] sm:$0xff] %v3829_v25  ;;  %v5831_v51 = vsel %vm3884_vm0, 4294967295, %v5830_v51  ;;  %v3896_v41 = vsel %vm5837_vm12, %v5666_v35, 1.0  ;;  %v5848_v43 = vunpack.c.h.bf16 %v5843_v56  ;;  %vm5852_vm12 = vcmp.ge.f32.partialorder %v3451_v2, 0.0  ;;  %v5855_v52 = vld [vmem:[#allocation158_spill] sm:$0xff] }
 0x15f   :  { %5796 = vst [vmem:[#allocation95_spill] sm:$0xff] %v3834_v21  ;;  %v3919_v35 = vsel %vm5852_vm12, %v5681_v22, 1.0  ;;  %v5867_v2 = vmov 0  ;;  %v5910_v63 = vmov 0 }
 0x160   :  { %5799 = vst [vmem:[#allocation96_spill] sm:$0xff] %v3839_v55  ;;  %vm3912_vm14 = vcmp.ge.f32.partialorder %v5848_v43, 0.5  ;;  %v5861_v43 = vld [vmem:[#allocation64_spill] sm:$0xff] }
 0x161   :  { %5804 = vst [vmem:[#allocation38_spill] sm:$0xff] %v5803_v50  ;;  %v5850_v58 = vsel %vm3912_vm14, 4294967295, %v5849_v58  ;;  %v5866_v22 = vunpack.c.h.bf16 %v5861_v43 }
 0x162   :  { %5809 = vst [vmem:[#allocation39_spill] sm:$0xff] %v5808_v6  ;;  %v5826_v6 = vmov 0 }
 0x163   :  { %5813 = vst [vmem:[#allocation44_spill] sm:$0xff] %v3857_v5  ;;  %v5827_v6 = vsel %vm3878_vm15, 4294967295, %v5826_v6  ;;  %vm5858_vm15 = vcmp.ge.f32.partialorder %v3457_v34, 0.0  ;;  %vm3940_vm12 = vcmp.ge.f32.partialorder %v5866_v22, 0.5  ;;  %v5879_v22 = vmov 0 }
 0x164   :  { %5816 = vst [vmem:[#allocation45_spill] sm:$0xff] %v3862_v54  ;;  %v5868_v2 = vsel %vm3940_vm12, 4294967295, %v5867_v2 }
 0x165   :  { %5818 = vst [vmem:[#allocation49_spill] sm:$0xff] %v3867_v15  ;;  %vm5960_vm13 = vnez %v5868_v2  ;;  %v5971_v15 = vld [vmem:[#allocation154_spill] sm:$0xff] }
 0x166   :  { %5823 = vst [vmem:[#allocation50_spill] sm:$0xff] %v5822_v38  ;;  %v5844_v38 = vunpack.c.l.bf16 %v5843_v56  ;;  %v5860_v56 = vld [vmem:[#allocation113_spill] sm:$0xff] }
 0x167   :  { %5828 = vst [vmem:[#allocation51_spill] sm:$0xff] %v5827_v6  ;;  %v3901_v6 = vsel %vm5840_vm8, %v5678_v59, 1.0  ;;  %v5854_v59 = vld [vmem:[#allocation97_spill] sm:$0xff]  ;;  %vm5856_vm8 = vcmp.ge.f32.partialorder %v5855_v52, 0.0  ;;  %1649 = vrcp.f32 %v5860_v56  ;;  %v5877_v52 = vld [vmem:[#allocation71_spill] sm:$0xff] }
 0x168   :  { %5832 = vst [vmem:[#allocation52_spill] sm:$0xff] %v5831_v51  ;;  %vm3906_vm0 = vcmp.ge.f32.partialorder %v5844_v38, 0.5  ;;  %v5845_v51 = vmov 0  ;;  %v3924_v16 = vsel %vm5856_vm8, %v5854_v59, 1.0  ;;  %v3929_v38 = vsel %vm5858_vm15, %v2484_v53, 1.0  ;;  %v5876_v59 = vld [vmem:[#allocation119_spill] sm:$0xff] }
 0x169   :  { %5835 = vst [vmem:[#allocation53_spill] sm:$0xff] %v3891_v3  ;;  %v5846_v51 = vsel %vm3906_vm0, 4294967295, %v5845_v51  ;;  %vm5870_vm8 = vcmp.ge.f32.partialorder %v3460_v46, 0.0  ;;  %vm5872_vm15 = vcmp.ge.f32.partialorder %v3463_v24, 0.0  ;;  %vm5874_vm0 = vcmp.ge.f32.partialorder %v3466_v11, 0.0  ;;  %v5904_v24 = vld [vmem:[#allocation121_spill] sm:$0xff] }
 0x16a   :  { %5838 = vst [vmem:[#allocation148_spill] sm:$0xff] %v3896_v41  ;;  %v3947_v34 = vsel %vm5870_vm8, %v2502_v1, 1.0  ;;  %v3952_v53 = vsel %vm5872_vm15, %v2520_v8, 1.0  ;;  %1651 = vrcp.f32 %v5876_v59  ;;  %v5882_v1 = vunpack.c.h.bf16 %v5877_v52  ;;  %v5908_v59 = vld [vmem:[#allocation122_spill] sm:$0xff]  ;;  %v5919_v11 = vld [vmem:[#allocation65_spill] sm:$0xff] }
 0x16b   :  { %5841 = vst [vmem:[#allocation108_spill] sm:$0xff] %v3901_v6  ;;  %v5883_v46 = vmov 0  ;;  %vm5886_vm15 = vcmp.ge.f32.partialorder %v3469_v57, 0.0  ;;  %v5895_v57 = vmov 0  ;;  %v5957_v3 = vld [vmem:[#allocation142_spill] sm:$0xff]  ;;  %v5961_v6 = vld [vmem:[#allocation144_spill] sm:$0xff] }
 0x16c   :  { %5847 = vst [vmem:[#allocation54_spill] sm:$0xff] %v5846_v51  ;;  %v5862_v51 = vunpack.c.l.bf16 %v5861_v43  ;;  %v5878_v43 = vunpack.c.l.bf16 %v5877_v52  ;;  %vm3968_vm8 = vcmp.ge.f32.partialorder %v5882_v1, 0.5  ;;  %v3975_v8 = vsel %vm5886_vm15, %v2549_v14, 1.0  ;;  %v5892_v52 = vld [vmem:[#allocation120_spill] sm:$0xff]  ;;  %v3986_v1 = vpop.eup %1643  ;;  %v5898_v14 = vld [vmem:[#allocation155_spill] sm:$0xff] }
 0x16d   :  { %5851 = vst [vmem:[#allocation90_spill] sm:$0xff] %v5850_v58  ;;  %v5863_v58 = vmov 0  ;;  %v5884_v46 = vsel %vm3968_vm8, 4294967295, %v5883_v46  ;;  %1653 = vrcp.f32 %v5892_v52  ;;  %v5905_v52 = vld [vmem:[#allocation157_spill] sm:$0xff]  ;;  %v1047_v61 = vmul.f32 %v3986_v1, %v5800_v12 }
 0x16e   :  { %5853 = vst [vmem:[#allocation57_spill] sm:$0xff] %v3919_v35  ;;  %vm3934_vm14 = vcmp.ge.f32.partialorder %v5862_v51, 0.5  ;;  %v3957_v51 = vsel %vm5874_vm0, %v2535_v27, 1.0  ;;  %vm3962_vm12 = vcmp.ge.f32.partialorder %v5878_v43, 0.5  ;;  %1655 = vrcp.f32 %v5904_v24  ;;  %v5906_v27 = vld [vmem:[#allocation159_spill] sm:$0xff]  ;;  %v5941_v43 = vld [vmem:[#allocation137_spill] sm:$0xff] }
 0x16f   :  { %5857 = vst [vmem:[#allocation149_spill] sm:$0xff] %v3924_v16  ;;  %v5864_v58 = vsel %vm3934_vm14, 4294967295, %v5863_v58  ;;  %v5880_v22 = vsel %vm3962_vm12, 4294967295, %v5879_v22  ;;  %1657 = vrcp.f32 %v5908_v59  ;;  %v5946_v40 = vld [vmem:[#allocation51_spill] sm:$0xff]  ;;  %v5949_v21 = vld [vmem:[#allocation52_spill] sm:$0xff]  ;;  %v1079_v5 = vsub.f32 2.0, %v1047_v61 }
 0x170   :  { %5859 = vst [vmem:[#allocation111_spill] sm:$0xff] %v3929_v38  ;;  %vm5947_vm11 = vnez %v5946_v40  ;;  %vm5950_vm1 = vnez %v5949_v21  ;;  %v5969_v38 = vld [vmem:[#allocation150_spill] sm:$0xff]  ;;  %v5972_v21 = vld [vmem:[#allocation120_spill] sm:$0xff] }
 0x171   :  { %5865 = vst [vmem:[#allocation56_spill] sm:$0xff] %v5864_v58 }
 0x172   :  { %5869 = vst [vmem:[#allocation58_spill] sm:$0xff] %v5868_v2 }
 0x173   :  { %5871 = vst [vmem:[#allocation152_spill] sm:$0xff] %v3947_v34 }
 0x174   :  { %5873 = vst [vmem:[#allocation151_spill] sm:$0xff] %v3952_v53  ;;  %v5955_v12 = vld [vmem:[#allocation90_spill] sm:$0xff] }
 0x175   :  { %5875 = vst [vmem:[#allocation112_spill] sm:$0xff] %v3957_v51  ;;  %v5923_v51 = vld [vmem:[#allocation125_spill] sm:$0xff]  ;;  %vm5956_vm9 = vnez %v5955_v12 }
 0x176   :  { %5881 = vst [vmem:[#allocation60_spill] sm:$0xff] %v5880_v22 }
 0x177   :  { %5885 = vst [vmem:[#allocation97_spill] sm:$0xff] %v5884_v46  ;;  %v5893_v46 = vld [vmem:[#allocation78_spill] sm:$0xff] }
 0x178   :  { %5887 = vst [vmem:[#allocation158_spill] sm:$0xff] %v3975_v8  ;;  %v5894_v53 = vunpack.c.l.bf16 %v5893_v46  ;;  %v5909_v0 = vunpack.c.h.bf16 %v5893_v46  ;;  %v5913_v8 = vld [vmem:[#allocation105_spill] sm:$0xff]  ;;  %v5916_v46 = vld [vmem:[#allocation123_spill] sm:$0xff] }
 0x179   :  { %1659 = vrcp.f32 %v5916_v46 }
 0x17a   :  { %vm3990_vm0 = vcmp.ge.f32.partialorder %v5894_v53, 0.5  ;;  %v4007_v53 = vpop.eup %1645  ;;  %vm4026_vm15 = vcmp.ge.f32.partialorder %v5909_v0, 0.5  ;;  %1661 = vrcp.f32 %v5923_v51 }
 0x17b   :  { %v5896_v57 = vsel %vm3990_vm0, 4294967295, %v5895_v57  ;;  %v4022_v60 = vpop.eup %1647  ;;  %v5911_v63 = vsel %vm4026_vm15, 4294967295, %v5910_v63  ;;  %1663 = vrcp.f32 %v5930_v4  ;;  %v1048_v7 = vmul.f32 %v4007_v53, %v5819_v37 }
 0x17c   :  { %5897 = vst [vmem:[#allocation113_spill] sm:$0xff] %v5896_v57  ;;  %v4043_v0 = vpop.eup %1649  ;;  %1665 = vrcp.f32 %v5935_v19  ;;  %v1049_v37 = vmul.f32 %v4022_v60, %v5842_v45  ;;  %v5975_v57 = vld [vmem:[#allocation156_spill] sm:$0xff] }
 0x17d   :  { %5912 = vst [vmem:[#allocation64_spill] sm:$0xff] %v5911_v63  ;;  %v4058_v26 = vpop.eup %1651  ;;  %1667 = vrcp.f32 %v5941_v43  ;;  %v1050_v54 = vmul.f32 %v4043_v0, %v5860_v56  ;;  %v1080_v16 = vsub.f32 2.0, %v1048_v7 }
 0x17e   :  { %v4073_v20 = vpop.eup %1653  ;;  %1669 = vrcp.f32 %v5957_v3  ;;  %v1051_v22 = vmul.f32 %v4058_v26, %v5970_v29  ;;  %v1081_v56 = vsub.f32 2.0, %v1049_v37  ;;  %v1111_v37 = vmul.f32 %v3986_v1, %v1079_v5  ;;  %v5976_v5 = vld [vmem:[#allocation160_spill] sm:$0xff] }
 0x17f   :  { %v4086_v47 = vpop.eup %1655  ;;  %1671 = vrcp.f32 %v5961_v6  ;;  %v1052_v58 = vmul.f32 %v4073_v20, %v5972_v21  ;;  %v1082_v12 = vsub.f32 2.0, %v1050_v54 }
 0x180   :  { %v4099_v55 = vpop.eup %1657  ;;  %1673 = vrcp.f32 %v5966_v30  ;;  %v1053_v7 = vmul.f32 %v4086_v47, %v5904_v24  ;;  %v1112_v24 = vmul.f32 %v4007_v53, %v1080_v16  ;;  %v1083_v25 = vsub.f32 2.0, %v1051_v22 }
 0x181   :  { %v4115_v36 = vpop.eup %1659  ;;  %1675 = vrcp.f32 %v5969_v38  ;;  %v1054_v2 = vmul.f32 %v4099_v55, %v5908_v59  ;;  %v1084_v1 = vsub.f32 2.0, %v1052_v58  ;;  %v1114_v18 = vmul.f32 %v4043_v0, %v1082_v12 }
 0x182   :  { %v4128_v41 = vpop.eup %1661  ;;  %1677 = vrcp.f32 %v5971_v15  ;;  %v1055_v29 = vmul.f32 %v4115_v36, %v5916_v46  ;;  %v1113_v46 = vmul.f32 %v4022_v60, %v1081_v56  ;;  %v1085_v40 = vsub.f32 2.0, %v1053_v7 }
 0x183   :  { %v1664_v35 = vpop.eup %1663  ;;  %1679 = vrcp.f32 %v5975_v57  ;;  %v1056_v21 = vmul.f32 %v4128_v41, %v5923_v51  ;;  %v1086_v16 = vsub.f32 2.0, %v1054_v2  ;;  %v1115_v0 = vmul.f32 %v4058_v26, %v1083_v25  ;;  %v5980_v25 = vld [vmem:[#allocation171_spill] sm:$0xff] }
 0x184   :  { %v1666_v45 = vpop.eup %1665  ;;  %v1057_v54 = vmul.f32 %v1664_v35, %v5930_v4  ;;  %1681 = vrcp.f32 %v5976_v5  ;;  %v1087_v53 = vsub.f32 2.0, %v1055_v29  ;;  %v1116_v2 = vmul.f32 %v4073_v20, %v1084_v1 }
 0x185   :  { %v1668_v34 = vpop.eup %1667  ;;  %v1058_v61 = vmul.f32 %v1666_v45, %v5935_v19  ;;  %1683 = vrcp.f32 %v5977_v13  ;;  %v1088_v60 = vsub.f32 2.0, %v1056_v21  ;;  %v4189_v29 = vmul.f32 %v4086_v47, %v1085_v40 }
 0x186   :  { %v1670_v44 = vpop.eup %1669  ;;  %v1059_v59 = vmul.f32 %v1668_v34, %v5941_v43  ;;  %1685 = vrcp.f32 %v5978_v17  ;;  %v1089_v43 = vsub.f32 2.0, %v1057_v54  ;;  %v4193_v54 = vmul.f32 %v4099_v55, %v1086_v16 }
 0x187   :  { %v1672_v63 = vpop.eup %1671  ;;  %v1060_v4 = vmul.f32 %v1670_v44, %v5957_v3  ;;  %v1090_v58 = vsub.f32 2.0, %v1058_v61  ;;  %1687 = vrcp.f32 %v5979_v10 }
 0x188   :  { %v1674_v50 = vpop.eup %1673  ;;  %v1061_v22 = vmul.f32 %v1672_v63, %v5961_v6  ;;  %v1091_v7 = vsub.f32 2.0, %v1059_v59  ;;  %1689 = vrcp.f32 %v5980_v25  ;;  %v4202_v20 = vmul.f32 %v1664_v35, %v1089_v43  ;;  %v5988_v43 = vld [vmem:[#allocation153_spill] sm:$0xff] }
 0x189   :  { %v1676_v51 = vpop.eup %1675  ;;  %v1062_v56 = vmul.f32 %v1674_v50, %v5966_v30  ;;  %v1092_v21 = vsub.f32 2.0, %v1060_v4  ;;  %v4196_v30 = vmul.f32 %v4115_v36, %v1087_v53  ;;  %v4205_v59 = vmul.f32 %v1666_v45, %v1090_v58  ;;  %v5982_v36 = vld [vmem:[#allocation177_spill] sm:$0xff]  ;;  %v5984_v53 = vld [vmem:[#allocation59_spill] sm:$0xff] }
 0x18a   :  { %v1678_v19 = vpop.eup %1677  ;;  %v1063_v3 = vmul.f32 %v1676_v51, %v5969_v38  ;;  %v1093_v61 = vsub.f32 2.0, %v1061_v22  ;;  %v4200_v38 = vmul.f32 %v4128_v41, %v1088_v60  ;;  %v4207_v55 = vmul.f32 %v1668_v34, %v1091_v7  ;;  %v5985_v22 = vld [vmem:[#allocation82_spill] sm:$0xff]  ;;  %v5991_v45 = vld [vmem:[#allocation181_spill] sm:$0xff] }
 0x18b   :  { %v1680_v12 = vpop.eup %1679  ;;  %v1064_v6 = vmul.f32 %v1678_v19, %v5971_v15  ;;  %v1094_v15 = vsub.f32 2.0, %v1062_v56  ;;  %1691 = vrcp.f32 %v5982_v36  ;;  %v5986_v41 = vsel %vm3594_vm5, %v5984_v53, %v5985_v22  ;;  %v5995_v22 = vld [vmem:[#allocation186_spill] sm:$0xff] }
 0x18c   :  { %v1682_v26 = vpop.eup %1681  ;;  %v1065_v47 = vmul.f32 %v1680_v12, %v5975_v57  ;;  %5981 = vst [vmem:[#allocation71_spill] sm:$0xff] %v4207_v55  ;;  %v1095_v4 = vsub.f32 2.0, %v1063_v3  ;;  %v1143_v60 = vmul.f32 %v1111_v37, %v5986_v41  ;;  %v5990_v57 = vsel %vm3600_vm6, %v5988_v43, %v5989_v62  ;;  %v5992_v55 = vld [vmem:[#allocation182_spill] sm:$0xff]  ;;  %v6003_v37 = vld [vmem:[#allocation88_spill] sm:$0xff] }
 0x18d   :  { %v1684_v40 = vpop.eup %1683  ;;  %v1144_v56 = vmul.f32 %v1112_v24, %v5990_v57  ;;  %1693 = vrcp.f32 %v5991_v45  ;;  %v1066_v34 = vmul.f32 %v1682_v26, %v5976_v5  ;;  %v1096_v58 = vsub.f32 2.0, %v1064_v6  ;;  %v6002_v57 = vld [vmem:[#allocation104_spill] sm:$0xff] }
 0x18e   :  { %v1686_v1 = vpop.eup %1685  ;;  %v4222_v7 = vmul.f32 %v1670_v44, %v1092_v21  ;;  %1695 = vrcp.f32 %v5992_v55  ;;  %v1067_v16 = vmul.f32 %v1684_v40, %v5977_v13  ;;  %v4226_v53 = vmul.f32 %v1672_v63, %v1093_v61  ;;  %v5997_v63 = vld [vmem:[#allocation84_spill] sm:$0xff] }
 0x18f   :  { %v1688_v3 = vpop.eup %1687  ;;  %v5994_v62 = vsel %vm3626_vm2, %v5898_v14, %v3693_v32  ;;  %1697 = vrcp.f32 %v5995_v22  ;;  %v1068_v5 = vmul.f32 %v1686_v1, %v5978_v17  ;;  %v1097_v6 = vsub.f32 2.0, %v1065_v47  ;;  %v5999_v32 = vld [vmem:[#allocation188_spill] sm:$0xff] }
 0x190   :  { %v1145_v24 = vmul.f32 %v1113_v46, %v5994_v62  ;;  %v4235_v44 = vmul.f32 %v1674_v50, %v1094_v15  ;;  %v4237_v21 = vpop.eup %1689  ;;  %v4239_v41 = vmul.f32 %v1676_v51, %v1095_v4  ;;  %v5998_v61 = vsel %vm3632_vm7, %v5900_v49, %v5997_v63  ;;  %v6000_v15 = vld [vmem:[#allocation191_spill] sm:$0xff]  ;;  %v6005_v62 = vld [vmem:[#allocation193_spill] sm:$0xff]  ;;  %v6007_v4 = vld [vmem:[#allocation202_spill] sm:$0xff] }
 0x191   :  { %v1146_v35 = vmul.f32 %v1114_v18, %v5998_v61  ;;  %v1175_v43 = vsub.f32 1.0, %v1143_v60  ;;  %v1176_v14 = vsub.f32 1.0, %v1144_v56  ;;  %1699 = vrcp.f32 %v5999_v32  ;;  %v4250_v50 = vpop.eup %1691 }
 0x192   :  { %v1069_v46 = vmul.f32 %v1688_v3, %v5979_v10  ;;  %v1098_v17 = vsub.f32 2.0, %v1066_v34  ;;  %v4248_v47 = vmul.f32 %v1678_v19, %v1096_v58  ;;  %1701 = vrcp.f32 %v6000_v15 }
 0x193   :  { %v1099_v51 = vsub.f32 2.0, %v1067_v16  ;;  %v6004_v49 = vsel %vm3638_vm3, %v6002_v57, %v6003_v37  ;;  %v1177_v60 = vsub.f32 1.0, %v1145_v24  ;;  %v4258_v56 = vpop.eup %1693  ;;  %1703 = vrcp.f32 %v6005_v62  ;;  %v6015_v37 = vld [vmem:[#allocation207_spill] sm:$0xff] }
 0x194   :  { %v1147_v18 = vmul.f32 %v1115_v0, %v6004_v49  ;;  %v1070_v10 = vmul.f32 %v4237_v21, %v5980_v25  ;;  %v1100_v19 = vsub.f32 2.0, %v1068_v5  ;;  %v4263_v34 = vmul.f32 %v1680_v12, %v1097_v6  ;;  %v4265_v58 = vpop.eup %1695 }
 0x195   :  { %v6006_v16 = vsel %vm3664_vm4, %v5905_v52, %v3726_v42  ;;  %v1178_v0 = vsub.f32 1.0, %v1146_v35  ;;  %v1207_v24 = vmul.f32 %v1175_v43, %v1175_v43  ;;  %v1208_v63 = vmul.f32 %v1176_v14, %v1176_v14  ;;  %v4272_v61 = vpop.eup %1697 }
 0x196   :  { %v1148_v13 = vmul.f32 %v1116_v2, %v6006_v16  ;;  %1705 = vrcp.f32 %v6007_v4  ;;  %v4277_v25 = vmul.f32 %v4250_v50, %v5982_v36  ;;  %v1101_v12 = vsub.f32 2.0, %v1069_v46  ;;  %v6012_v46 = vld [vmem:[#allocation162_spill] sm:$0xff]  ;;  %v6018_v16 = vld [vmem:[#allocation16_spill] sm:$0xff] }
 0x197   :  { %v4279_v5 = vmul.f32 %v1682_v26, %v1098_v17  ;;  %v4281_v6 = vmul.f32 %v1684_v40, %v1099_v51  ;;  %v6009_v42 = vsel %vm3670_vm10, %v5906_v27, %v6008_v9  ;;  %v1179_v2 = vsub.f32 1.0, %v1147_v18  ;;  %v4289_v43 = vpop.eup %1699  ;;  %v6010_v40 = vld [vmem:[#allocation81_spill] sm:$0xff]  ;;  %v6016_v18 = vld [vmem:[#allocation208_spill] sm:$0xff] }
 0x198   :  { %v1149_v52 = vmul.f32 %v4189_v29, %v6009_v42  ;;  %v1209_v35 = vmul.f32 %v1177_v60, %v1177_v60  ;;  %v4293_v36 = vmul.f32 %v4258_v56, %v5991_v45  ;;  %v1102_v14 = vsub.f32 2.0, %v1070_v10  ;;  %v4303_v51 = vpop.eup %1701  ;;  %v6022_v9 = vld [vmem:[#allocation209_spill] sm:$0xff] }
 0x199   :  { %v4295_v26 = vmul.f32 %v1686_v1, %v1100_v19  ;;  %vm6011_vm2 = vnez %v6010_v40  ;;  %v1180_v29 = vsub.f32 1.0, %v1148_v13  ;;  %v1210_v57 = vmul.f32 %v1178_v0, %v1178_v0  ;;  %v4307_v45 = vpop.eup %1703  ;;  %v6017_v19 = vld [vmem:[#allocation15_spill] sm:$0xff] }
 0x19a   :  { %v6014_v17 = vsel %vm6011_vm2, %v6012_v46, %v6013_v28  ;;  %v1239_v49 = vmul.f32 %v1207_v24, %v6015_v37  ;;  %v1240_v60 = vmul.f32 %v1208_v63, %v6016_v18  ;;  %v4311_v1 = vmul.f32 %v4265_v58, %v5992_v55  ;;  %v6026_v37 = vld [vmem:[#allocation17_spill] sm:$0xff]  ;;  %v6030_v18 = vld [vmem:[#allocation63_spill] sm:$0xff] }
 0x19b   :  { %v1150_v27 = vmul.f32 %v4193_v54, %v6014_v17  ;;  %v1103_v10 = vsub.f32 2.0, %v4277_v25  ;;  %vm1307_vm10 = vcmp.lt.s32.totalorder %v6017_v19, 2048  ;;  %vm1308_vm5 = vcmp.lt.s32.totalorder %v6018_v16, 2048  ;;  %v6019_v54 = vld [vmem:[#allocation85_spill] sm:$0xff]  ;;  %v6023_v25 = vld [vmem:[#allocation86_spill] sm:$0xff] }
 0x19c   :  { %vm6020_vm6 = vnez %v6019_v54  ;;  %v1181_v24 = vsub.f32 1.0, %v1149_v52  ;;  %v1211_v63 = vmul.f32 %v1179_v2, %v1179_v2  ;;  %v1241_v42 = vmul.f32 %v1209_v35, %v6022_v9  ;;  %v4323_v40 = vpop.eup %1705 }
 0x19d   :  { %v6021_v13 = vsel %vm6020_vm6, %v5913_v8, %v3759_v33  ;;  %v4325_v55 = vmul.f32 %v1688_v3, %v1101_v12  ;;  %vm6024_vm7 = vnez %v6023_v25  ;;  %v1182_v17 = vsub.f32 1.0, %v1150_v27  ;;  %v6027_v8 = vld [vmem:[#allocation210_spill] sm:$0xff]  ;;  %v6028_v12 = vld [vmem:[#allocation87_spill] sm:$0xff] }
 0x19e   :  { %v1151_v0 = vmul.f32 %v4196_v30, %v6021_v13  ;;  %v6025_v46 = vsel %vm6024_vm7, %v5914_v31, %v3764_v48  ;;  %vm1309_vm3 = vcmp.lt.s32.totalorder %v6026_v37, 2048  ;;  %v1212_v33 = vmul.f32 %v1180_v29, %v1180_v29  ;;  %v6031_v31 = vld [vmem:[#allocation75_spill] sm:$0xff]  ;;  %v6033_v27 = vld [vmem:[#allocation18_spill] sm:$0xff] }
 0x19f   :  { %v1152_v28 = vmul.f32 %v4200_v38, %v6025_v46  ;;  %v1242_v30 = vmul.f32 %v1210_v57, %v6027_v8  ;;  %v1339_v52 = vsel %vm1307_vm10, %v1239_v49, 0.0  ;;  %v1340_v2 = vsel %vm1308_vm5, %v1240_v60, 0.0  ;;  %v6034_v57 = vld [vmem:[#allocation211_spill] sm:$0xff] }
 0x1a0   :  { %v4337_v35 = vmul.f32 %v4272_v61, %v5995_v22  ;;  %v1104_v3 = vsub.f32 2.0, %v4293_v36  ;;  %vm6029_vm4 = vnez %v6028_v12  ;;  %vm1310_vm2 = vcmp.lt.s32.totalorder %v6033_v27, 2048  ;;  %v6035_v22 = vld [vmem:[#allocation62_spill] sm:$0xff]  ;;  %v6038_v13 = vld [vmem:[#allocation19_spill] sm:$0xff]  ;;  %v6050_v12 = vld [vmem:[#allocation89_spill] sm:$0xff] }
 0x1a1   :  { %v6032_v48 = vsel %vm6029_vm4, %v6030_v18, %v6031_v31  ;;  %v1183_v29 = vsub.f32 1.0, %v1151_v0  ;;  %v1213_v19 = vmul.f32 %v1181_v24, %v1181_v24  ;;  %v1243_v49 = vmul.f32 %v1211_v63, %v6034_v57  ;;  %v6039_v0 = vld [vmem:[#allocation127_spill] sm:$0xff] }
 0x1a2   :  { %v1153_v38 = vmul.f32 %v4202_v20, %v6032_v48  ;;  %v1341_v60 = vsel %vm1309_vm3, %v1241_v42, 0.0  ;;  %v4349_v16 = vmul.f32 %v4237_v21, %v1102_v14  ;;  %vm6036_vm10 = vnez %v6035_v22  ;;  %v6040_v21 = vld [vmem:[#allocation68_spill] sm:$0xff]  ;;  %v6057_v22 = vld [vmem:[#allocation91_spill] sm:$0xff] }
 0x1a3   :  { %v6037_v36 = vsel %vm6036_vm10, %v5917_v23, %v3774_v39  ;;  %vm1311_vm5 = vcmp.lt.s32.totalorder %v6038_v13, 2048  ;;  %v1371_v20 = vadd.f32 %v1340_v2, %v1339_v52  ;;  %v1184_v9 = vsub.f32 1.0, %v1152_v28  ;;  %v6042_v14 = vld [vmem:[#allocation80_spill] sm:$0xff]  ;;  %v6044_v23 = vld [vmem:[#allocation71_spill] sm:$0xff]  ;;  %v6047_v2 = vld [vmem:[#allocation69_spill] sm:$0xff] }
 0x1a4   :  { %v1154_v54 = vmul.f32 %v4205_v59, %v6037_v36  ;;  %v1214_v25 = vmul.f32 %v1182_v17, %v1182_v17  ;;  %v1244_v24 = vmul.f32 %v1212_v33, %v6039_v0  ;;  %v1342_v46 = vsel %vm1310_vm2, %v1242_v30, 0.0  ;;  %v6045_v59 = vld [vmem:[#allocation20_spill] sm:$0xff]  ;;  %v6046_v17 = vld [vmem:[#allocation98_spill] sm:$0xff] }
 0x1a5   :  { %v4361_v63 = vmul.f32 %v4289_v43, %v5999_v32  ;;  %vm6041_vm6 = vnez %v6040_v21  ;;  %vm1312_vm7 = vcmp.lt.s32.totalorder %v6045_v59, 2048  ;;  %v1372_v37 = vadd.f32 %v1371_v20, %v1341_v60  ;;  %v6049_v32 = vld [vmem:[#allocation165_spill] sm:$0xff]  ;;  %v6053_v60 = vld [vmem:[#allocation124_spill] sm:$0xff]  ;;  %v6059_v20 = vld [vmem:[#allocation22_spill] sm:$0xff] }
 0x1a6   :  { %v6043_v42 = vsel %vm6041_vm6, %v5919_v11, %v6042_v14  ;;  %v1185_v8 = vsub.f32 1.0, %v1153_v38  ;;  %v1215_v28 = vmul.f32 %v1183_v29, %v1183_v29  ;;  %v1245_v52 = vmul.f32 %v1213_v19, %v6046_v17  ;;  %v6052_v11 = vld [vmem:[#allocation21_spill] sm:$0xff] }
 0x1a7   :  { %v1155_v39 = vmul.f32 %v6044_v23, %v6043_v42  ;;  %v1343_v33 = vsel %vm1311_vm5, %v1243_v49, 0.0  ;;  %v1105_v30 = vsub.f32 2.0, %v4311_v1  ;;  %vm6048_vm3 = vnez %v6047_v2  ;;  %v6054_v49 = vld [vmem:[#allocation76_spill] sm:$0xff]  ;;  %v6056_v1 = vld [vmem:[#allocation170_spill] sm:$0xff] }
 0x1a8   :  { %v6051_v18 = vsel %vm6048_vm3, %v6049_v32, %v6050_v12  ;;  %vm1313_vm4 = vcmp.lt.s32.totalorder %v6052_v11, 2048  ;;  %v1373_v48 = vadd.f32 %v1372_v37, %v1342_v46  ;;  %v1186_v27 = vsub.f32 1.0, %v1154_v54  ;;  %v6060_v54 = vld [vmem:[#allocation128_spill] sm:$0xff]  ;;  %v6067_v37 = vld [vmem:[#allocation129_spill] sm:$0xff] }
 0x1a9   :  { %v1156_v31 = vmul.f32 %v4222_v7, %v6051_v18  ;;  %v1216_v57 = vmul.f32 %v1184_v9, %v1184_v9  ;;  %v1246_v38 = vmul.f32 %v1214_v25, %v6053_v60  ;;  %v1344_v29 = vsel %vm1312_vm7, %v1244_v24, 0.0  ;;  %v6064_v24 = vld [vmem:[#allocation92_spill] sm:$0xff]  ;;  %v6075_v60 = vld [vmem:[#allocation93_spill] sm:$0xff] }
 0x1aa   :  { %v4381_v19 = vmul.f32 %v4250_v50, %v1103_v10  ;;  %vm6055_vm2 = vnez %v6054_v49  ;;  %vm1314_vm10 = vcmp.lt.s32.totalorder %v6059_v20, 2048  ;;  %v1374_v7 = vadd.f32 %v1373_v48, %v1343_v33  ;;  %v6061_v50 = vld [vmem:[#allocation77_spill] sm:$0xff]  ;;  %v6063_v10 = vld [vmem:[#allocation66_spill] sm:$0xff]  ;;  %v6073_v12 = vld [vmem:[#allocation24_spill] sm:$0xff] }
 0x1ab   :  { %v6058_v36 = vsel %vm6055_vm2, %v6056_v1, %v6057_v22  ;;  %v1187_v0 = vsub.f32 1.0, %v1155_v39  ;;  %v1217_v46 = vmul.f32 %v1185_v8, %v1185_v8  ;;  %v1247_v9 = vmul.f32 %v1215_v28, %v6060_v54  ;;  %v6071_v33 = vld [vmem:[#allocation33_spill] sm:$0xff]  ;;  %v6074_v48 = vld [vmem:[#allocation99_spill] sm:$0xff] }
 0x1ac   :  { %v1157_v13 = vmul.f32 %v4226_v53, %v6058_v36  ;;  %v1345_v21 = vsel %vm1313_vm4, %v1245_v52, 0.0  ;;  %v4393_v25 = vmul.f32 %v4303_v51, %v6000_v15  ;;  %vm6062_vm5 = vnez %v6061_v50  ;;  %v6066_v53 = vld [vmem:[#allocation23_spill] sm:$0xff]  ;;  %v6070_v15 = vld [vmem:[#allocation168_spill] sm:$0xff]  ;;  %v6080_v1 = vld [vmem:[#allocation25_spill] sm:$0xff] }
 0x1ad   :  { %v6065_v14 = vsel %vm6062_vm5, %v6063_v10, %v6064_v24  ;;  %vm1315_vm6 = vcmp.lt.s32.totalorder %v6066_v53, 2048  ;;  %v1375_v23 = vadd.f32 %v1374_v7, %v1344_v29  ;;  %v1188_v59 = vsub.f32 1.0, %v1156_v31  ;;  %v6068_v52 = vld [vmem:[#allocation79_spill] sm:$0xff]  ;;  %v6088_v24 = vld [vmem:[#allocation130_spill] sm:$0xff] }
 0x1ae   :  { %v1158_v42 = vmul.f32 %v4235_v44, %v6065_v14  ;;  %v1218_v39 = vmul.f32 %v1186_v27, %v1186_v27  ;;  %v1248_v8 = vmul.f32 %v1216_v57, %v6067_v37  ;;  %v1346_v28 = vsel %vm1314_vm10, %v1246_v38, 0.0  ;;  %v6078_v38 = vld [vmem:[#allocation95_spill] sm:$0xff] }
 0x1af   :  { %v1106_v17 = vsub.f32 2.0, %v4337_v35  ;;  %vm6069_vm7 = vnez %v6068_v52  ;;  %vm1316_vm3 = vcmp.lt.s32.totalorder %v6073_v12, 2048  ;;  %v1376_v44 = vadd.f32 %v1375_v23, %v1345_v21  ;;  %v6077_v35 = vld [vmem:[#allocation173_spill] sm:$0xff]  ;;  %v6089_v23 = vld [vmem:[#allocation38_spill] sm:$0xff]  ;;  %v6096_v12 = vld [vmem:[#allocation39_spill] sm:$0xff] }
 0x1b0   :  { %v6072_v2 = vsel %vm6069_vm7, %v6070_v15, %v6071_v33  ;;  %v1189_v18 = vsub.f32 1.0, %v1157_v13  ;;  %v1219_v11 = vmul.f32 %v1187_v0, %v1187_v0  ;;  %v1249_v31 = vmul.f32 %v1217_v46, %v6074_v48  ;;  %v6081_v13 = vld [vmem:[#allocation131_spill] sm:$0xff]  ;;  %v6085_v46 = vld [vmem:[#allocation96_spill] sm:$0xff] }
 0x1b1   :  { %v1159_v32 = vmul.f32 %v4239_v41, %v6072_v2  ;;  %v1347_v27 = vsel %vm1315_vm6, %v1247_v9, 0.0  ;;  %v4413_v57 = vmul.f32 %v4258_v56, %v1104_v3  ;;  %vm6076_vm4 = vnez %v6075_v60  ;;  %v6082_v56 = vld [vmem:[#allocation94_spill] sm:$0xff]  ;;  %v6084_v3 = vld [vmem:[#allocation172_spill] sm:$0xff] }
 0x1b2   :  { %v6079_v29 = vsel %vm6076_vm4, %v6077_v35, %v6078_v38  ;;  %vm1317_vm2 = vcmp.lt.s32.totalorder %v6080_v1, 2048  ;;  %v1377_v41 = vadd.f32 %v1376_v44, %v1346_v28  ;;  %v1190_v22 = vsub.f32 1.0, %v1158_v42  ;;  %v6095_v15 = vld [vmem:[#allocation100_spill] sm:$0xff]  ;;  %v6099_v44 = vld [vmem:[#allocation45_spill] sm:$0xff]  ;;  %v6102_v60 = vld [vmem:[#allocation138_spill] sm:$0xff] }
 0x1b3   :  { %v1160_v49 = vmul.f32 %v4248_v47, %v6079_v29  ;;  %v1220_v36 = vmul.f32 %v1188_v59, %v1188_v59  ;;  %v1250_v20 = vmul.f32 %v1218_v39, %v6081_v13  ;;  %v1348_v7 = vsel %vm1316_vm3, %v1248_v8, 0.0  ;;  %v6087_v47 = vld [vmem:[#allocation26_spill] sm:$0xff]  ;;  %v6092_v59 = vld [vmem:[#allocation44_spill] sm:$0xff]  ;;  %v6094_v8 = vld [vmem:[#allocation27_spill] sm:$0xff] }
 0x1b4   :  { %v4425_v0 = vmul.f32 %v4307_v45, %v6005_v62  ;;  %vm6083_vm10 = vnez %v6082_v56  ;;  %vm1318_vm5 = vcmp.lt.s32.totalorder %v6087_v47, 2048  ;;  %v1378_v21 = vadd.f32 %v1377_v41, %v1347_v27  ;;  %v6091_v62 = vld [vmem:[#allocation67_spill] sm:$0xff]  ;;  %v6101_v48 = vld [vmem:[#allocation28_spill] sm:$0xff] }
 0x1b5   :  { %v6086_v54 = vsel %vm6083_vm10, %v6084_v3, %v6085_v46  ;;  %v1191_v50 = vsub.f32 1.0, %v1159_v32  ;;  %v1221_v10 = vmul.f32 %v1189_v18, %v1189_v18  ;;  %v1251_v14 = vmul.f32 %v1219_v11, %v6088_v24  ;;  %v6115_v24 = vld [vmem:[#allocation135_spill] sm:$0xff] }
 0x1b6   :  { %v1161_v9 = vmul.f32 %v4263_v34, %v6086_v54  ;;  %v1349_v42 = vsel %vm1317_vm2, %v1249_v31, 0.0  ;;  %v1107_v53 = vsub.f32 2.0, %v4361_v63  ;;  %vm6090_vm6 = vnez %v6089_v23  ;;  %v6098_v63 = vld [vmem:[#allocation174_spill] sm:$0xff]  ;;  %v6112_v54 = vld [vmem:[#allocation53_spill] sm:$0xff]  ;;  %v6139_v46 = vld [vmem:[#allocation35_spill] sm:$0xff] }
 0x1b7   :  { %v6093_v39 = vsel %vm6090_vm6, %v6091_v62, %v6092_v59  ;;  %vm1319_vm7 = vcmp.lt.s32.totalorder %v6094_v8, 2048  ;;  %v1379_v34 = vadd.f32 %v1378_v21, %v1348_v7  ;;  %v1192_v28 = vsub.f32 1.0, %v1160_v49  ;;  %v6106_v49 = vld [vmem:[#allocation49_spill] sm:$0xff]  ;;  %v6114_v21 = vld [vmem:[#allocation30_spill] sm:$0xff]  ;;  %v6118_v59 = vld [vmem:[#allocation148_spill] sm:$0xff] }
 0x1b8   :  { %v1162_v37 = vmul.f32 %v4279_v5, %v6093_v39  ;;  %v1222_v52 = vmul.f32 %v1190_v22, %v1190_v22  ;;  %v1252_v33 = vmul.f32 %v1220_v36, %v6095_v15  ;;  %v1350_v2 = vsel %vm1318_vm5, %v1250_v20, 0.0  ;;  %v6109_v20 = vld [vmem:[#allocation101_spill] sm:$0xff]  ;;  %v6120_v8 = vld [vmem:[#allocation31_spill] sm:$0xff] }
 0x1b9   :  { %v1137_v32 = vmul.f32 %v4265_v58, %v1105_v30  ;;  %vm6097_vm3 = vnez %v6096_v12  ;;  %vm1320_vm4 = vcmp.lt.s32.totalorder %v6101_v48, 2048  ;;  %v1380_v5 = vadd.f32 %v1379_v34, %v1349_v42  ;;  %v6103_v58 = vld [vmem:[#allocation50_spill] sm:$0xff]  ;;  %v6105_v30 = vld [vmem:[#allocation175_spill] sm:$0xff] }
 0x1ba   :  { %v6100_v18 = vsel %vm6097_vm3, %v6098_v63, %v6099_v44  ;;  %v1193_v31 = vsub.f32 1.0, %v1161_v9  ;;  %v1223_v27 = vmul.f32 %v1191_v50, %v1191_v50  ;;  %v1253_v35 = vmul.f32 %v1221_v10, %v6102_v60  ;;  %v6122_v12 = vld [vmem:[#allocation54_spill] sm:$0xff] }
 0x1bb   :  { %v1163_v11 = vmul.f32 %v4281_v6, %v6100_v18  ;;  %v1351_v38 = vsel %vm1319_vm7, %v1251_v14, 0.0  ;;  %v4455_v29 = vmul.f32 %v4323_v40, %v6007_v4  ;;  %vm6104_vm2 = vnez %v6103_v58  ;;  %v6108_v6 = vld [vmem:[#allocation29_spill] sm:$0xff]  ;;  %v6111_v4 = vld [vmem:[#allocation176_spill] sm:$0xff] }
 0x1bc   :  { %v6107_v1 = vsel %vm6104_vm2, %v6105_v30, %v6106_v49  ;;  %vm1321_vm10 = vcmp.lt.s32.totalorder %v6108_v6, 2048  ;;  %v1381_v22 = vadd.f32 %v1380_v5, %v1350_v2  ;;  %v1194_v36 = vsub.f32 1.0, %v1162_v37  ;;  %v6127_v18 = vld [vmem:[#allocation32_spill] sm:$0xff]  ;;  %v6128_v5 = vld [vmem:[#allocation143_spill] sm:$0xff]  ;;  %v6133_v49 = vld [vmem:[#allocation34_spill] sm:$0xff] }
 0x1bd   :  { %v1164_v41 = vmul.f32 %v4295_v26, %v6107_v1  ;;  %v1224_v13 = vmul.f32 %v1192_v28, %v1192_v28  ;;  %v1254_v7 = vmul.f32 %v1222_v52, %v6109_v20  ;;  %v1352_v56 = vsel %vm1320_vm4, %v1252_v33, 0.0  ;;  %v6121_v52 = vld [vmem:[#allocation136_spill] sm:$0xff]  ;;  %v6134_v6 = vld [vmem:[#allocation102_spill] sm:$0xff] }
 0x1be   :  { %v1108_v3 = vsub.f32 2.0, %v4393_v25  ;;  %v6113_v9 = vsel %vm5947_vm11, %v6111_v4, %v6112_v54  ;;  %vm1322_vm5 = vcmp.lt.s32.totalorder %v6114_v21, 2048  ;;  %v1382_v26 = vadd.f32 %v1381_v22, %v1351_v38  ;;  %v6117_v25 = vld [vmem:[#allocation107_spill] sm:$0xff]  ;;  %v6131_v38 = vld [vmem:[#allocation57_spill] sm:$0xff]  ;;  %v6174_v20 = vld [vmem:[#allocation72_spill] sm:$0xff] }
 0x1bf   :  { %v1165_v47 = vmul.f32 %v4325_v55, %v6113_v9  ;;  %v1195_v50 = vsub.f32 1.0, %v1163_v11  ;;  %v1225_v10 = vmul.f32 %v1193_v31, %v1193_v31  ;;  %v1255_v14 = vmul.f32 %v1223_v27, %v6115_v24  ;;  %v6140_v9 = vld [vmem:[#allocation140_spill] sm:$0xff] }
 0x1c0   :  { %v1353_v42 = vsel %vm1321_vm10, %v1253_v35, 0.0  ;;  %v1138_v23 = vmul.f32 %v4272_v61, %v1106_v17  ;;  %v6119_v39 = vsel %vm5950_vm1, %v6117_v25, %v6118_v59  ;;  %vm1323_vm11 = vcmp.lt.s32.totalorder %v6120_v8, 2048  ;;  %v6124_v61 = vld [vmem:[#allocation185_spill] sm:$0xff]  ;;  %v6125_v17 = vld [vmem:[#allocation108_spill] sm:$0xff]  ;;  %v6150_v8 = vld [vmem:[#allocation139_spill] sm:$0xff] }
 0x1c1   :  { %v1166_v37 = vmul.f32 %v4349_v16, %v6119_v39  ;;  %v1383_v55 = vadd.f32 %v1382_v26, %v1352_v56  ;;  %v1196_v34 = vsub.f32 1.0, %v1164_v41  ;;  %v1226_v28 = vmul.f32 %v1194_v36, %v1194_v36  ;;  %v6165_v35 = vld [vmem:[#allocation40_spill] sm:$0xff] }
 0x1c2   :  { %v1256_v15 = vmul.f32 %v1224_v13, %v6121_v52  ;;  %v1354_v33 = vsel %vm1322_vm5, %v1254_v7, 0.0  ;;  %v1109_v2 = vsub.f32 2.0, %v4425_v0  ;;  %vm6123_vm6 = vnez %v6122_v12  ;;  %v6130_v0 = vld [vmem:[#allocation110_spill] sm:$0xff]  ;;  %v6211_v59 = vld [vmem:[#allocation212_spill] sm:$0xff] }
 0x1c3   :  { %v6126_v63 = vsel %vm6123_vm6, %v6124_v61, %v6125_v17  ;;  %vm1324_vm1 = vcmp.lt.s32.totalorder %v6127_v18, 2048  ;;  %v1384_v16 = vadd.f32 %v1383_v55, %v1353_v42  ;;  %v1197_v11 = vsub.f32 1.0, %v1165_v47  ;;  %v6145_v42 = vld [vmem:[#allocation36_spill] sm:$0xff]  ;;  %v6156_v61 = vld [vmem:[#allocation109_spill] sm:$0xff] }
 0x1c4   :  { %v1167_v44 = vmul.f32 %v4381_v19, %v6126_v63  ;;  %v1227_v48 = vmul.f32 %v1195_v50, %v1195_v50  ;;  %v1257_v31 = vmul.f32 %v1225_v10, %v6128_v5  ;;  %v1355_v27 = vsel %vm1323_vm11, %v1255_v14, 0.0  ;;  %v6142_v10 = vld [vmem:[#allocation183_spill] sm:$0xff]  ;;  %v6162_v5 = vld [vmem:[#allocation190_spill] sm:$0xff] }
 0x1c5   :  { %v1139_v60 = vmul.f32 %v4289_v43, %v1107_v53  ;;  %v6132_v58 = vsel %vm5956_vm9, %v6130_v0, %v6131_v38  ;;  %vm1325_vm7 = vcmp.lt.s32.totalorder %v6133_v49, 2048  ;;  %v1385_v19 = vadd.f32 %v1384_v16, %v1354_v33  ;;  %v6136_v43 = vld [vmem:[#allocation180_spill] sm:$0xff]  ;;  %v6137_v53 = vld [vmem:[#allocation149_spill] sm:$0xff]  ;;  %v6182_v50 = vld [vmem:[#allocation198_spill] sm:$0xff] }
 0x1c6   :  { %v1168_v30 = vmul.f32 %v4413_v57, %v6132_v58  ;;  %v1198_v1 = vsub.f32 1.0, %v1166_v37  ;;  %v1228_v41 = vmul.f32 %v1196_v34, %v1196_v34  ;;  %v1258_v22 = vmul.f32 %v1226_v28, %v6134_v6  ;;  %v6152_v28 = vld [vmem:[#allocation189_spill] sm:$0xff]  ;;  %v6170_v6 = vld [vmem:[#allocation195_spill] sm:$0xff] }
 0x1c7   :  { %v1356_v36 = vsel %vm1324_vm1, %v1256_v15, 0.0  ;;  %v1110_v13 = vsub.f32 2.0, %v4455_v29  ;;  %v6138_v7 = vsel %vm3934_vm14, %v6136_v43, %v6137_v53  ;;  %vm1326_vm9 = vcmp.lt.s32.totalorder %v6139_v46, 2048  ;;  %v6143_v29 = vld [vmem:[#allocation111_spill] sm:$0xff]  ;;  %v6155_v33 = vld [vmem:[#allocation37_spill] sm:$0xff]  ;;  %v6175_v43 = vld [vmem:[#allocation112_spill] sm:$0xff] }
 0x1c8   :  { %v1169_v56 = vmul.f32 %v1137_v32, %v6138_v7  ;;  %v1386_v4 = vadd.f32 %v1385_v19, %v1355_v27  ;;  %v1199_v57 = vsub.f32 1.0, %v1167_v44  ;;  %v1229_v54 = vmul.f32 %v1197_v11, %v1197_v11  ;;  %v6146_v32 = vld [vmem:[#allocation106_spill] sm:$0xff]  ;;  %v6160_v16 = vld [vmem:[#allocation145_spill] sm:$0xff] }
 0x1c9   :  { %v1259_v47 = vmul.f32 %v1227_v48, %v6140_v9  ;;  %v1357_v21 = vsel %vm1325_vm7, %v1257_v31, 0.0  ;;  %v1140_v26 = vmul.f32 %v4303_v51, %v1108_v3  ;;  %v6144_v24 = vsel %vm5960_vm13, %v6142_v10, %v6143_v29  ;;  %v6163_v31 = vld [vmem:[#allocation151_spill] sm:$0xff]  ;;  %v6183_v10 = vld [vmem:[#allocation197_spill] sm:$0xff] }
 0x1ca   :  { %v1170_v14 = vmul.f32 %v1138_v23, %v6144_v24  ;;  %vm1327_vm3 = vcmp.lt.s32.totalorder %v6145_v42, 2048  ;;  %v1387_v62 = vadd.f32 %v1386_v4, %v1356_v36  ;;  %v6147_v25 = vand.u32 2147483647, %v6146_v32  ;;  %v6153_v23 = vld [vmem:[#allocation152_spill] sm:$0xff]  ;;  %v6186_v42 = vld [vmem:[#allocation73_spill] sm:$0xff] }
 0x1cb   :  { %v1200_v39 = vsub.f32 1.0, %v1168_v30  ;;  %v1230_v37 = vmul.f32 %v1198_v1, %v1198_v1  ;;  %v1260_v55 = vmul.f32 %v1228_v41, %v6150_v8  ;;  %v1358_v51 = vsel %vm1326_vm9, %v1258_v22, 0.0  ;;  %v6166_v30 = vld [vmem:[#allocation103_spill] sm:$0xff]  ;;  %v6167_v1 = vld [vmem:[#allocation74_spill] sm:$0xff]  ;;  %v6168_v41 = vld [vmem:[#allocation192_spill] sm:$0xff] }
 0x1cc   :  { %vm4518_vm14 = vcmp.lt.f32.partialorder %v6147_v25, 0.0004427343  ;;  %v1141_v3 = vmul.f32 %v4307_v45, %v1109_v2  ;;  %v6154_v52 = vsel %vm3962_vm12, %v6152_v28, %v6153_v23  ;;  %vm1328_vm13 = vcmp.lt.s32.totalorder %v6155_v33, 2048  ;;  %v6171_v22 = vld [vmem:[#allocation194_spill] sm:$0xff]  ;;  %v6195_v33 = vld [vmem:[#allocation201_spill] sm:$0xff] }
 0x1cd   :  { %v1171_v15 = vmul.f32 %v1139_v60, %v6154_v52  ;;  %v1388_v12 = vadd.f32 %v1387_v62, %v1357_v21  ;;  %v6157_v17 = vand.u32 2147483647, %v6156_v61  ;;  %v1201_v44 = vsub.f32 1.0, %v1169_v56  ;;  %v6177_v56 = vld [vmem:[#allocation41_spill] sm:$0xff]  ;;  %v6179_v21 = vld [vmem:[#allocation114_spill] sm:$0xff]  ;;  %v6192_v52 = vld [vmem:[#allocation115_spill] sm:$0xff] }
 0x1ce   :  { %v1231_v18 = vmul.f32 %v1199_v57, %v1199_v57  ;;  %v1261_v11 = vmul.f32 %v1229_v54, %v6160_v16  ;;  %v1359_v45 = vsel %vm1327_vm3, %v1259_v47, 0.0  ;;  %v1142_v2 = vmul.f32 %v4323_v40, %v1110_v13  ;;  %v6178_v54 = vld [vmem:[#allocation141_spill] sm:$0xff]  ;;  %v6187_v62 = vld [vmem:[#allocation158_spill] sm:$0xff] }
 0x1cf   :  { %vm4532_vm4 = vcmp.lt.f32.partialorder %v6157_v17, 0.0004427343  ;;  %v6164_v27 = vsel %vm3968_vm8, %v6162_v5, %v6163_v31  ;;  %vm1329_vm12 = vcmp.lt.s32.totalorder %v6165_v35, 2048  ;;  %v1389_v0 = vadd.f32 %v1388_v12, %v1358_v51  ;;  %v6190_v51 = vld [vmem:[#allocation147_spill] sm:$0xff]  ;;  %v6191_v28 = vld [vmem:[#allocation134_spill] sm:$0xff]  ;;  %v6196_v12 = vld [vmem:[#allocation200_spill] sm:$0xff] }
 0x1d0   :  { %v1172_v60 = vmul.f32 %v1140_v26, %v6164_v27  ;;  %v1202_v38 = vsub.f32 1.0, %v1170_v14  ;;  %v1232_v58 = vmul.f32 %v1200_v39, %v1200_v39  ;;  %v1262_v49 = vmul.f32 %v1230_v37, %v6166_v30  ;;  %v6180_v26 = vld [vmem:[#allocation196_spill] sm:$0xff]  ;;  %v6189_v39 = vld [vmem:[#allocation42_spill] sm:$0xff]  ;;  %v6199_v48 = vld [vmem:[#allocation133_spill] sm:$0xff] }
 0x1d1   :  { %v1360_v19 = vsel %vm1328_vm13, %v1260_v55, 0.0  ;;  %vm6169_vm2 = vnez %v6168_v41  ;;  %v6176_v53 = vsel %vm3990_vm0, %v6174_v20, %v6175_v43  ;;  %vm1330_vm8 = vcmp.lt.s32.totalorder %v6177_v56, 2048  ;;  %v6200_v5 = vld [vmem:[#allocation206_spill] sm:$0xff]  ;;  %v6201_v27 = vld [vmem:[#allocation116_spill] sm:$0xff]  ;;  %v6204_v35 = vld [vmem:[#allocation205_spill] sm:$0xff] }
 0x1d2   :  { %v6172_v40 = vsel %vm6169_vm2, %v6170_v6, %v6171_v22  ;;  %v1173_v7 = vmul.f32 %v1141_v3, %v6176_v53  ;;  %v1390_v46 = vadd.f32 %v1389_v0, %v1359_v45  ;;  %v1203_v4 = vsub.f32 1.0, %v1171_v15  ;;  %v6193_v15 = vld [vmem:[#allocation199_spill] sm:$0xff]  ;;  %v6205_v0 = vld [vmem:[#allocation204_spill] sm:$0xff]  ;;  %v6207_v30 = vld [vmem:[#allocation46_spill] sm:$0xff] }
 0x1d3   :  { %v817_v36 = vadd.f32 %v6172_v40, %v6167_v1  ;;  %v1233_v57 = vmul.f32 %v1201_v44, %v1201_v44  ;;  %v1263_v9 = vmul.f32 %v1231_v18, %v6178_v54  ;;  %v1361_v47 = vsel %vm1329_vm12, %v1261_v11, 0.0  ;;  %v6198_v44 = vld [vmem:[#allocation43_spill] sm:$0xff]  ;;  %v6208_v22 = vld [vmem:[#allocation12_spill] sm:$0xff]  ;;  %v6214_v54 = vld [vmem:[#allocation13_spill] sm:$0xff] }
 0x1d4   :  { %vm6181_vm10 = vnez %v6180_v26  ;;  %v6188_v32 = vsel %vm4026_vm15, %v6186_v42, %v6187_v62  ;;  %vm1331_vm0 = vcmp.lt.s32.totalorder %v6189_v39, 2048  ;;  %v1391_v37 = vadd.f32 %v1390_v46, %v1360_v19  ;;  %v6212_v43 = vld [vmem:[#allocation47_spill] sm:$0xff]  ;;  %v6218_v14 = vld [vmem:[#allocation14_spill] sm:$0xff] }
 0x1d5   :  { %v6184_v29 = vsel %vm6181_vm10, %v6182_v50, %v6183_v10  ;;  %v1174_v25 = vmul.f32 %v1142_v2, %v6188_v32  ;;  %v1204_v8 = vsub.f32 1.0, %v1172_v60  ;;  %v1234_v55 = vmul.f32 %v1202_v38, %v1202_v38  ;;  %v6202_v60 = vld [vmem:[#allocation203_spill] sm:$0xff]  ;;  %v6217_v50 = vld [vmem:[#allocation118_spill] sm:$0xff] }
 0x1d6   :  { %v818_v24 = vadd.f32 %v6184_v29, %v6179_v21  ;;  %v1264_v3 = vmul.f32 %v1232_v58, %v6190_v51  ;;  %v1362_v34 = vsel %vm1330_vm8, %v1262_v49, 0.0  ;;  %v784_v23 = vmul.f32 0.6931472, %v6191_v28  ;;  %v6216_v21 = vld [vmem:[#allocation48_spill] sm:$0xff] }
 0x1d7   :  { %vm6194_vm5 = vnez %v6193_v15  ;;  %vm1332_vm15 = vcmp.lt.s32.totalorder %v6198_v44, 2048  ;;  %v1392_v18 = vadd.f32 %v1391_v37, %v1361_v47  ;;  %v1205_v16 = vsub.f32 1.0, %v1173_v7  ;;  %v6213_v7 = vld [vmem:[#allocation117_spill] sm:$0xff] }
 0x1d8   :  { %v6197_v61 = vsel %vm6194_vm5, %v6195_v33, %v6196_v12  ;;  %v1235_v11 = vmul.f32 %v1203_v4, %v1203_v4  ;;  %v1265_v45 = vmul.f32 %v1233_v57, %v817_v36  ;;  %v1363_v2 = vsel %vm1331_vm0, %v1263_v9, 0.0  ;;  %v6210_v36 = vld [vmem:[#allocation11_spill] sm:$0xff] }
 0x1d9   :  { %v819_v17 = vadd.f32 %v6197_v61, %v6192_v52  ;;  %v781_v31 = vsel %vm4518_vm14, %v6200_v5, %v6199_v48  ;;  %vm6203_vm11 = vnez %v6202_v60  ;;  %vm1333_vm6 = vcmp.lt.s32.totalorder %v6207_v30, 2048 }
 0x1da   :  { %v6206_v38 = vsel %vm6203_vm11, %v6204_v35, %v6205_v0  ;;  %v1393_v49 = vadd.f32 %v1392_v18, %v1362_v34  ;;  %v1206_v19 = vsub.f32 1.0, %v1174_v25  ;;  %v1236_v1 = vmul.f32 %v1204_v8, %v1204_v8 }
 0x1db   :  { %v820_v58 = vadd.f32 %v6206_v38, %v6201_v27  ;;  %v1266_v41 = vmul.f32 %v1234_v55, %v818_v24  ;;  %v1364_v6 = vsel %vm1332_vm15, %v1264_v3, 0.0  ;;  %v6209_v40 = vmul.u32 128, %v6208_v22 }
 0x1dc   :  { %v790_v20 = vsel %vm4532_vm4, %v6211_v59, %v784_v23  ;;  %vm1334_vm1 = vcmp.lt.s32.totalorder %v6212_v43, 2048  ;;  %v1394_v53 = vadd.f32 %v1393_v49, %v1363_v2  ;;  %v821_v56 = vadd.f32 %v781_v31, %v6213_v7 }
 0x1dd   :  { %v180_v13 = vadd.s32 %v6210_v36, %v6209_v40  ;;  %v1237_v46 = vmul.f32 %v1205_v16, %v1205_v16  ;;  %v1267_v4 = vmul.f32 %v1235_v11, %v819_v17  ;;  %v1365_v57 = vsel %vm1333_vm6, %v1265_v45, 0.0 }
 0x1de   :  { %v6215_v9 = vmul.u32 128, %v6214_v54  ;;  %vm1335_vm7 = vcmp.lt.s32.totalorder %v6216_v21, 2048  ;;  %v1395_v26 = vadd.f32 %v1394_v53, %v1364_v6  ;;  %v822_v10 = vadd.f32 %v790_v20, %v6217_v50 }
 0x1df   :  { %v1238_v29 = vmul.f32 %v1206_v19, %v1206_v19  ;;  %v1268_v63 = vmul.f32 %v1236_v1, %v820_v58  ;;  %v1366_v24 = vsel %vm1334_vm1, %v1266_v41, 0.0  ;;  %v6219_v42 = vmul.u32 128, %v6218_v14 }
 0x1e0   :  { %v181_v47 = vadd.s32 %v6210_v36, %v6215_v9  ;;  %vm1336_vm9 = vcmp.lt.s32.totalorder %v180_v13, 2048  ;;  %v1396_v32 = vadd.f32 %v1395_v26, %v1365_v57  ;;  %v1269_v25 = vmul.f32 %v1237_v46, %v821_v56 }
 0x1e1   :  { %v182_v62 = vadd.s32 %v6210_v36, %v6219_v42  ;;  %v1367_v39 = vsel %vm1335_vm7, %v1267_v4, 0.0  ;;  %v1270_v8 = vmul.f32 %v1238_v29, %v822_v10  ;;  %v1368_v55 = vsel %vm1336_vm9, %v1268_v63, 0.0 }
 0x1e2   :  { %vm1337_vm3 = vcmp.lt.s32.totalorder %v181_v47, 2048  ;;  %v1397_v37 = vadd.f32 %v1396_v32, %v1366_v24 }
 0x1e3   :  { %vm1338_vm14 = vcmp.lt.s32.totalorder %v182_v62, 2048  ;;  %v1369_v3 = vsel %vm1337_vm3, %v1269_v25, 0.0 }
 0x1e4   :  { %v1398_v51 = vadd.f32 %v1397_v37, %v1367_v39  ;;  %v1370_v28 = vsel %vm1338_vm14, %v1270_v8, 0.0 }
 0x1e6   :  { %v1399_v34 = vadd.f32 %v1398_v51, %v1368_v55 }
 0x1e8   :  { %v1400_v23 = vadd.f32 %v1399_v34, %v1369_v3 }
 0x1ea   :  { %v1401_v52 = vadd.f32 %v1400_v23, %v1370_v28 }
 0x1ec   :  { %1405 = vst [vmem:[#allocation7] sm:$0xff] %v1401_v52 }
 0x1ed   :  { %1416 = dma.vmem_to_hbm [thread:$0]  %s1412_s1, 128, %s1414_s25, [#allocation4]  }
 0x1ee   :  { %1815 = dma.done.wait [#allocation4], 128  }
 0x1ef   :  { %1816 = vsyncadd [#allocation4], 4294967168 }
 0x1f0   :  { %1421 = vsyncpa [#allocation3], 1 }
 0x1f1   :  { %1422 = vsyncpa [#allocation6], 1 }
 0x1f2   :  { %1423 = vsyncpa [#allocation4], 1 }

</bundles_post_ra>
